<compile_context>
chip_gen: v7x
topology: tpu7x:2x2x1
jax: 0.10.0
libtpu: 0.0.40
codegen_flags: <defaults>
</compile_context>

<pallas_src>
import numpy as np
import jax
import jax.numpy as jnp
from jax.experimental import pallas as pl
from jax.experimental.pallas import tpu as pltpu

NODE_TYPES = ("Process", "File", "Port")
EDGE_TYPES = (
    ("Process", "access", "File"),
    ("File", "rev_access", "Process"),
    ("Process", "same_as", "File"),
    ("File", "rev_same_as", "Process"),
    ("Process", "bind", "Port"),
    ("Port", "rev_bind", "Process"),
    ("Port", "session", "Port"),
    ("Port", "rev_session", "Port"),
    ("Process", "create", "Process"),
    ("Process", "rev_create", "Process"),
)
NUM_EDGE_TYPES = len(EDGE_TYPES)

LANE = 128
SUBLANE = 8

_VMEM = pl.BlockSpec(memory_space=pltpu.MemorySpace.VMEM)


def _pad_to(n, m):
    return ((n + m - 1) // m) * m


# ------------------------------ fused Pallas kernel ------------------------------

def _make_kernel(n_act):
    """Kernel factory; n_act = dict of real (unpadded) node counts per type (Python ints)."""
    n_t = len(NODE_TYPES)
    n_e = len(EDGE_TYPES)

    def kernel(*refs):
        # input layout (all whole-array VMEM blocks):
        #   [x_Process, x_File, x_Port]                      3  (n_pad_t, D_pad) f32
        #   [adj block per edge type, EDGE_TYPES order]      10 (n_pad_dst, n_pad_src) int8
        #   [W stack bf16, att_src, att_dst, bias]           4  (L,D,D)/(L,1,D)
        #   [onehot_Process, onehot_File, onehot_Port]       3  (G_pad, n_pad_t) f32
        #   [w1, b1, w2, b2]                                 4  padded MLP head
        x_refs = refs[:n_t]
        adj_refs = refs[n_t:n_t + n_e]
        w_ref, asrc_ref, adst_ref, bias_ref = refs[n_t + n_e:n_t + n_e + 4]
        oh_refs = refs[n_t + n_e + 4:n_t + n_e + 4 + n_t]
        w1_ref, b1_ref, w2_ref, b2_ref = refs[n_t + n_e + 4 + n_t:n_t + n_e + 8 + n_t]
        out_ref = refs[-1]

        num_layers = w_ref.shape[0]
        x = {t: x_refs[i][...] for i, t in enumerate(NODE_TYPES)}

        for l in range(num_layers):                 # static unroll (small num_layers)
            w_l = w_ref[l]                          # (D,D) bf16
            asrc_l = asrc_ref[l]                    # (1,D) f32
            adst_l = adst_ref[l]
            bias_l = bias_ref[l]

            # shared GAT projection, computed once per node type per layer (shared across
            # all edge types); attention terms kept in f32.
            h, h_bf, a_src_row, a_dst_col = {}, {}, {}, {}
            for t in NODE_TYPES:
                ht = jnp.dot(x[t].astype(jnp.bfloat16), w_l,
                             preferred_element_type=jnp.float32)      # bf16 MXU, f32 acc
                h[t] = ht
                h_bf[t] = ht.astype(jnp.bfloat16)
                a_dst_col[t] = jnp.sum(ht * adst_l, axis=-1, keepdims=True)          # (n,1)
                a_src_row[t] = jnp.transpose(
                    jnp.sum(ht * asrc_l, axis=-1, keepdims=True))                    # (1,n)

            new_x = {}
            for dst_t in NODE_TYPES:
                incoming = [(e, s) for e, (s, _r, d) in enumerate(EDGE_TYPES) if d == dst_t]
                acc = jnp.zeros_like(h[dst_t])
                # group edge types by src type: alphas sharing a (dst,src) block fold into
                # ONE block matmul (6 matmuls/layer total, minimal MXU work).
                for src_t in NODE_TYPES:
                    eids = [e for e, s in incoming if s == src_t]
                    if not eids:
                        continue
                    logits = a_dst_col[dst_t] + a_src_row[src_t]       # (n_dst, n_src) f32
                    logits = jnp.where(logits >= 0, logits, 0.2 * logits)  # GAT LeakyReLU(0.2)
                    alpha_sum = jnp.zeros(logits.shape, jnp.float32)
                    for e in eids:                                     # static unroll (<=2)
                        adj = adj_refs[e][...].astype(jnp.float32)     # int8 block -> f32
                        mask = adj > 0.0
                        masked = jnp.where(mask, logits, jnp.float32(-1e30))
                        m = jnp.max(masked, axis=-1, keepdims=True)
                        ex = jnp.where(mask, jnp.exp(masked - m), 0.0)
                        denom = jnp.sum(ex, axis=-1, keepdims=True)
                        inv = pl.reciprocal(jnp.where(denom > 0.0, denom, 1.0), approx=True)
                        alpha_sum = alpha_sum + ex * inv               # zero in-degree -> 0
                    acc = acc + jnp.dot(alpha_sum.astype(jnp.bfloat16), h_bf[src_t],
                                        preferred_element_type=jnp.float32)
                # HeteroConv aggr='mean' over edge types into this dst type (+ shared bias),
                # then F.leaky_relu(0.01).
                y = acc * (1.0 / float(len(incoming))) + bias_l
                y = jnp.where(y >= 0, y, 0.01 * y)
                # keep padded rows exactly zero across layers (robust padding invariant)
                if n_act[dst_t] != y.shape[0]:
                    rows = jax.lax.broadcasted_iota(jnp.int32, (y.shape[0], 1), 0)
                    y = jnp.where(rows < n_act[dst_t], y, 0.0)
                new_x[dst_t] = y
            x = new_x

        # global_add_pool + lin_1 + lin_2 (dropout is identity in eval mode); exact f32.
        pooled = jnp.zeros((out_ref.shape[0], x[NODE_TYPES[0]].shape[1]), jnp.float32)
        for i, t in enumerate(NODE_TYPES):
            pooled = pooled + jnp.dot(oh_refs[i][...], x[t],
                                      preferred_element_type=jnp.float32)
        h1 = jnp.dot(pooled, w1_ref[...], preferred_element_type=jnp.float32) + b1_ref[...]
        out_ref[...] = (jnp.dot(h1, w2_ref[...], preferred_element_type=jnp.float32)
                        + b2_ref[...])

    return kernel


# ------------------------------ wrapper ------------------------------

def hetero_gnn_forward(params, x_dict, adj_dict, batch_dict, num_graphs, out_channels):
    num_layers = len(params["layers"])
    f_in, hidden = params["layers"][0]["W"].shape
    d_pad = _pad_to(max(f_in, hidden, out_channels), LANE)
    n_act = {t: int(x_dict[t].shape[0]) for t in NODE_TYPES}
    n_pad = {t: max(_pad_to(n_act[t], SUBLANE), SUBLANE) for t in NODE_TYPES}
    g_pad = max(_pad_to(num_graphs, SUBLANE), SUBLANE)

    # ---- trace-time numpy assembly (no per-call .at[].set XLA op chains) ----
    x_in = []
    for t in NODE_TYPES:
        xp = np.zeros((n_pad[t], d_pad), np.float32)
        xp[:n_act[t], :f_in] = np.asarray(x_dict[t], dtype=np.float32)
        x_in.append(xp)

    adj_in = []                                    # one int8 block per edge type
    for (s, r, d) in EDGE_TYPES:
        a = np.asarray(adj_dict[(s, r, d)])
        ap = np.zeros((n_pad[d], n_pad[s]), np.int8)
        ap[:a.shape[0], :a.shape[1]] = (a > 0).astype(np.int8)
        adj_in.append(ap)

    w_np = np.zeros((num_layers, d_pad, d_pad), np.float32)
    asrc_np = np.zeros((num_layers, 1, d_pad), np.float32)
    adst_np = np.zeros((num_layers, 1, d_pad), np.float32)
    bias_np = np.zeros((num_layers, 1, d_pad), np.float32)
    for l, lp in enumerate(params["layers"]):
        fi, fo = lp["W"].shape
        w_np[l, :fi, :fo] = np.asarray(lp["W"])
        asrc_np[l, :, :fo] = np.asarray(lp["att_src"])
        adst_np[l, :, :fo] = np.asarray(lp["att_dst"])
        bias_np[l, :, :fo] = np.asarray(lp["bias"])
    w_bf16 = jnp.asarray(w_np, dtype=jnp.bfloat16)        # MXU-native weight stack

    oh_in = []                                     # global_add_pool one-hots per node type
    for t in NODE_TYPES:
        oh = np.zeros((g_pad, n_pad[t]), np.float32)
        b = np.asarray(batch_dict[t])
        oh[b, np.arange(n_act[t])] = 1.0
        oh_in.append(oh)

    w1p = np.zeros((d_pad, d_pad), np.float32); w1p[:hidden, :hidden] = np.asarray(params["w1"])
    b1p = np.zeros((1, d_pad), np.float32);     b1p[:, :hidden] = np.asarray(params["b1"])
    w2p = np.zeros((d_pad, d_pad), np.float32); w2p[:hidden, :out_channels] = np.asarray(params["w2"])
    b2p = np.zeros((1, d_pad), np.float32);     b2p[:, :out_channels] = np.asarray(params["b2"])

    inputs = (*x_in, *adj_in, w_bf16, asrc_np, adst_np, bias_np, *oh_in, w1p, b1p, w2p, b2p)

    out_pad = pl.pallas_call(
        _make_kernel(n_act),
        out_shape=jax.ShapeDtypeStruct((g_pad, d_pad), jnp.float32),
        in_specs=[_VMEM] * len(inputs),
        out_specs=_VMEM,
        compiler_params=pltpu.CompilerParams(vmem_limit_bytes=32 * 1024 * 1024),
    )(*inputs)

    # TODO(synk): for large graphs, add a grid over dst-row tiles (adjacency
    # BlockSpec((TILE_R, n_src), pipeline_mode=pl.Buffered(2)), tile axis marked
    # "parallel" for v7x megacore) and fold the pooled accumulator + MLP head into a
    # pl.when(last-tile) epilogue; at these sizes a single program fits easily in VMEM.
    return out_pad[:num_graphs, :out_channels]


# ------------------------------ params ------------------------------

def init_params(key, f_in, hidden, out_channels, num_layers):
    params = {"layers": []}
    in_dims = [f_in] + [hidden] * (num_layers - 1)
    for l in range(num_layers):
        key, k1, k2, k3, k4 = jax.random.split(key, 5)
        params["layers"].append({
            "W": 0.1 * jax.random.normal(k1, (in_dims[l], hidden), jnp.float32),
            "att_src": 0.1 * jax.random.normal(k2, (1, hidden), jnp.float32),
            "att_dst": 0.1 * jax.random.normal(k3, (1, hidden), jnp.float32),
            "bias": 0.1 * jax.random.normal(k4, (1, hidden), jnp.float32),
        })
    key, k1, k2, k3, k4 = jax.random.split(key, 5)
    params["w1"] = 0.1 * jax.random.normal(k1, (hidden, hidden), jnp.float32)
    params["b1"] = 0.1 * jax.random.normal(k2, (1, hidden), jnp.float32)
    params["w2"] = 0.1 * jax.random.normal(k3, (hidden, out_channels), jnp.float32)
    params["b2"] = 0.1 * jax.random.normal(k4, (1, out_channels), jnp.float32)
    return params


# ------------------------------ pure-JAX reference ------------------------------

def _ref_forward(params, x_dict, adj_dict, batch_dict, num_graphs):
    hp = jax.lax.Precision.HIGHEST
    x = dict(x_dict)
    for lp in params["layers"]:
        per_dst = {t: [] for t in NODE_TYPES}
        for (src_t, rel, dst_t) in EDGE_TYPES:
            adj = adj_dict[(src_t, rel, dst_t)]
            h_src = jnp.dot(x[src_t], lp["W"], precision=hp)
            h_dst = jnp.dot(x[dst_t], lp["W"], precision=hp)
            a_src = jnp.sum(h_src * lp["att_src"], axis=-1)
            a_dst = jnp.sum(h_dst * lp["att_dst"], axis=-1, keepdims=True)
            logits = a_dst + a_src[None, :]
            logits = jnp.where(logits >= 0, logits, 0.2 * logits)
            masked = jnp.where(adj > 0, logits, jnp.float32(-1e30))
            m = jnp.max(masked, axis=-1, keepdims=True)
            e = jnp.where(adj > 0, jnp.exp(masked - m), 0.0)
            denom = jnp.sum(e, axis=-1, keepdims=True)
            alpha = e / jnp.where(denom > 0, denom, 1.0)
            per_dst[dst_t].append(jnp.dot(alpha, h_src, precision=hp) + lp["bias"])
        new_x = {}
        for t in NODE_TYPES:
            m = jnp.mean(jnp.stack(per_dst[t], axis=0), axis=0)
            new_x[t] = jnp.where(m >= 0, m, 0.01 * m)
        x = new_x
    x_all = jnp.concatenate([x[t] for t in NODE_TYPES], axis=0)
    batch = jnp.concatenate([batch_dict[t] for t in NODE_TYPES])
    onehot = (batch[None, :] == jnp.arange(num_graphs)[:, None]).astype(jnp.float32)
    pooled = jnp.dot(onehot, x_all, precision=hp)
    h = jnp.dot(pooled, params["w1"], precision=hp) + params["b1"]
    return jnp.dot(h, params["w2"], precision=hp) + params["b2"]


# ------------------------------ main ------------------------------

if __name__ == "__main__":
    F_IN = 16          # all node types share the input dim (shared lazy GATConv)
    HIDDEN = 32
    OUT = 2
    NUM_LAYERS = 2
    N = {"Process": 12, "File": 10, "Port": 6}
    NUM_GRAPHS = 2

    key = jax.random.PRNGKey(0)

    # node features
    x_dict = {}
    for t in NODE_TYPES:
        key, k = jax.random.split(key)
        x_dict[t] = jax.random.normal(k, (N[t], F_IN), jnp.float32)

    # dense adjacencies per edge type: [N_dst, N_src]
    adj_dict = {}
    for (src_t, rel, dst_t) in EDGE_TYPES:
        key, k = jax.random.split(key)
        adj_dict[(src_t, rel, dst_t)] = (
            jax.random.uniform(k, (N[dst_t], N[src_t])) < 0.3
        ).astype(jnp.float32)

    # batch assignment per node type (first half -> graph 0, rest -> graph 1)
    batch_dict = {t: jnp.where(jnp.arange(N[t]) < N[t] // 2, 0, 1) for t in NODE_TYPES}

    key, kp = jax.random.split(key)
    params = init_params(kp, F_IN, HIDDEN, OUT, NUM_LAYERS)

    # TODO(synk): nn.Dropout(p=0.5) is identity in eval mode; training-mode RNG dropout not implemented.
    out = hetero_gnn_forward(params, x_dict, adj_dict, batch_dict, NUM_GRAPHS, OUT)
    out = jax.block_until_ready(out)

    ref = jax.block_until_ready(_ref_forward(params, x_dict, adj_dict, batch_dict, NUM_GRAPHS))
    assert out.shape == (NUM_GRAPHS, OUT)
    assert np.allclose(np.asarray(out), np.asarray(ref), rtol=2e-2, atol=2e-2), (
        np.max(np.abs(np.asarray(out) - np.asarray(ref))))

    print("KERNEL_OK")
</pallas_src>

<mosaic_0001>
module attributes {stable_mosaic.version = 11 : i64} {
  func.func @kernel(%arg0: memref<16x128xf32, #tpu.memory_space<vmem>>, %arg1: memref<16x128xf32, #tpu.memory_space<vmem>>, %arg2: memref<8x128xf32, #tpu.memory_space<vmem>>, %arg3: memref<16x16xi8, #tpu.memory_space<vmem>>, %arg4: memref<16x16xi8, #tpu.memory_space<vmem>>, %arg5: memref<16x16xi8, #tpu.memory_space<vmem>>, %arg6: memref<16x16xi8, #tpu.memory_space<vmem>>, %arg7: memref<8x16xi8, #tpu.memory_space<vmem>>, %arg8: memref<16x8xi8, #tpu.memory_space<vmem>>, %arg9: memref<8x8xi8, #tpu.memory_space<vmem>>, %arg10: memref<8x8xi8, #tpu.memory_space<vmem>>, %arg11: memref<16x16xi8, #tpu.memory_space<vmem>>, %arg12: memref<16x16xi8, #tpu.memory_space<vmem>>, %arg13: memref<2x128x128xbf16, #tpu.memory_space<vmem>>, %arg14: memref<2x1x128xf32, #tpu.memory_space<vmem>>, %arg15: memref<2x1x128xf32, #tpu.memory_space<vmem>>, %arg16: memref<2x1x128xf32, #tpu.memory_space<vmem>>, %arg17: memref<8x16xf32, #tpu.memory_space<vmem>>, %arg18: memref<8x16xf32, #tpu.memory_space<vmem>>, %arg19: memref<8x8xf32, #tpu.memory_space<vmem>>, %arg20: memref<128x128xf32, #tpu.memory_space<vmem>>, %arg21: memref<1x128xf32, #tpu.memory_space<vmem>>, %arg22: memref<128x128xf32, #tpu.memory_space<vmem>>, %arg23: memref<1x128xf32, #tpu.memory_space<vmem>>, %arg24: memref<8x128xf32, #tpu.memory_space<vmem>>) attributes {dimension_semantics = [], scalar_prefetch = 0 : i64, scratch_operands = 0 : i64, tpu.core_type = #tpu.core_type<tc>} {
    %c0 = arith.constant 0 : index
    %c0_0 = arith.constant 0 : index
    %0 = vector.load %arg0[%c0, %c0_0] : memref<16x128xf32, #tpu.memory_space<vmem>>, vector<16x128xf32>
    %c0_1 = arith.constant 0 : index
    %c0_2 = arith.constant 0 : index
    %1 = vector.load %arg1[%c0_1, %c0_2] : memref<16x128xf32, #tpu.memory_space<vmem>>, vector<16x128xf32>
    %c0_3 = arith.constant 0 : index
    %c0_4 = arith.constant 0 : index
    %2 = vector.load %arg2[%c0_3, %c0_4] : memref<8x128xf32, #tpu.memory_space<vmem>>, vector<8x128xf32>
    %c0_5 = arith.constant 0 : index
    %c0_6 = arith.constant 0 : index
    %c0_7 = arith.constant 0 : index
    %3 = vector.load %arg13[%c0_5, %c0_6, %c0_7] : memref<2x128x128xbf16, #tpu.memory_space<vmem>>, vector<1x128x128xbf16>
    %4 = vector.shape_cast %3 : vector<1x128x128xbf16> to vector<128x128xbf16>
    %c0_8 = arith.constant 0 : index
    %c0_9 = arith.constant 0 : index
    %c0_10 = arith.constant 0 : index
    %5 = vector.load %arg14[%c0_8, %c0_9, %c0_10] : memref<2x1x128xf32, #tpu.memory_space<vmem>>, vector<1x1x128xf32>
    %6 = vector.shape_cast %5 : vector<1x1x128xf32> to vector<1x128xf32>
    %c0_11 = arith.constant 0 : index
    %c0_12 = arith.constant 0 : index
    %c0_13 = arith.constant 0 : index
    %7 = vector.load %arg15[%c0_11, %c0_12, %c0_13] : memref<2x1x128xf32, #tpu.memory_space<vmem>>, vector<1x1x128xf32>
    %8 = vector.shape_cast %7 : vector<1x1x128xf32> to vector<1x128xf32>
    %c0_14 = arith.constant 0 : index
    %c0_15 = arith.constant 0 : index
    %c0_16 = arith.constant 0 : index
    %9 = vector.load %arg16[%c0_14, %c0_15, %c0_16] : memref<2x1x128xf32, #tpu.memory_space<vmem>>, vector<1x1x128xf32>
    %10 = vector.shape_cast %9 : vector<1x1x128xf32> to vector<1x128xf32>
    %11 = arith.truncf %0 : vector<16x128xf32> to vector<16x128xbf16>
    %cst = arith.constant dense<0.000000e+00> : vector<16x128xf32>
    %12 = tpu.matmul %11, %4, %cst {dimension_numbers = #tpu.dot_dimension_numbers<[1], [0], [0], [1], [0, 0, 1, 1], [], []>} : vector<16x128xbf16>, vector<128x128xbf16>, vector<16x128xf32> -> vector<16x128xf32>
    %13 = arith.truncf %12 : vector<16x128xf32> to vector<16x128xbf16>
    %14 = vector.broadcast %8 : vector<1x128xf32> to vector<16x128xf32>
    %15 = arith.mulf %12, %14 : vector<16x128xf32>
    %cst_17 = arith.constant dense<0.000000e+00> : vector<16xf32>
    %16 = vector.multi_reduction <add>, %15, %cst_17 [1] : vector<16x128xf32> to vector<16xf32>
    %17 = vector.shape_cast %16 : vector<16xf32> to vector<16x1xf32>
    %18 = vector.broadcast %6 : vector<1x128xf32> to vector<16x128xf32>
    %19 = arith.mulf %12, %18 : vector<16x128xf32>
    %cst_18 = arith.constant dense<0.000000e+00> : vector<16xf32>
    %20 = vector.multi_reduction <add>, %19, %cst_18 [1] : vector<16x128xf32> to vector<16xf32>
    %21 = vector.shape_cast %20 : vector<16xf32> to vector<16x1xf32>
    %22 = tpu.transpose %21, [1, 0] : vector<16x1xf32> -> vector<1x16xf32>
    %23 = arith.truncf %1 : vector<16x128xf32> to vector<16x128xbf16>
    %cst_19 = arith.constant dense<0.000000e+00> : vector<16x128xf32>
    %24 = tpu.matmul %23, %4, %cst_19 {dimension_numbers = #tpu.dot_dimension_numbers<[1], [0], [0], [1], [0, 0, 1, 1], [], []>} : vector<16x128xbf16>, vector<128x128xbf16>, vector<16x128xf32> -> vector<16x128xf32>
    %25 = arith.truncf %24 : vector<16x128xf32> to vector<16x128xbf16>
    %26 = vector.broadcast %8 : vector<1x128xf32> to vector<16x128xf32>
    %27 = arith.mulf %24, %26 : vector<16x128xf32>
    %cst_20 = arith.constant dense<0.000000e+00> : vector<16xf32>
    %28 = vector.multi_reduction <add>, %27, %cst_20 [1] : vector<16x128xf32> to vector<16xf32>
    %29 = vector.shape_cast %28 : vector<16xf32> to vector<16x1xf32>
    %30 = vector.broadcast %6 : vector<1x128xf32> to vector<16x128xf32>
    %31 = arith.mulf %24, %30 : vector<16x128xf32>
    %cst_21 = arith.constant dense<0.000000e+00> : vector<16xf32>
    %32 = vector.multi_reduction <add>, %31, %cst_21 [1] : vector<16x128xf32> to vector<16xf32>
    %33 = vector.shape_cast %32 : vector<16xf32> to vector<16x1xf32>
    %34 = tpu.transpose %33, [1, 0] : vector<16x1xf32> -> vector<1x16xf32>
    %35 = arith.truncf %2 : vector<8x128xf32> to vector<8x128xbf16>
    %cst_22 = arith.constant dense<0.000000e+00> : vector<8x128xf32>
    %36 = tpu.matmul %35, %4, %cst_22 {dimension_numbers = #tpu.dot_dimension_numbers<[1], [0], [0], [1], [0, 0, 1, 1], [], []>} : vector<8x128xbf16>, vector<128x128xbf16>, vector<8x128xf32> -> vector<8x128xf32>
    %37 = arith.truncf %36 : vector<8x128xf32> to vector<8x128xbf16>
    %38 = vector.broadcast %8 : vector<1x128xf32> to vector<8x128xf32>
    %39 = arith.mulf %36, %38 : vector<8x128xf32>
    %cst_23 = arith.constant dense<0.000000e+00> : vector<8xf32>
    %40 = vector.multi_reduction <add>, %39, %cst_23 [1] : vector<8x128xf32> to vector<8xf32>
    %41 = vector.shape_cast %40 : vector<8xf32> to vector<8x1xf32>
    %42 = vector.broadcast %6 : vector<1x128xf32> to vector<8x128xf32>
    %43 = arith.mulf %36, %42 : vector<8x128xf32>
    %cst_24 = arith.constant dense<0.000000e+00> : vector<8xf32>
    %44 = vector.multi_reduction <add>, %43, %cst_24 [1] : vector<8x128xf32> to vector<8xf32>
    %45 = vector.shape_cast %44 : vector<8xf32> to vector<8x1xf32>
    %46 = tpu.transpose %45, [1, 0] : vector<8x1xf32> -> vector<1x8xf32>
    %cst_25 = arith.constant 0.000000e+00 : f32
    %47 = vector.broadcast %cst_25 : f32 to vector<16x128xf32>
    %48 = vector.broadcast %17 : vector<16x1xf32> to vector<16x16xf32>
    %49 = vector.broadcast %22 : vector<1x16xf32> to vector<16x16xf32>
    %50 = arith.addf %48, %49 : vector<16x16xf32>
    %cst_26 = arith.constant 0.000000e+00 : f32
    %51 = vector.broadcast %cst_26 : f32 to vector<16x16xf32>
    %52 = arith.cmpf oge, %50, %51 : vector<16x16xf32>
    %cst_27 = arith.constant 2.000000e-01 : f32
    %53 = vector.broadcast %cst_27 : f32 to vector<16x16xf32>
    %54 = arith.mulf %53, %50 : vector<16x16xf32>
    %55 = arith.select %52, %50, %54 : vector<16x16xi1>, vector<16x16xf32>
    %cst_28 = arith.constant 0.000000e+00 : f32
    %56 = vector.broadcast %cst_28 : f32 to vector<16x16xf32>
    %c0_29 = arith.constant 0 : index
    %c0_30 = arith.constant 0 : index
    %57 = vector.load %arg11[%c0_29, %c0_30] : memref<16x16xi8, #tpu.memory_space<vmem>>, vector<16x16xi8>
    %58 = arith.sitofp %57 : vector<16x16xi8> to vector<16x16xf32>
    %cst_31 = arith.constant 0.000000e+00 : f32
    %59 = vector.broadcast %cst_31 : f32 to vector<16x16xf32>
    %60 = arith.cmpf ogt, %58, %59 : vector<16x16xf32>
    %cst_32 = arith.constant -1.000000e+30 : f32
    %61 = vector.broadcast %cst_32 : f32 to vector<16x16xf32>
    %62 = arith.select %60, %55, %61 : vector<16x16xi1>, vector<16x16xf32>
    %cst_33 = arith.constant dense<0xFF800000> : vector<16xf32>
    %63 = vector.multi_reduction <maximumf>, %62, %cst_33 [1] : vector<16x16xf32> to vector<16xf32>
    %64 = vector.shape_cast %63 : vector<16xf32> to vector<16x1xf32>
    %65 = vector.broadcast %64 : vector<16x1xf32> to vector<16x16xf32>
    %66 = arith.subf %62, %65 : vector<16x16xf32>
    %67 = math.exp %66 : vector<16x16xf32>
    %cst_34 = arith.constant 0.000000e+00 : f32
    %68 = vector.broadcast %cst_34 : f32 to vector<16x16xf32>
    %69 = arith.select %60, %67, %68 : vector<16x16xi1>, vector<16x16xf32>
    %cst_35 = arith.constant dense<0.000000e+00> : vector<16xf32>
    %70 = vector.multi_reduction <add>, %69, %cst_35 [1] : vector<16x16xf32> to vector<16xf32>
    %71 = vector.shape_cast %70 : vector<16xf32> to vector<16x1xf32>
    %cst_36 = arith.constant 0.000000e+00 : f32
    %72 = vector.broadcast %cst_36 : f32 to vector<16x1xf32>
    %73 = arith.cmpf ogt, %71, %72 : vector<16x1xf32>
    %cst_37 = arith.constant 1.000000e+00 : f32
    %74 = vector.broadcast %cst_37 : f32 to vector<16x1xf32>
    %75 = arith.select %73, %71, %74 : vector<16x1xi1>, vector<16x1xf32>
    %76 = tpu.reciprocal %75 {approx = true} : vector<16x1xf32> -> vector<16x1xf32>
    %77 = vector.broadcast %76 : vector<16x1xf32> to vector<16x16xf32>
    %78 = arith.mulf %69, %77 : vector<16x16xf32>
    %79 = arith.addf %56, %78 : vector<16x16xf32>
    %c0_38 = arith.constant 0 : index
    %c0_39 = arith.constant 0 : index
    %80 = vector.load %arg12[%c0_38, %c0_39] : memref<16x16xi8, #tpu.memory_space<vmem>>, vector<16x16xi8>
    %81 = arith.sitofp %80 : vector<16x16xi8> to vector<16x16xf32>
    %cst_40 = arith.constant 0.000000e+00 : f32
    %82 = vector.broadcast %cst_40 : f32 to vector<16x16xf32>
    %83 = arith.cmpf ogt, %81, %82 : vector<16x16xf32>
    %cst_41 = arith.constant -1.000000e+30 : f32
    %84 = vector.broadcast %cst_41 : f32 to vector<16x16xf32>
    %85 = arith.select %83, %55, %84 : vector<16x16xi1>, vector<16x16xf32>
    %cst_42 = arith.constant dense<0xFF800000> : vector<16xf32>
    %86 = vector.multi_reduction <maximumf>, %85, %cst_42 [1] : vector<16x16xf32> to vector<16xf32>
    %87 = vector.shape_cast %86 : vector<16xf32> to vector<16x1xf32>
    %88 = vector.broadcast %87 : vector<16x1xf32> to vector<16x16xf32>
    %89 = arith.subf %85, %88 : vector<16x16xf32>
    %90 = math.exp %89 : vector<16x16xf32>
    %cst_43 = arith.constant 0.000000e+00 : f32
    %91 = vector.broadcast %cst_43 : f32 to vector<16x16xf32>
    %92 = arith.select %83, %90, %91 : vector<16x16xi1>, vector<16x16xf32>
    %cst_44 = arith.constant dense<0.000000e+00> : vector<16xf32>
    %93 = vector.multi_reduction <add>, %92, %cst_44 [1] : vector<16x16xf32> to vector<16xf32>
    %94 = vector.shape_cast %93 : vector<16xf32> to vector<16x1xf32>
    %cst_45 = arith.constant 0.000000e+00 : f32
    %95 = vector.broadcast %cst_45 : f32 to vector<16x1xf32>
    %96 = arith.cmpf ogt, %94, %95 : vector<16x1xf32>
    %cst_46 = arith.constant 1.000000e+00 : f32
    %97 = vector.broadcast %cst_46 : f32 to vector<16x1xf32>
    %98 = arith.select %96, %94, %97 : vector<16x1xi1>, vector<16x1xf32>
    %99 = tpu.reciprocal %98 {approx = true} : vector<16x1xf32> -> vector<16x1xf32>
    %100 = vector.broadcast %99 : vector<16x1xf32> to vector<16x16xf32>
    %101 = arith.mulf %92, %100 : vector<16x16xf32>
    %102 = arith.addf %79, %101 : vector<16x16xf32>
    %103 = arith.truncf %102 : vector<16x16xf32> to vector<16x16xbf16>
    %cst_47 = arith.constant dense<0.000000e+00> : vector<16x128xf32>
    %104 = tpu.matmul %103, %13, %cst_47 {dimension_numbers = #tpu.dot_dimension_numbers<[1], [0], [0], [1], [0, 0, 1, 1], [], []>} : vector<16x16xbf16>, vector<16x128xbf16>, vector<16x128xf32> -> vector<16x128xf32>
    %105 = arith.addf %47, %104 : vector<16x128xf32>
    %106 = vector.broadcast %17 : vector<16x1xf32> to vector<16x16xf32>
    %107 = vector.broadcast %34 : vector<1x16xf32> to vector<16x16xf32>
    %108 = arith.addf %106, %107 : vector<16x16xf32>
    %cst_48 = arith.constant 0.000000e+00 : f32
    %109 = vector.broadcast %cst_48 : f32 to vector<16x16xf32>
    %110 = arith.cmpf oge, %108, %109 : vector<16x16xf32>
    %cst_49 = arith.constant 2.000000e-01 : f32
    %111 = vector.broadcast %cst_49 : f32 to vector<16x16xf32>
    %112 = arith.mulf %111, %108 : vector<16x16xf32>
    %113 = arith.select %110, %108, %112 : vector<16x16xi1>, vector<16x16xf32>
    %cst_50 = arith.constant 0.000000e+00 : f32
    %114 = vector.broadcast %cst_50 : f32 to vector<16x16xf32>
    %c0_51 = arith.constant 0 : index
    %c0_52 = arith.constant 0 : index
    %115 = vector.load %arg4[%c0_51, %c0_52] : memref<16x16xi8, #tpu.memory_space<vmem>>, vector<16x16xi8>
    %116 = arith.sitofp %115 : vector<16x16xi8> to vector<16x16xf32>
    %cst_53 = arith.constant 0.000000e+00 : f32
    %117 = vector.broadcast %cst_53 : f32 to vector<16x16xf32>
    %118 = arith.cmpf ogt, %116, %117 : vector<16x16xf32>
    %cst_54 = arith.constant -1.000000e+30 : f32
    %119 = vector.broadcast %cst_54 : f32 to vector<16x16xf32>
    %120 = arith.select %118, %113, %119 : vector<16x16xi1>, vector<16x16xf32>
    %cst_55 = arith.constant dense<0xFF800000> : vector<16xf32>
    %121 = vector.multi_reduction <maximumf>, %120, %cst_55 [1] : vector<16x16xf32> to vector<16xf32>
    %122 = vector.shape_cast %121 : vector<16xf32> to vector<16x1xf32>
    %123 = vector.broadcast %122 : vector<16x1xf32> to vector<16x16xf32>
    %124 = arith.subf %120, %123 : vector<16x16xf32>
    %125 = math.exp %124 : vector<16x16xf32>
    %cst_56 = arith.constant 0.000000e+00 : f32
    %126 = vector.broadcast %cst_56 : f32 to vector<16x16xf32>
    %127 = arith.select %118, %125, %126 : vector<16x16xi1>, vector<16x16xf32>
    %cst_57 = arith.constant dense<0.000000e+00> : vector<16xf32>
    %128 = vector.multi_reduction <add>, %127, %cst_57 [1] : vector<16x16xf32> to vector<16xf32>
    %129 = vector.shape_cast %128 : vector<16xf32> to vector<16x1xf32>
    %cst_58 = arith.constant 0.000000e+00 : f32
    %130 = vector.broadcast %cst_58 : f32 to vector<16x1xf32>
    %131 = arith.cmpf ogt, %129, %130 : vector<16x1xf32>
    %cst_59 = arith.constant 1.000000e+00 : f32
    %132 = vector.broadcast %cst_59 : f32 to vector<16x1xf32>
    %133 = arith.select %131, %129, %132 : vector<16x1xi1>, vector<16x1xf32>
    %134 = tpu.reciprocal %133 {approx = true} : vector<16x1xf32> -> vector<16x1xf32>
    %135 = vector.broadcast %134 : vector<16x1xf32> to vector<16x16xf32>
    %136 = arith.mulf %127, %135 : vector<16x16xf32>
    %137 = arith.addf %114, %136 : vector<16x16xf32>
    %c0_60 = arith.constant 0 : index
    %c0_61 = arith.constant 0 : index
    %138 = vector.load %arg6[%c0_60, %c0_61] : memref<16x16xi8, #tpu.memory_space<vmem>>, vector<16x16xi8>
    %139 = arith.sitofp %138 : vector<16x16xi8> to vector<16x16xf32>
    %cst_62 = arith.constant 0.000000e+00 : f32
    %140 = vector.broadcast %cst_62 : f32 to vector<16x16xf32>
    %141 = arith.cmpf ogt, %139, %140 : vector<16x16xf32>
    %cst_63 = arith.constant -1.000000e+30 : f32
    %142 = vector.broadcast %cst_63 : f32 to vector<16x16xf32>
    %143 = arith.select %141, %113, %142 : vector<16x16xi1>, vector<16x16xf32>
    %cst_64 = arith.constant dense<0xFF800000> : vector<16xf32>
    %144 = vector.multi_reduction <maximumf>, %143, %cst_64 [1] : vector<16x16xf32> to vector<16xf32>
    %145 = vector.shape_cast %144 : vector<16xf32> to vector<16x1xf32>
    %146 = vector.broadcast %145 : vector<16x1xf32> to vector<16x16xf32>
    %147 = arith.subf %143, %146 : vector<16x16xf32>
    %148 = math.exp %147 : vector<16x16xf32>
    %cst_65 = arith.constant 0.000000e+00 : f32
    %149 = vector.broadcast %cst_65 : f32 to vector<16x16xf32>
    %150 = arith.select %141, %148, %149 : vector<16x16xi1>, vector<16x16xf32>
    %cst_66 = arith.constant dense<0.000000e+00> : vector<16xf32>
    %151 = vector.multi_reduction <add>, %150, %cst_66 [1] : vector<16x16xf32> to vector<16xf32>
    %152 = vector.shape_cast %151 : vector<16xf32> to vector<16x1xf32>
    %cst_67 = arith.constant 0.000000e+00 : f32
    %153 = vector.broadcast %cst_67 : f32 to vector<16x1xf32>
    %154 = arith.cmpf ogt, %152, %153 : vector<16x1xf32>
    %cst_68 = arith.constant 1.000000e+00 : f32
    %155 = vector.broadcast %cst_68 : f32 to vector<16x1xf32>
    %156 = arith.select %154, %152, %155 : vector<16x1xi1>, vector<16x1xf32>
    %157 = tpu.reciprocal %156 {approx = true} : vector<16x1xf32> -> vector<16x1xf32>
    %158 = vector.broadcast %157 : vector<16x1xf32> to vector<16x16xf32>
    %159 = arith.mulf %150, %158 : vector<16x16xf32>
    %160 = arith.addf %137, %159 : vector<16x16xf32>
    %161 = arith.truncf %160 : vector<16x16xf32> to vector<16x16xbf16>
    %cst_69 = arith.constant dense<0.000000e+00> : vector<16x128xf32>
    %162 = tpu.matmul %161, %25, %cst_69 {dimension_numbers = #tpu.dot_dimension_numbers<[1], [0], [0], [1], [0, 0, 1, 1], [], []>} : vector<16x16xbf16>, vector<16x128xbf16>, vector<16x128xf32> -> vector<16x128xf32>
    %163 = arith.addf %105, %162 : vector<16x128xf32>
    %164 = vector.broadcast %17 : vector<16x1xf32> to vector<16x8xf32>
    %165 = vector.broadcast %46 : vector<1x8xf32> to vector<16x8xf32>
    %166 = arith.addf %164, %165 : vector<16x8xf32>
    %cst_70 = arith.constant 0.000000e+00 : f32
    %167 = vector.broadcast %cst_70 : f32 to vector<16x8xf32>
    %168 = arith.cmpf oge, %166, %167 : vector<16x8xf32>
    %cst_71 = arith.constant 2.000000e-01 : f32
    %169 = vector.broadcast %cst_71 : f32 to vector<16x8xf32>
    %170 = arith.mulf %169, %166 : vector<16x8xf32>
    %171 = arith.select %168, %166, %170 : vector<16x8xi1>, vector<16x8xf32>
    %cst_72 = arith.constant 0.000000e+00 : f32
    %172 = vector.broadcast %cst_72 : f32 to vector<16x8xf32>
    %c0_73 = arith.constant 0 : index
    %c0_74 = arith.constant 0 : index
    %173 = vector.load %arg8[%c0_73, %c0_74] : memref<16x8xi8, #tpu.memory_space<vmem>>, vector<16x8xi8>
    %174 = arith.sitofp %173 : vector<16x8xi8> to vector<16x8xf32>
    %cst_75 = arith.constant 0.000000e+00 : f32
    %175 = vector.broadcast %cst_75 : f32 to vector<16x8xf32>
    %176 = arith.cmpf ogt, %174, %175 : vector<16x8xf32>
    %cst_76 = arith.constant -1.000000e+30 : f32
    %177 = vector.broadcast %cst_76 : f32 to vector<16x8xf32>
    %178 = arith.select %176, %171, %177 : vector<16x8xi1>, vector<16x8xf32>
    %cst_77 = arith.constant dense<0xFF800000> : vector<16xf32>
    %179 = vector.multi_reduction <maximumf>, %178, %cst_77 [1] : vector<16x8xf32> to vector<16xf32>
    %180 = vector.shape_cast %179 : vector<16xf32> to vector<16x1xf32>
    %181 = vector.broadcast %180 : vector<16x1xf32> to vector<16x8xf32>
    %182 = arith.subf %178, %181 : vector<16x8xf32>
    %183 = math.exp %182 : vector<16x8xf32>
    %cst_78 = arith.constant 0.000000e+00 : f32
    %184 = vector.broadcast %cst_78 : f32 to vector<16x8xf32>
    %185 = arith.select %176, %183, %184 : vector<16x8xi1>, vector<16x8xf32>
    %cst_79 = arith.constant dense<0.000000e+00> : vector<16xf32>
    %186 = vector.multi_reduction <add>, %185, %cst_79 [1] : vector<16x8xf32> to vector<16xf32>
    %187 = vector.shape_cast %186 : vector<16xf32> to vector<16x1xf32>
    %cst_80 = arith.constant 0.000000e+00 : f32
    %188 = vector.broadcast %cst_80 : f32 to vector<16x1xf32>
    %189 = arith.cmpf ogt, %187, %188 : vector<16x1xf32>
    %cst_81 = arith.constant 1.000000e+00 : f32
    %190 = vector.broadcast %cst_81 : f32 to vector<16x1xf32>
    %191 = arith.select %189, %187, %190 : vector<16x1xi1>, vector<16x1xf32>
    %192 = tpu.reciprocal %191 {approx = true} : vector<16x1xf32> -> vector<16x1xf32>
    %193 = vector.broadcast %192 : vector<16x1xf32> to vector<16x8xf32>
    %194 = arith.mulf %185, %193 : vector<16x8xf32>
    %195 = arith.addf %172, %194 : vector<16x8xf32>
    %196 = arith.truncf %195 : vector<16x8xf32> to vector<16x8xbf16>
    %cst_82 = arith.constant dense<0.000000e+00> : vector<16x128xf32>
    %197 = tpu.matmul %196, %37, %cst_82 {dimension_numbers = #tpu.dot_dimension_numbers<[1], [0], [0], [1], [0, 0, 1, 1], [], []>} : vector<16x8xbf16>, vector<8x128xbf16>, vector<16x128xf32> -> vector<16x128xf32>
    %198 = arith.addf %163, %197 : vector<16x128xf32>
    %cst_83 = arith.constant 2.000000e-01 : f32
    %199 = vector.broadcast %cst_83 : f32 to vector<16x128xf32>
    %200 = arith.mulf %198, %199 : vector<16x128xf32>
    %201 = vector.broadcast %10 : vector<1x128xf32> to vector<16x128xf32>
    %202 = arith.addf %200, %201 : vector<16x128xf32>
    %cst_84 = arith.constant 0.000000e+00 : f32
    %203 = vector.broadcast %cst_84 : f32 to vector<16x128xf32>
    %204 = arith.cmpf oge, %202, %203 : vector<16x128xf32>
    %cst_85 = arith.constant 0.00999999977 : f32
    %205 = vector.broadcast %cst_85 : f32 to vector<16x128xf32>
    %206 = arith.mulf %205, %202 : vector<16x128xf32>
    %207 = arith.select %204, %202, %206 : vector<16x128xi1>, vector<16x128xf32>
    %208 = tpu.iota {dimensions = array<i32: 0>} : vector<16x1xi32>
    %c12_i32 = arith.constant 12 : i32
    %209 = vector.broadcast %c12_i32 : i32 to vector<16x1xi32>
    %210 = arith.cmpi slt, %208, %209 : vector<16x1xi32>
    %cst_86 = arith.constant 0.000000e+00 : f32
    %211 = vector.shape_cast %210 : vector<16x1xi1> to vector<16x1xi1>
    %212 = vector.broadcast %211 : vector<16x1xi1> to vector<16x128xi1>
    %213 = vector.broadcast %cst_86 : f32 to vector<16x128xf32>
    %214 = arith.select %212, %207, %213 : vector<16x128xi1>, vector<16x128xf32>
    %cst_87 = arith.constant 0.000000e+00 : f32
    %215 = vector.broadcast %cst_87 : f32 to vector<16x128xf32>
    %216 = vector.broadcast %29 : vector<16x1xf32> to vector<16x16xf32>
    %217 = vector.broadcast %22 : vector<1x16xf32> to vector<16x16xf32>
    %218 = arith.addf %216, %217 : vector<16x16xf32>
    %cst_88 = arith.constant 0.000000e+00 : f32
    %219 = vector.broadcast %cst_88 : f32 to vector<16x16xf32>
    %220 = arith.cmpf oge, %218, %219 : vector<16x16xf32>
    %cst_89 = arith.constant 2.000000e-01 : f32
    %221 = vector.broadcast %cst_89 : f32 to vector<16x16xf32>
    %222 = arith.mulf %221, %218 : vector<16x16xf32>
    %223 = arith.select %220, %218, %222 : vector<16x16xi1>, vector<16x16xf32>
    %cst_90 = arith.constant 0.000000e+00 : f32
    %224 = vector.broadcast %cst_90 : f32 to vector<16x16xf32>
    %c0_91 = arith.constant 0 : index
    %c0_92 = arith.constant 0 : index
    %225 = vector.load %arg3[%c0_91, %c0_92] : memref<16x16xi8, #tpu.memory_space<vmem>>, vector<16x16xi8>
    %226 = arith.sitofp %225 : vector<16x16xi8> to vector<16x16xf32>
    %cst_93 = arith.constant 0.000000e+00 : f32
    %227 = vector.broadcast %cst_93 : f32 to vector<16x16xf32>
    %228 = arith.cmpf ogt, %226, %227 : vector<16x16xf32>
    %cst_94 = arith.constant -1.000000e+30 : f32
    %229 = vector.broadcast %cst_94 : f32 to vector<16x16xf32>
    %230 = arith.select %228, %223, %229 : vector<16x16xi1>, vector<16x16xf32>
    %cst_95 = arith.constant dense<0xFF800000> : vector<16xf32>
    %231 = vector.multi_reduction <maximumf>, %230, %cst_95 [1] : vector<16x16xf32> to vector<16xf32>
    %232 = vector.shape_cast %231 : vector<16xf32> to vector<16x1xf32>
    %233 = vector.broadcast %232 : vector<16x1xf32> to vector<16x16xf32>
    %234 = arith.subf %230, %233 : vector<16x16xf32>
    %235 = math.exp %234 : vector<16x16xf32>
    %cst_96 = arith.constant 0.000000e+00 : f32
    %236 = vector.broadcast %cst_96 : f32 to vector<16x16xf32>
    %237 = arith.select %228, %235, %236 : vector<16x16xi1>, vector<16x16xf32>
    %cst_97 = arith.constant dense<0.000000e+00> : vector<16xf32>
    %238 = vector.multi_reduction <add>, %237, %cst_97 [1] : vector<16x16xf32> to vector<16xf32>
    %239 = vector.shape_cast %238 : vector<16xf32> to vector<16x1xf32>
    %cst_98 = arith.constant 0.000000e+00 : f32
    %240 = vector.broadcast %cst_98 : f32 to vector<16x1xf32>
    %241 = arith.cmpf ogt, %239, %240 : vector<16x1xf32>
    %cst_99 = arith.constant 1.000000e+00 : f32
    %242 = vector.broadcast %cst_99 : f32 to vector<16x1xf32>
    %243 = arith.select %241, %239, %242 : vector<16x1xi1>, vector<16x1xf32>
    %244 = tpu.reciprocal %243 {approx = true} : vector<16x1xf32> -> vector<16x1xf32>
    %245 = vector.broadcast %244 : vector<16x1xf32> to vector<16x16xf32>
    %246 = arith.mulf %237, %245 : vector<16x16xf32>
    %247 = arith.addf %224, %246 : vector<16x16xf32>
    %c0_100 = arith.constant 0 : index
    %c0_101 = arith.constant 0 : index
    %248 = vector.load %arg5[%c0_100, %c0_101] : memref<16x16xi8, #tpu.memory_space<vmem>>, vector<16x16xi8>
    %249 = arith.sitofp %248 : vector<16x16xi8> to vector<16x16xf32>
    %cst_102 = arith.constant 0.000000e+00 : f32
    %250 = vector.broadcast %cst_102 : f32 to vector<16x16xf32>
    %251 = arith.cmpf ogt, %249, %250 : vector<16x16xf32>
    %cst_103 = arith.constant -1.000000e+30 : f32
    %252 = vector.broadcast %cst_103 : f32 to vector<16x16xf32>
    %253 = arith.select %251, %223, %252 : vector<16x16xi1>, vector<16x16xf32>
    %cst_104 = arith.constant dense<0xFF800000> : vector<16xf32>
    %254 = vector.multi_reduction <maximumf>, %253, %cst_104 [1] : vector<16x16xf32> to vector<16xf32>
    %255 = vector.shape_cast %254 : vector<16xf32> to vector<16x1xf32>
    %256 = vector.broadcast %255 : vector<16x1xf32> to vector<16x16xf32>
    %257 = arith.subf %253, %256 : vector<16x16xf32>
    %258 = math.exp %257 : vector<16x16xf32>
    %cst_105 = arith.constant 0.000000e+00 : f32
    %259 = vector.broadcast %cst_105 : f32 to vector<16x16xf32>
    %260 = arith.select %251, %258, %259 : vector<16x16xi1>, vector<16x16xf32>
    %cst_106 = arith.constant dense<0.000000e+00> : vector<16xf32>
    %261 = vector.multi_reduction <add>, %260, %cst_106 [1] : vector<16x16xf32> to vector<16xf32>
    %262 = vector.shape_cast %261 : vector<16xf32> to vector<16x1xf32>
    %cst_107 = arith.constant 0.000000e+00 : f32
    %263 = vector.broadcast %cst_107 : f32 to vector<16x1xf32>
    %264 = arith.cmpf ogt, %262, %263 : vector<16x1xf32>
    %cst_108 = arith.constant 1.000000e+00 : f32
    %265 = vector.broadcast %cst_108 : f32 to vector<16x1xf32>
    %266 = arith.select %264, %262, %265 : vector<16x1xi1>, vector<16x1xf32>
    %267 = tpu.reciprocal %266 {approx = true} : vector<16x1xf32> -> vector<16x1xf32>
    %268 = vector.broadcast %267 : vector<16x1xf32> to vector<16x16xf32>
    %269 = arith.mulf %260, %268 : vector<16x16xf32>
    %270 = arith.addf %247, %269 : vector<16x16xf32>
    %271 = arith.truncf %270 : vector<16x16xf32> to vector<16x16xbf16>
    %cst_109 = arith.constant dense<0.000000e+00> : vector<16x128xf32>
    %272 = tpu.matmul %271, %13, %cst_109 {dimension_numbers = #tpu.dot_dimension_numbers<[1], [0], [0], [1], [0, 0, 1, 1], [], []>} : vector<16x16xbf16>, vector<16x128xbf16>, vector<16x128xf32> -> vector<16x128xf32>
    %273 = arith.addf %215, %272 : vector<16x128xf32>
    %cst_110 = arith.constant 5.000000e-01 : f32
    %274 = vector.broadcast %cst_110 : f32 to vector<16x128xf32>
    %275 = arith.mulf %273, %274 : vector<16x128xf32>
    %276 = vector.broadcast %10 : vector<1x128xf32> to vector<16x128xf32>
    %277 = arith.addf %275, %276 : vector<16x128xf32>
    %cst_111 = arith.constant 0.000000e+00 : f32
    %278 = vector.broadcast %cst_111 : f32 to vector<16x128xf32>
    %279 = arith.cmpf oge, %277, %278 : vector<16x128xf32>
    %cst_112 = arith.constant 0.00999999977 : f32
    %280 = vector.broadcast %cst_112 : f32 to vector<16x128xf32>
    %281 = arith.mulf %280, %277 : vector<16x128xf32>
    %282 = arith.select %279, %277, %281 : vector<16x128xi1>, vector<16x128xf32>
    %283 = tpu.iota {dimensions = array<i32: 0>} : vector<16x1xi32>
    %c10_i32 = arith.constant 10 : i32
    %284 = vector.broadcast %c10_i32 : i32 to vector<16x1xi32>
    %285 = arith.cmpi slt, %283, %284 : vector<16x1xi32>
    %cst_113 = arith.constant 0.000000e+00 : f32
    %286 = vector.shape_cast %285 : vector<16x1xi1> to vector<16x1xi1>
    %287 = vector.broadcast %286 : vector<16x1xi1> to vector<16x128xi1>
    %288 = vector.broadcast %cst_113 : f32 to vector<16x128xf32>
    %289 = arith.select %287, %282, %288 : vector<16x128xi1>, vector<16x128xf32>
    %cst_114 = arith.constant 0.000000e+00 : f32
    %290 = vector.broadcast %cst_114 : f32 to vector<8x128xf32>
    %291 = vector.broadcast %41 : vector<8x1xf32> to vector<8x16xf32>
    %292 = vector.broadcast %22 : vector<1x16xf32> to vector<8x16xf32>
    %293 = arith.addf %291, %292 : vector<8x16xf32>
    %cst_115 = arith.constant 0.000000e+00 : f32
    %294 = vector.broadcast %cst_115 : f32 to vector<8x16xf32>
    %295 = arith.cmpf oge, %293, %294 : vector<8x16xf32>
    %cst_116 = arith.constant 2.000000e-01 : f32
    %296 = vector.broadcast %cst_116 : f32 to vector<8x16xf32>
    %297 = arith.mulf %296, %293 : vector<8x16xf32>
    %298 = arith.select %295, %293, %297 : vector<8x16xi1>, vector<8x16xf32>
    %cst_117 = arith.constant 0.000000e+00 : f32
    %299 = vector.broadcast %cst_117 : f32 to vector<8x16xf32>
    %c0_118 = arith.constant 0 : index
    %c0_119 = arith.constant 0 : index
    %300 = vector.load %arg7[%c0_118, %c0_119] : memref<8x16xi8, #tpu.memory_space<vmem>>, vector<8x16xi8>
    %301 = arith.sitofp %300 : vector<8x16xi8> to vector<8x16xf32>
    %cst_120 = arith.constant 0.000000e+00 : f32
    %302 = vector.broadcast %cst_120 : f32 to vector<8x16xf32>
    %303 = arith.cmpf ogt, %301, %302 : vector<8x16xf32>
    %cst_121 = arith.constant -1.000000e+30 : f32
    %304 = vector.broadcast %cst_121 : f32 to vector<8x16xf32>
    %305 = arith.select %303, %298, %304 : vector<8x16xi1>, vector<8x16xf32>
    %cst_122 = arith.constant dense<0xFF800000> : vector<8xf32>
    %306 = vector.multi_reduction <maximumf>, %305, %cst_122 [1] : vector<8x16xf32> to vector<8xf32>
    %307 = vector.shape_cast %306 : vector<8xf32> to vector<8x1xf32>
    %308 = vector.broadcast %307 : vector<8x1xf32> to vector<8x16xf32>
    %309 = arith.subf %305, %308 : vector<8x16xf32>
    %310 = math.exp %309 : vector<8x16xf32>
    %cst_123 = arith.constant 0.000000e+00 : f32
    %311 = vector.broadcast %cst_123 : f32 to vector<8x16xf32>
    %312 = arith.select %303, %310, %311 : vector<8x16xi1>, vector<8x16xf32>
    %cst_124 = arith.constant dense<0.000000e+00> : vector<8xf32>
    %313 = vector.multi_reduction <add>, %312, %cst_124 [1] : vector<8x16xf32> to vector<8xf32>
    %314 = vector.shape_cast %313 : vector<8xf32> to vector<8x1xf32>
    %cst_125 = arith.constant 0.000000e+00 : f32
    %315 = vector.broadcast %cst_125 : f32 to vector<8x1xf32>
    %316 = arith.cmpf ogt, %314, %315 : vector<8x1xf32>
    %cst_126 = arith.constant 1.000000e+00 : f32
    %317 = vector.broadcast %cst_126 : f32 to vector<8x1xf32>
    %318 = arith.select %316, %314, %317 : vector<8x1xi1>, vector<8x1xf32>
    %319 = tpu.reciprocal %318 {approx = true} : vector<8x1xf32> -> vector<8x1xf32>
    %320 = vector.broadcast %319 : vector<8x1xf32> to vector<8x16xf32>
    %321 = arith.mulf %312, %320 : vector<8x16xf32>
    %322 = arith.addf %299, %321 : vector<8x16xf32>
    %323 = arith.truncf %322 : vector<8x16xf32> to vector<8x16xbf16>
    %cst_127 = arith.constant dense<0.000000e+00> : vector<8x128xf32>
    %324 = tpu.matmul %323, %13, %cst_127 {dimension_numbers = #tpu.dot_dimension_numbers<[1], [0], [0], [1], [0, 0, 1, 1], [], []>} : vector<8x16xbf16>, vector<16x128xbf16>, vector<8x128xf32> -> vector<8x128xf32>
    %325 = arith.addf %290, %324 : vector<8x128xf32>
    %326 = vector.broadcast %41 : vector<8x1xf32> to vector<8x8xf32>
    %327 = vector.broadcast %46 : vector<1x8xf32> to vector<8x8xf32>
    %328 = arith.addf %326, %327 : vector<8x8xf32>
    %cst_128 = arith.constant 0.000000e+00 : f32
    %329 = vector.broadcast %cst_128 : f32 to vector<8x8xf32>
    %330 = arith.cmpf oge, %328, %329 : vector<8x8xf32>
    %cst_129 = arith.constant 2.000000e-01 : f32
    %331 = vector.broadcast %cst_129 : f32 to vector<8x8xf32>
    %332 = arith.mulf %331, %328 : vector<8x8xf32>
    %333 = arith.select %330, %328, %332 : vector<8x8xi1>, vector<8x8xf32>
    %cst_130 = arith.constant 0.000000e+00 : f32
    %334 = vector.broadcast %cst_130 : f32 to vector<8x8xf32>
    %c0_131 = arith.constant 0 : index
    %c0_132 = arith.constant 0 : index
    %335 = vector.load %arg9[%c0_131, %c0_132] : memref<8x8xi8, #tpu.memory_space<vmem>>, vector<8x8xi8>
    %336 = arith.sitofp %335 : vector<8x8xi8> to vector<8x8xf32>
    %cst_133 = arith.constant 0.000000e+00 : f32
    %337 = vector.broadcast %cst_133 : f32 to vector<8x8xf32>
    %338 = arith.cmpf ogt, %336, %337 : vector<8x8xf32>
    %cst_134 = arith.constant -1.000000e+30 : f32
    %339 = vector.broadcast %cst_134 : f32 to vector<8x8xf32>
    %340 = arith.select %338, %333, %339 : vector<8x8xi1>, vector<8x8xf32>
    %cst_135 = arith.constant dense<0xFF800000> : vector<8xf32>
    %341 = vector.multi_reduction <maximumf>, %340, %cst_135 [1] : vector<8x8xf32> to vector<8xf32>
    %342 = vector.shape_cast %341 : vector<8xf32> to vector<8x1xf32>
    %343 = vector.broadcast %342 : vector<8x1xf32> to vector<8x8xf32>
    %344 = arith.subf %340, %343 : vector<8x8xf32>
    %345 = math.exp %344 : vector<8x8xf32>
    %cst_136 = arith.constant 0.000000e+00 : f32
    %346 = vector.broadcast %cst_136 : f32 to vector<8x8xf32>
    %347 = arith.select %338, %345, %346 : vector<8x8xi1>, vector<8x8xf32>
    %cst_137 = arith.constant dense<0.000000e+00> : vector<8xf32>
    %348 = vector.multi_reduction <add>, %347, %cst_137 [1] : vector<8x8xf32> to vector<8xf32>
    %349 = vector.shape_cast %348 : vector<8xf32> to vector<8x1xf32>
    %cst_138 = arith.constant 0.000000e+00 : f32
    %350 = vector.broadcast %cst_138 : f32 to vector<8x1xf32>
    %351 = arith.cmpf ogt, %349, %350 : vector<8x1xf32>
    %cst_139 = arith.constant 1.000000e+00 : f32
    %352 = vector.broadcast %cst_139 : f32 to vector<8x1xf32>
    %353 = arith.select %351, %349, %352 : vector<8x1xi1>, vector<8x1xf32>
    %354 = tpu.reciprocal %353 {approx = true} : vector<8x1xf32> -> vector<8x1xf32>
    %355 = vector.broadcast %354 : vector<8x1xf32> to vector<8x8xf32>
    %356 = arith.mulf %347, %355 : vector<8x8xf32>
    %357 = arith.addf %334, %356 : vector<8x8xf32>
    %c0_140 = arith.constant 0 : index
    %c0_141 = arith.constant 0 : index
    %358 = vector.load %arg10[%c0_140, %c0_141] : memref<8x8xi8, #tpu.memory_space<vmem>>, vector<8x8xi8>
    %359 = arith.sitofp %358 : vector<8x8xi8> to vector<8x8xf32>
    %cst_142 = arith.constant 0.000000e+00 : f32
    %360 = vector.broadcast %cst_142 : f32 to vector<8x8xf32>
    %361 = arith.cmpf ogt, %359, %360 : vector<8x8xf32>
    %cst_143 = arith.constant -1.000000e+30 : f32
    %362 = vector.broadcast %cst_143 : f32 to vector<8x8xf32>
    %363 = arith.select %361, %333, %362 : vector<8x8xi1>, vector<8x8xf32>
    %cst_144 = arith.constant dense<0xFF800000> : vector<8xf32>
    %364 = vector.multi_reduction <maximumf>, %363, %cst_144 [1] : vector<8x8xf32> to vector<8xf32>
    %365 = vector.shape_cast %364 : vector<8xf32> to vector<8x1xf32>
    %366 = vector.broadcast %365 : vector<8x1xf32> to vector<8x8xf32>
    %367 = arith.subf %363, %366 : vector<8x8xf32>
    %368 = math.exp %367 : vector<8x8xf32>
    %cst_145 = arith.constant 0.000000e+00 : f32
    %369 = vector.broadcast %cst_145 : f32 to vector<8x8xf32>
    %370 = arith.select %361, %368, %369 : vector<8x8xi1>, vector<8x8xf32>
    %cst_146 = arith.constant dense<0.000000e+00> : vector<8xf32>
    %371 = vector.multi_reduction <add>, %370, %cst_146 [1] : vector<8x8xf32> to vector<8xf32>
    %372 = vector.shape_cast %371 : vector<8xf32> to vector<8x1xf32>
    %cst_147 = arith.constant 0.000000e+00 : f32
    %373 = vector.broadcast %cst_147 : f32 to vector<8x1xf32>
    %374 = arith.cmpf ogt, %372, %373 : vector<8x1xf32>
    %cst_148 = arith.constant 1.000000e+00 : f32
    %375 = vector.broadcast %cst_148 : f32 to vector<8x1xf32>
    %376 = arith.select %374, %372, %375 : vector<8x1xi1>, vector<8x1xf32>
    %377 = tpu.reciprocal %376 {approx = true} : vector<8x1xf32> -> vector<8x1xf32>
    %378 = vector.broadcast %377 : vector<8x1xf32> to vector<8x8xf32>
    %379 = arith.mulf %370, %378 : vector<8x8xf32>
    %380 = arith.addf %357, %379 : vector<8x8xf32>
    %381 = arith.truncf %380 : vector<8x8xf32> to vector<8x8xbf16>
    %cst_149 = arith.constant dense<0.000000e+00> : vector<8x128xf32>
    %382 = tpu.matmul %381, %37, %cst_149 {dimension_numbers = #tpu.dot_dimension_numbers<[1], [0], [0], [1], [0, 0, 1, 1], [], []>} : vector<8x8xbf16>, vector<8x128xbf16>, vector<8x128xf32> -> vector<8x128xf32>
    %383 = arith.addf %325, %382 : vector<8x128xf32>
    %cst_150 = arith.constant 0.333333343 : f32
    %384 = vector.broadcast %cst_150 : f32 to vector<8x128xf32>
    %385 = arith.mulf %383, %384 : vector<8x128xf32>
    %386 = vector.broadcast %10 : vector<1x128xf32> to vector<8x128xf32>
    %387 = arith.addf %385, %386 : vector<8x128xf32>
    %cst_151 = arith.constant 0.000000e+00 : f32
    %388 = vector.broadcast %cst_151 : f32 to vector<8x128xf32>
    %389 = arith.cmpf oge, %387, %388 : vector<8x128xf32>
    %cst_152 = arith.constant 0.00999999977 : f32
    %390 = vector.broadcast %cst_152 : f32 to vector<8x128xf32>
    %391 = arith.mulf %390, %387 : vector<8x128xf32>
    %392 = arith.select %389, %387, %391 : vector<8x128xi1>, vector<8x128xf32>
    %393 = tpu.iota {dimensions = array<i32: 0>} : vector<8x1xi32>
    %c6_i32 = arith.constant 6 : i32
    %394 = vector.broadcast %c6_i32 : i32 to vector<8x1xi32>
    %395 = arith.cmpi slt, %393, %394 : vector<8x1xi32>
    %cst_153 = arith.constant 0.000000e+00 : f32
    %396 = vector.shape_cast %395 : vector<8x1xi1> to vector<8x1xi1>
    %397 = vector.broadcast %396 : vector<8x1xi1> to vector<8x128xi1>
    %398 = vector.broadcast %cst_153 : f32 to vector<8x128xf32>
    %399 = arith.select %397, %392, %398 : vector<8x128xi1>, vector<8x128xf32>
    %c1 = arith.constant 1 : index
    %c0_154 = arith.constant 0 : index
    %c0_155 = arith.constant 0 : index
    %400 = vector.load %arg13[%c1, %c0_154, %c0_155] : memref<2x128x128xbf16, #tpu.memory_space<vmem>>, vector<1x128x128xbf16>
    %401 = vector.shape_cast %400 : vector<1x128x128xbf16> to vector<128x128xbf16>
    %c1_156 = arith.constant 1 : index
    %c0_157 = arith.constant 0 : index
    %c0_158 = arith.constant 0 : index
    %402 = vector.load %arg14[%c1_156, %c0_157, %c0_158] : memref<2x1x128xf32, #tpu.memory_space<vmem>>, vector<1x1x128xf32>
    %403 = vector.shape_cast %402 : vector<1x1x128xf32> to vector<1x128xf32>
    %c1_159 = arith.constant 1 : index
    %c0_160 = arith.constant 0 : index
    %c0_161 = arith.constant 0 : index
    %404 = vector.load %arg15[%c1_159, %c0_160, %c0_161] : memref<2x1x128xf32, #tpu.memory_space<vmem>>, vector<1x1x128xf32>
    %405 = vector.shape_cast %404 : vector<1x1x128xf32> to vector<1x128xf32>
    %c1_162 = arith.constant 1 : index
    %c0_163 = arith.constant 0 : index
    %c0_164 = arith.constant 0 : index
    %406 = vector.load %arg16[%c1_162, %c0_163, %c0_164] : memref<2x1x128xf32, #tpu.memory_space<vmem>>, vector<1x1x128xf32>
    %407 = vector.shape_cast %406 : vector<1x1x128xf32> to vector<1x128xf32>
    %408 = arith.truncf %214 : vector<16x128xf32> to vector<16x128xbf16>
    %cst_165 = arith.constant dense<0.000000e+00> : vector<16x128xf32>
    %409 = tpu.matmul %408, %401, %cst_165 {dimension_numbers = #tpu.dot_dimension_numbers<[1], [0], [0], [1], [0, 0, 1, 1], [], []>} : vector<16x128xbf16>, vector<128x128xbf16>, vector<16x128xf32> -> vector<16x128xf32>
    %410 = arith.truncf %409 : vector<16x128xf32> to vector<16x128xbf16>
    %411 = vector.broadcast %405 : vector<1x128xf32> to vector<16x128xf32>
    %412 = arith.mulf %409, %411 : vector<16x128xf32>
    %cst_166 = arith.constant dense<0.000000e+00> : vector<16xf32>
    %413 = vector.multi_reduction <add>, %412, %cst_166 [1] : vector<16x128xf32> to vector<16xf32>
    %414 = vector.shape_cast %413 : vector<16xf32> to vector<16x1xf32>
    %415 = vector.broadcast %403 : vector<1x128xf32> to vector<16x128xf32>
    %416 = arith.mulf %409, %415 : vector<16x128xf32>
    %cst_167 = arith.constant dense<0.000000e+00> : vector<16xf32>
    %417 = vector.multi_reduction <add>, %416, %cst_167 [1] : vector<16x128xf32> to vector<16xf32>
    %418 = vector.shape_cast %417 : vector<16xf32> to vector<16x1xf32>
    %419 = tpu.transpose %418, [1, 0] : vector<16x1xf32> -> vector<1x16xf32>
    %420 = arith.truncf %289 : vector<16x128xf32> to vector<16x128xbf16>
    %cst_168 = arith.constant dense<0.000000e+00> : vector<16x128xf32>
    %421 = tpu.matmul %420, %401, %cst_168 {dimension_numbers = #tpu.dot_dimension_numbers<[1], [0], [0], [1], [0, 0, 1, 1], [], []>} : vector<16x128xbf16>, vector<128x128xbf16>, vector<16x128xf32> -> vector<16x128xf32>
    %422 = arith.truncf %421 : vector<16x128xf32> to vector<16x128xbf16>
    %423 = vector.broadcast %405 : vector<1x128xf32> to vector<16x128xf32>
    %424 = arith.mulf %421, %423 : vector<16x128xf32>
    %cst_169 = arith.constant dense<0.000000e+00> : vector<16xf32>
    %425 = vector.multi_reduction <add>, %424, %cst_169 [1] : vector<16x128xf32> to vector<16xf32>
    %426 = vector.shape_cast %425 : vector<16xf32> to vector<16x1xf32>
    %427 = vector.broadcast %403 : vector<1x128xf32> to vector<16x128xf32>
    %428 = arith.mulf %421, %427 : vector<16x128xf32>
    %cst_170 = arith.constant dense<0.000000e+00> : vector<16xf32>
    %429 = vector.multi_reduction <add>, %428, %cst_170 [1] : vector<16x128xf32> to vector<16xf32>
    %430 = vector.shape_cast %429 : vector<16xf32> to vector<16x1xf32>
    %431 = tpu.transpose %430, [1, 0] : vector<16x1xf32> -> vector<1x16xf32>
    %432 = arith.truncf %399 : vector<8x128xf32> to vector<8x128xbf16>
    %cst_171 = arith.constant dense<0.000000e+00> : vector<8x128xf32>
    %433 = tpu.matmul %432, %401, %cst_171 {dimension_numbers = #tpu.dot_dimension_numbers<[1], [0], [0], [1], [0, 0, 1, 1], [], []>} : vector<8x128xbf16>, vector<128x128xbf16>, vector<8x128xf32> -> vector<8x128xf32>
    %434 = arith.truncf %433 : vector<8x128xf32> to vector<8x128xbf16>
    %435 = vector.broadcast %405 : vector<1x128xf32> to vector<8x128xf32>
    %436 = arith.mulf %433, %435 : vector<8x128xf32>
    %cst_172 = arith.constant dense<0.000000e+00> : vector<8xf32>
    %437 = vector.multi_reduction <add>, %436, %cst_172 [1] : vector<8x128xf32> to vector<8xf32>
    %438 = vector.shape_cast %437 : vector<8xf32> to vector<8x1xf32>
    %439 = vector.broadcast %403 : vector<1x128xf32> to vector<8x128xf32>
    %440 = arith.mulf %433, %439 : vector<8x128xf32>
    %cst_173 = arith.constant dense<0.000000e+00> : vector<8xf32>
    %441 = vector.multi_reduction <add>, %440, %cst_173 [1] : vector<8x128xf32> to vector<8xf32>
    %442 = vector.shape_cast %441 : vector<8xf32> to vector<8x1xf32>
    %443 = tpu.transpose %442, [1, 0] : vector<8x1xf32> -> vector<1x8xf32>
    %cst_174 = arith.constant 0.000000e+00 : f32
    %444 = vector.broadcast %cst_174 : f32 to vector<16x128xf32>
    %445 = vector.broadcast %414 : vector<16x1xf32> to vector<16x16xf32>
    %446 = vector.broadcast %419 : vector<1x16xf32> to vector<16x16xf32>
    %447 = arith.addf %445, %446 : vector<16x16xf32>
    %cst_175 = arith.constant 0.000000e+00 : f32
    %448 = vector.broadcast %cst_175 : f32 to vector<16x16xf32>
    %449 = arith.cmpf oge, %447, %448 : vector<16x16xf32>
    %cst_176 = arith.constant 2.000000e-01 : f32
    %450 = vector.broadcast %cst_176 : f32 to vector<16x16xf32>
    %451 = arith.mulf %450, %447 : vector<16x16xf32>
    %452 = arith.select %449, %447, %451 : vector<16x16xi1>, vector<16x16xf32>
    %cst_177 = arith.constant 0.000000e+00 : f32
    %453 = vector.broadcast %cst_177 : f32 to vector<16x16xf32>
    %c0_178 = arith.constant 0 : index
    %c0_179 = arith.constant 0 : index
    %454 = vector.load %arg11[%c0_178, %c0_179] : memref<16x16xi8, #tpu.memory_space<vmem>>, vector<16x16xi8>
    %455 = arith.sitofp %454 : vector<16x16xi8> to vector<16x16xf32>
    %cst_180 = arith.constant 0.000000e+00 : f32
    %456 = vector.broadcast %cst_180 : f32 to vector<16x16xf32>
    %457 = arith.cmpf ogt, %455, %456 : vector<16x16xf32>
    %cst_181 = arith.constant -1.000000e+30 : f32
    %458 = vector.broadcast %cst_181 : f32 to vector<16x16xf32>
    %459 = arith.select %457, %452, %458 : vector<16x16xi1>, vector<16x16xf32>
    %cst_182 = arith.constant dense<0xFF800000> : vector<16xf32>
    %460 = vector.multi_reduction <maximumf>, %459, %cst_182 [1] : vector<16x16xf32> to vector<16xf32>
    %461 = vector.shape_cast %460 : vector<16xf32> to vector<16x1xf32>
    %462 = vector.broadcast %461 : vector<16x1xf32> to vector<16x16xf32>
    %463 = arith.subf %459, %462 : vector<16x16xf32>
    %464 = math.exp %463 : vector<16x16xf32>
    %cst_183 = arith.constant 0.000000e+00 : f32
    %465 = vector.broadcast %cst_183 : f32 to vector<16x16xf32>
    %466 = arith.select %457, %464, %465 : vector<16x16xi1>, vector<16x16xf32>
    %cst_184 = arith.constant dense<0.000000e+00> : vector<16xf32>
    %467 = vector.multi_reduction <add>, %466, %cst_184 [1] : vector<16x16xf32> to vector<16xf32>
    %468 = vector.shape_cast %467 : vector<16xf32> to vector<16x1xf32>
    %cst_185 = arith.constant 0.000000e+00 : f32
    %469 = vector.broadcast %cst_185 : f32 to vector<16x1xf32>
    %470 = arith.cmpf ogt, %468, %469 : vector<16x1xf32>
    %cst_186 = arith.constant 1.000000e+00 : f32
    %471 = vector.broadcast %cst_186 : f32 to vector<16x1xf32>
    %472 = arith.select %470, %468, %471 : vector<16x1xi1>, vector<16x1xf32>
    %473 = tpu.reciprocal %472 {approx = true} : vector<16x1xf32> -> vector<16x1xf32>
    %474 = vector.broadcast %473 : vector<16x1xf32> to vector<16x16xf32>
    %475 = arith.mulf %466, %474 : vector<16x16xf32>
    %476 = arith.addf %453, %475 : vector<16x16xf32>
    %c0_187 = arith.constant 0 : index
    %c0_188 = arith.constant 0 : index
    %477 = vector.load %arg12[%c0_187, %c0_188] : memref<16x16xi8, #tpu.memory_space<vmem>>, vector<16x16xi8>
    %478 = arith.sitofp %477 : vector<16x16xi8> to vector<16x16xf32>
    %cst_189 = arith.constant 0.000000e+00 : f32
    %479 = vector.broadcast %cst_189 : f32 to vector<16x16xf32>
    %480 = arith.cmpf ogt, %478, %479 : vector<16x16xf32>
    %cst_190 = arith.constant -1.000000e+30 : f32
    %481 = vector.broadcast %cst_190 : f32 to vector<16x16xf32>
    %482 = arith.select %480, %452, %481 : vector<16x16xi1>, vector<16x16xf32>
    %cst_191 = arith.constant dense<0xFF800000> : vector<16xf32>
    %483 = vector.multi_reduction <maximumf>, %482, %cst_191 [1] : vector<16x16xf32> to vector<16xf32>
    %484 = vector.shape_cast %483 : vector<16xf32> to vector<16x1xf32>
    %485 = vector.broadcast %484 : vector<16x1xf32> to vector<16x16xf32>
    %486 = arith.subf %482, %485 : vector<16x16xf32>
    %487 = math.exp %486 : vector<16x16xf32>
    %cst_192 = arith.constant 0.000000e+00 : f32
    %488 = vector.broadcast %cst_192 : f32 to vector<16x16xf32>
    %489 = arith.select %480, %487, %488 : vector<16x16xi1>, vector<16x16xf32>
    %cst_193 = arith.constant dense<0.000000e+00> : vector<16xf32>
    %490 = vector.multi_reduction <add>, %489, %cst_193 [1] : vector<16x16xf32> to vector<16xf32>
    %491 = vector.shape_cast %490 : vector<16xf32> to vector<16x1xf32>
    %cst_194 = arith.constant 0.000000e+00 : f32
    %492 = vector.broadcast %cst_194 : f32 to vector<16x1xf32>
    %493 = arith.cmpf ogt, %491, %492 : vector<16x1xf32>
    %cst_195 = arith.constant 1.000000e+00 : f32
    %494 = vector.broadcast %cst_195 : f32 to vector<16x1xf32>
    %495 = arith.select %493, %491, %494 : vector<16x1xi1>, vector<16x1xf32>
    %496 = tpu.reciprocal %495 {approx = true} : vector<16x1xf32> -> vector<16x1xf32>
    %497 = vector.broadcast %496 : vector<16x1xf32> to vector<16x16xf32>
    %498 = arith.mulf %489, %497 : vector<16x16xf32>
    %499 = arith.addf %476, %498 : vector<16x16xf32>
    %500 = arith.truncf %499 : vector<16x16xf32> to vector<16x16xbf16>
    %cst_196 = arith.constant dense<0.000000e+00> : vector<16x128xf32>
    %501 = tpu.matmul %500, %410, %cst_196 {dimension_numbers = #tpu.dot_dimension_numbers<[1], [0], [0], [1], [0, 0, 1, 1], [], []>} : vector<16x16xbf16>, vector<16x128xbf16>, vector<16x128xf32> -> vector<16x128xf32>
    %502 = arith.addf %444, %501 : vector<16x128xf32>
    %503 = vector.broadcast %414 : vector<16x1xf32> to vector<16x16xf32>
    %504 = vector.broadcast %431 : vector<1x16xf32> to vector<16x16xf32>
    %505 = arith.addf %503, %504 : vector<16x16xf32>
    %cst_197 = arith.constant 0.000000e+00 : f32
    %506 = vector.broadcast %cst_197 : f32 to vector<16x16xf32>
    %507 = arith.cmpf oge, %505, %506 : vector<16x16xf32>
    %cst_198 = arith.constant 2.000000e-01 : f32
    %508 = vector.broadcast %cst_198 : f32 to vector<16x16xf32>
    %509 = arith.mulf %508, %505 : vector<16x16xf32>
    %510 = arith.select %507, %505, %509 : vector<16x16xi1>, vector<16x16xf32>
    %cst_199 = arith.constant 0.000000e+00 : f32
    %511 = vector.broadcast %cst_199 : f32 to vector<16x16xf32>
    %c0_200 = arith.constant 0 : index
    %c0_201 = arith.constant 0 : index
    %512 = vector.load %arg4[%c0_200, %c0_201] : memref<16x16xi8, #tpu.memory_space<vmem>>, vector<16x16xi8>
    %513 = arith.sitofp %512 : vector<16x16xi8> to vector<16x16xf32>
    %cst_202 = arith.constant 0.000000e+00 : f32
    %514 = vector.broadcast %cst_202 : f32 to vector<16x16xf32>
    %515 = arith.cmpf ogt, %513, %514 : vector<16x16xf32>
    %cst_203 = arith.constant -1.000000e+30 : f32
    %516 = vector.broadcast %cst_203 : f32 to vector<16x16xf32>
    %517 = arith.select %515, %510, %516 : vector<16x16xi1>, vector<16x16xf32>
    %cst_204 = arith.constant dense<0xFF800000> : vector<16xf32>
    %518 = vector.multi_reduction <maximumf>, %517, %cst_204 [1] : vector<16x16xf32> to vector<16xf32>
    %519 = vector.shape_cast %518 : vector<16xf32> to vector<16x1xf32>
    %520 = vector.broadcast %519 : vector<16x1xf32> to vector<16x16xf32>
    %521 = arith.subf %517, %520 : vector<16x16xf32>
    %522 = math.exp %521 : vector<16x16xf32>
    %cst_205 = arith.constant 0.000000e+00 : f32
    %523 = vector.broadcast %cst_205 : f32 to vector<16x16xf32>
    %524 = arith.select %515, %522, %523 : vector<16x16xi1>, vector<16x16xf32>
    %cst_206 = arith.constant dense<0.000000e+00> : vector<16xf32>
    %525 = vector.multi_reduction <add>, %524, %cst_206 [1] : vector<16x16xf32> to vector<16xf32>
    %526 = vector.shape_cast %525 : vector<16xf32> to vector<16x1xf32>
    %cst_207 = arith.constant 0.000000e+00 : f32
    %527 = vector.broadcast %cst_207 : f32 to vector<16x1xf32>
    %528 = arith.cmpf ogt, %526, %527 : vector<16x1xf32>
    %cst_208 = arith.constant 1.000000e+00 : f32
    %529 = vector.broadcast %cst_208 : f32 to vector<16x1xf32>
    %530 = arith.select %528, %526, %529 : vector<16x1xi1>, vector<16x1xf32>
    %531 = tpu.reciprocal %530 {approx = true} : vector<16x1xf32> -> vector<16x1xf32>
    %532 = vector.broadcast %531 : vector<16x1xf32> to vector<16x16xf32>
    %533 = arith.mulf %524, %532 : vector<16x16xf32>
    %534 = arith.addf %511, %533 : vector<16x16xf32>
    %c0_209 = arith.constant 0 : index
    %c0_210 = arith.constant 0 : index
    %535 = vector.load %arg6[%c0_209, %c0_210] : memref<16x16xi8, #tpu.memory_space<vmem>>, vector<16x16xi8>
    %536 = arith.sitofp %535 : vector<16x16xi8> to vector<16x16xf32>
    %cst_211 = arith.constant 0.000000e+00 : f32
    %537 = vector.broadcast %cst_211 : f32 to vector<16x16xf32>
    %538 = arith.cmpf ogt, %536, %537 : vector<16x16xf32>
    %cst_212 = arith.constant -1.000000e+30 : f32
    %539 = vector.broadcast %cst_212 : f32 to vector<16x16xf32>
    %540 = arith.select %538, %510, %539 : vector<16x16xi1>, vector<16x16xf32>
    %cst_213 = arith.constant dense<0xFF800000> : vector<16xf32>
    %541 = vector.multi_reduction <maximumf>, %540, %cst_213 [1] : vector<16x16xf32> to vector<16xf32>
    %542 = vector.shape_cast %541 : vector<16xf32> to vector<16x1xf32>
    %543 = vector.broadcast %542 : vector<16x1xf32> to vector<16x16xf32>
    %544 = arith.subf %540, %543 : vector<16x16xf32>
    %545 = math.exp %544 : vector<16x16xf32>
    %cst_214 = arith.constant 0.000000e+00 : f32
    %546 = vector.broadcast %cst_214 : f32 to vector<16x16xf32>
    %547 = arith.select %538, %545, %546 : vector<16x16xi1>, vector<16x16xf32>
    %cst_215 = arith.constant dense<0.000000e+00> : vector<16xf32>
    %548 = vector.multi_reduction <add>, %547, %cst_215 [1] : vector<16x16xf32> to vector<16xf32>
    %549 = vector.shape_cast %548 : vector<16xf32> to vector<16x1xf32>
    %cst_216 = arith.constant 0.000000e+00 : f32
    %550 = vector.broadcast %cst_216 : f32 to vector<16x1xf32>
    %551 = arith.cmpf ogt, %549, %550 : vector<16x1xf32>
    %cst_217 = arith.constant 1.000000e+00 : f32
    %552 = vector.broadcast %cst_217 : f32 to vector<16x1xf32>
    %553 = arith.select %551, %549, %552 : vector<16x1xi1>, vector<16x1xf32>
    %554 = tpu.reciprocal %553 {approx = true} : vector<16x1xf32> -> vector<16x1xf32>
    %555 = vector.broadcast %554 : vector<16x1xf32> to vector<16x16xf32>
    %556 = arith.mulf %547, %555 : vector<16x16xf32>
    %557 = arith.addf %534, %556 : vector<16x16xf32>
    %558 = arith.truncf %557 : vector<16x16xf32> to vector<16x16xbf16>
    %cst_218 = arith.constant dense<0.000000e+00> : vector<16x128xf32>
    %559 = tpu.matmul %558, %422, %cst_218 {dimension_numbers = #tpu.dot_dimension_numbers<[1], [0], [0], [1], [0, 0, 1, 1], [], []>} : vector<16x16xbf16>, vector<16x128xbf16>, vector<16x128xf32> -> vector<16x128xf32>
    %560 = arith.addf %502, %559 : vector<16x128xf32>
    %561 = vector.broadcast %414 : vector<16x1xf32> to vector<16x8xf32>
    %562 = vector.broadcast %443 : vector<1x8xf32> to vector<16x8xf32>
    %563 = arith.addf %561, %562 : vector<16x8xf32>
    %cst_219 = arith.constant 0.000000e+00 : f32
    %564 = vector.broadcast %cst_219 : f32 to vector<16x8xf32>
    %565 = arith.cmpf oge, %563, %564 : vector<16x8xf32>
    %cst_220 = arith.constant 2.000000e-01 : f32
    %566 = vector.broadcast %cst_220 : f32 to vector<16x8xf32>
    %567 = arith.mulf %566, %563 : vector<16x8xf32>
    %568 = arith.select %565, %563, %567 : vector<16x8xi1>, vector<16x8xf32>
    %cst_221 = arith.constant 0.000000e+00 : f32
    %569 = vector.broadcast %cst_221 : f32 to vector<16x8xf32>
    %c0_222 = arith.constant 0 : index
    %c0_223 = arith.constant 0 : index
    %570 = vector.load %arg8[%c0_222, %c0_223] : memref<16x8xi8, #tpu.memory_space<vmem>>, vector<16x8xi8>
    %571 = arith.sitofp %570 : vector<16x8xi8> to vector<16x8xf32>
    %cst_224 = arith.constant 0.000000e+00 : f32
    %572 = vector.broadcast %cst_224 : f32 to vector<16x8xf32>
    %573 = arith.cmpf ogt, %571, %572 : vector<16x8xf32>
    %cst_225 = arith.constant -1.000000e+30 : f32
    %574 = vector.broadcast %cst_225 : f32 to vector<16x8xf32>
    %575 = arith.select %573, %568, %574 : vector<16x8xi1>, vector<16x8xf32>
    %cst_226 = arith.constant dense<0xFF800000> : vector<16xf32>
    %576 = vector.multi_reduction <maximumf>, %575, %cst_226 [1] : vector<16x8xf32> to vector<16xf32>
    %577 = vector.shape_cast %576 : vector<16xf32> to vector<16x1xf32>
    %578 = vector.broadcast %577 : vector<16x1xf32> to vector<16x8xf32>
    %579 = arith.subf %575, %578 : vector<16x8xf32>
    %580 = math.exp %579 : vector<16x8xf32>
    %cst_227 = arith.constant 0.000000e+00 : f32
    %581 = vector.broadcast %cst_227 : f32 to vector<16x8xf32>
    %582 = arith.select %573, %580, %581 : vector<16x8xi1>, vector<16x8xf32>
    %cst_228 = arith.constant dense<0.000000e+00> : vector<16xf32>
    %583 = vector.multi_reduction <add>, %582, %cst_228 [1] : vector<16x8xf32> to vector<16xf32>
    %584 = vector.shape_cast %583 : vector<16xf32> to vector<16x1xf32>
    %cst_229 = arith.constant 0.000000e+00 : f32
    %585 = vector.broadcast %cst_229 : f32 to vector<16x1xf32>
    %586 = arith.cmpf ogt, %584, %585 : vector<16x1xf32>
    %cst_230 = arith.constant 1.000000e+00 : f32
    %587 = vector.broadcast %cst_230 : f32 to vector<16x1xf32>
    %588 = arith.select %586, %584, %587 : vector<16x1xi1>, vector<16x1xf32>
    %589 = tpu.reciprocal %588 {approx = true} : vector<16x1xf32> -> vector<16x1xf32>
    %590 = vector.broadcast %589 : vector<16x1xf32> to vector<16x8xf32>
    %591 = arith.mulf %582, %590 : vector<16x8xf32>
    %592 = arith.addf %569, %591 : vector<16x8xf32>
    %593 = arith.truncf %592 : vector<16x8xf32> to vector<16x8xbf16>
    %cst_231 = arith.constant dense<0.000000e+00> : vector<16x128xf32>
    %594 = tpu.matmul %593, %434, %cst_231 {dimension_numbers = #tpu.dot_dimension_numbers<[1], [0], [0], [1], [0, 0, 1, 1], [], []>} : vector<16x8xbf16>, vector<8x128xbf16>, vector<16x128xf32> -> vector<16x128xf32>
    %595 = arith.addf %560, %594 : vector<16x128xf32>
    %cst_232 = arith.constant 2.000000e-01 : f32
    %596 = vector.broadcast %cst_232 : f32 to vector<16x128xf32>
    %597 = arith.mulf %595, %596 : vector<16x128xf32>
    %598 = vector.broadcast %407 : vector<1x128xf32> to vector<16x128xf32>
    %599 = arith.addf %597, %598 : vector<16x128xf32>
    %cst_233 = arith.constant 0.000000e+00 : f32
    %600 = vector.broadcast %cst_233 : f32 to vector<16x128xf32>
    %601 = arith.cmpf oge, %599, %600 : vector<16x128xf32>
    %cst_234 = arith.constant 0.00999999977 : f32
    %602 = vector.broadcast %cst_234 : f32 to vector<16x128xf32>
    %603 = arith.mulf %602, %599 : vector<16x128xf32>
    %604 = arith.select %601, %599, %603 : vector<16x128xi1>, vector<16x128xf32>
    %605 = tpu.iota {dimensions = array<i32: 0>} : vector<16x1xi32>
    %c12_i32_235 = arith.constant 12 : i32
    %606 = vector.broadcast %c12_i32_235 : i32 to vector<16x1xi32>
    %607 = arith.cmpi slt, %605, %606 : vector<16x1xi32>
    %cst_236 = arith.constant 0.000000e+00 : f32
    %608 = vector.shape_cast %607 : vector<16x1xi1> to vector<16x1xi1>
    %609 = vector.broadcast %608 : vector<16x1xi1> to vector<16x128xi1>
    %610 = vector.broadcast %cst_236 : f32 to vector<16x128xf32>
    %611 = arith.select %609, %604, %610 : vector<16x128xi1>, vector<16x128xf32>
    %cst_237 = arith.constant 0.000000e+00 : f32
    %612 = vector.broadcast %cst_237 : f32 to vector<16x128xf32>
    %613 = vector.broadcast %426 : vector<16x1xf32> to vector<16x16xf32>
    %614 = vector.broadcast %419 : vector<1x16xf32> to vector<16x16xf32>
    %615 = arith.addf %613, %614 : vector<16x16xf32>
    %cst_238 = arith.constant 0.000000e+00 : f32
    %616 = vector.broadcast %cst_238 : f32 to vector<16x16xf32>
    %617 = arith.cmpf oge, %615, %616 : vector<16x16xf32>
    %cst_239 = arith.constant 2.000000e-01 : f32
    %618 = vector.broadcast %cst_239 : f32 to vector<16x16xf32>
    %619 = arith.mulf %618, %615 : vector<16x16xf32>
    %620 = arith.select %617, %615, %619 : vector<16x16xi1>, vector<16x16xf32>
    %cst_240 = arith.constant 0.000000e+00 : f32
    %621 = vector.broadcast %cst_240 : f32 to vector<16x16xf32>
    %c0_241 = arith.constant 0 : index
    %c0_242 = arith.constant 0 : index
    %622 = vector.load %arg3[%c0_241, %c0_242] : memref<16x16xi8, #tpu.memory_space<vmem>>, vector<16x16xi8>
    %623 = arith.sitofp %622 : vector<16x16xi8> to vector<16x16xf32>
    %cst_243 = arith.constant 0.000000e+00 : f32
    %624 = vector.broadcast %cst_243 : f32 to vector<16x16xf32>
    %625 = arith.cmpf ogt, %623, %624 : vector<16x16xf32>
    %cst_244 = arith.constant -1.000000e+30 : f32
    %626 = vector.broadcast %cst_244 : f32 to vector<16x16xf32>
    %627 = arith.select %625, %620, %626 : vector<16x16xi1>, vector<16x16xf32>
    %cst_245 = arith.constant dense<0xFF800000> : vector<16xf32>
    %628 = vector.multi_reduction <maximumf>, %627, %cst_245 [1] : vector<16x16xf32> to vector<16xf32>
    %629 = vector.shape_cast %628 : vector<16xf32> to vector<16x1xf32>
    %630 = vector.broadcast %629 : vector<16x1xf32> to vector<16x16xf32>
    %631 = arith.subf %627, %630 : vector<16x16xf32>
    %632 = math.exp %631 : vector<16x16xf32>
    %cst_246 = arith.constant 0.000000e+00 : f32
    %633 = vector.broadcast %cst_246 : f32 to vector<16x16xf32>
    %634 = arith.select %625, %632, %633 : vector<16x16xi1>, vector<16x16xf32>
    %cst_247 = arith.constant dense<0.000000e+00> : vector<16xf32>
    %635 = vector.multi_reduction <add>, %634, %cst_247 [1] : vector<16x16xf32> to vector<16xf32>
    %636 = vector.shape_cast %635 : vector<16xf32> to vector<16x1xf32>
    %cst_248 = arith.constant 0.000000e+00 : f32
    %637 = vector.broadcast %cst_248 : f32 to vector<16x1xf32>
    %638 = arith.cmpf ogt, %636, %637 : vector<16x1xf32>
    %cst_249 = arith.constant 1.000000e+00 : f32
    %639 = vector.broadcast %cst_249 : f32 to vector<16x1xf32>
    %640 = arith.select %638, %636, %639 : vector<16x1xi1>, vector<16x1xf32>
    %641 = tpu.reciprocal %640 {approx = true} : vector<16x1xf32> -> vector<16x1xf32>
    %642 = vector.broadcast %641 : vector<16x1xf32> to vector<16x16xf32>
    %643 = arith.mulf %634, %642 : vector<16x16xf32>
    %644 = arith.addf %621, %643 : vector<16x16xf32>
    %c0_250 = arith.constant 0 : index
    %c0_251 = arith.constant 0 : index
    %645 = vector.load %arg5[%c0_250, %c0_251] : memref<16x16xi8, #tpu.memory_space<vmem>>, vector<16x16xi8>
    %646 = arith.sitofp %645 : vector<16x16xi8> to vector<16x16xf32>
    %cst_252 = arith.constant 0.000000e+00 : f32
    %647 = vector.broadcast %cst_252 : f32 to vector<16x16xf32>
    %648 = arith.cmpf ogt, %646, %647 : vector<16x16xf32>
    %cst_253 = arith.constant -1.000000e+30 : f32
    %649 = vector.broadcast %cst_253 : f32 to vector<16x16xf32>
    %650 = arith.select %648, %620, %649 : vector<16x16xi1>, vector<16x16xf32>
    %cst_254 = arith.constant dense<0xFF800000> : vector<16xf32>
    %651 = vector.multi_reduction <maximumf>, %650, %cst_254 [1] : vector<16x16xf32> to vector<16xf32>
    %652 = vector.shape_cast %651 : vector<16xf32> to vector<16x1xf32>
    %653 = vector.broadcast %652 : vector<16x1xf32> to vector<16x16xf32>
    %654 = arith.subf %650, %653 : vector<16x16xf32>
    %655 = math.exp %654 : vector<16x16xf32>
    %cst_255 = arith.constant 0.000000e+00 : f32
    %656 = vector.broadcast %cst_255 : f32 to vector<16x16xf32>
    %657 = arith.select %648, %655, %656 : vector<16x16xi1>, vector<16x16xf32>
    %cst_256 = arith.constant dense<0.000000e+00> : vector<16xf32>
    %658 = vector.multi_reduction <add>, %657, %cst_256 [1] : vector<16x16xf32> to vector<16xf32>
    %659 = vector.shape_cast %658 : vector<16xf32> to vector<16x1xf32>
    %cst_257 = arith.constant 0.000000e+00 : f32
    %660 = vector.broadcast %cst_257 : f32 to vector<16x1xf32>
    %661 = arith.cmpf ogt, %659, %660 : vector<16x1xf32>
    %cst_258 = arith.constant 1.000000e+00 : f32
    %662 = vector.broadcast %cst_258 : f32 to vector<16x1xf32>
    %663 = arith.select %661, %659, %662 : vector<16x1xi1>, vector<16x1xf32>
    %664 = tpu.reciprocal %663 {approx = true} : vector<16x1xf32> -> vector<16x1xf32>
    %665 = vector.broadcast %664 : vector<16x1xf32> to vector<16x16xf32>
    %666 = arith.mulf %657, %665 : vector<16x16xf32>
    %667 = arith.addf %644, %666 : vector<16x16xf32>
    %668 = arith.truncf %667 : vector<16x16xf32> to vector<16x16xbf16>
    %cst_259 = arith.constant dense<0.000000e+00> : vector<16x128xf32>
    %669 = tpu.matmul %668, %410, %cst_259 {dimension_numbers = #tpu.dot_dimension_numbers<[1], [0], [0], [1], [0, 0, 1, 1], [], []>} : vector<16x16xbf16>, vector<16x128xbf16>, vector<16x128xf32> -> vector<16x128xf32>
    %670 = arith.addf %612, %669 : vector<16x128xf32>
    %cst_260 = arith.constant 5.000000e-01 : f32
    %671 = vector.broadcast %cst_260 : f32 to vector<16x128xf32>
    %672 = arith.mulf %670, %671 : vector<16x128xf32>
    %673 = vector.broadcast %407 : vector<1x128xf32> to vector<16x128xf32>
    %674 = arith.addf %672, %673 : vector<16x128xf32>
    %cst_261 = arith.constant 0.000000e+00 : f32
    %675 = vector.broadcast %cst_261 : f32 to vector<16x128xf32>
    %676 = arith.cmpf oge, %674, %675 : vector<16x128xf32>
    %cst_262 = arith.constant 0.00999999977 : f32
    %677 = vector.broadcast %cst_262 : f32 to vector<16x128xf32>
    %678 = arith.mulf %677, %674 : vector<16x128xf32>
    %679 = arith.select %676, %674, %678 : vector<16x128xi1>, vector<16x128xf32>
    %680 = tpu.iota {dimensions = array<i32: 0>} : vector<16x1xi32>
    %c10_i32_263 = arith.constant 10 : i32
    %681 = vector.broadcast %c10_i32_263 : i32 to vector<16x1xi32>
    %682 = arith.cmpi slt, %680, %681 : vector<16x1xi32>
    %cst_264 = arith.constant 0.000000e+00 : f32
    %683 = vector.shape_cast %682 : vector<16x1xi1> to vector<16x1xi1>
    %684 = vector.broadcast %683 : vector<16x1xi1> to vector<16x128xi1>
    %685 = vector.broadcast %cst_264 : f32 to vector<16x128xf32>
    %686 = arith.select %684, %679, %685 : vector<16x128xi1>, vector<16x128xf32>
    %cst_265 = arith.constant 0.000000e+00 : f32
    %687 = vector.broadcast %cst_265 : f32 to vector<8x128xf32>
    %688 = vector.broadcast %438 : vector<8x1xf32> to vector<8x16xf32>
    %689 = vector.broadcast %419 : vector<1x16xf32> to vector<8x16xf32>
    %690 = arith.addf %688, %689 : vector<8x16xf32>
    %cst_266 = arith.constant 0.000000e+00 : f32
    %691 = vector.broadcast %cst_266 : f32 to vector<8x16xf32>
    %692 = arith.cmpf oge, %690, %691 : vector<8x16xf32>
    %cst_267 = arith.constant 2.000000e-01 : f32
    %693 = vector.broadcast %cst_267 : f32 to vector<8x16xf32>
    %694 = arith.mulf %693, %690 : vector<8x16xf32>
    %695 = arith.select %692, %690, %694 : vector<8x16xi1>, vector<8x16xf32>
    %cst_268 = arith.constant 0.000000e+00 : f32
    %696 = vector.broadcast %cst_268 : f32 to vector<8x16xf32>
    %c0_269 = arith.constant 0 : index
    %c0_270 = arith.constant 0 : index
    %697 = vector.load %arg7[%c0_269, %c0_270] : memref<8x16xi8, #tpu.memory_space<vmem>>, vector<8x16xi8>
    %698 = arith.sitofp %697 : vector<8x16xi8> to vector<8x16xf32>
    %cst_271 = arith.constant 0.000000e+00 : f32
    %699 = vector.broadcast %cst_271 : f32 to vector<8x16xf32>
    %700 = arith.cmpf ogt, %698, %699 : vector<8x16xf32>
    %cst_272 = arith.constant -1.000000e+30 : f32
    %701 = vector.broadcast %cst_272 : f32 to vector<8x16xf32>
    %702 = arith.select %700, %695, %701 : vector<8x16xi1>, vector<8x16xf32>
    %cst_273 = arith.constant dense<0xFF800000> : vector<8xf32>
    %703 = vector.multi_reduction <maximumf>, %702, %cst_273 [1] : vector<8x16xf32> to vector<8xf32>
    %704 = vector.shape_cast %703 : vector<8xf32> to vector<8x1xf32>
    %705 = vector.broadcast %704 : vector<8x1xf32> to vector<8x16xf32>
    %706 = arith.subf %702, %705 : vector<8x16xf32>
    %707 = math.exp %706 : vector<8x16xf32>
    %cst_274 = arith.constant 0.000000e+00 : f32
    %708 = vector.broadcast %cst_274 : f32 to vector<8x16xf32>
    %709 = arith.select %700, %707, %708 : vector<8x16xi1>, vector<8x16xf32>
    %cst_275 = arith.constant dense<0.000000e+00> : vector<8xf32>
    %710 = vector.multi_reduction <add>, %709, %cst_275 [1] : vector<8x16xf32> to vector<8xf32>
    %711 = vector.shape_cast %710 : vector<8xf32> to vector<8x1xf32>
    %cst_276 = arith.constant 0.000000e+00 : f32
    %712 = vector.broadcast %cst_276 : f32 to vector<8x1xf32>
    %713 = arith.cmpf ogt, %711, %712 : vector<8x1xf32>
    %cst_277 = arith.constant 1.000000e+00 : f32
    %714 = vector.broadcast %cst_277 : f32 to vector<8x1xf32>
    %715 = arith.select %713, %711, %714 : vector<8x1xi1>, vector<8x1xf32>
    %716 = tpu.reciprocal %715 {approx = true} : vector<8x1xf32> -> vector<8x1xf32>
    %717 = vector.broadcast %716 : vector<8x1xf32> to vector<8x16xf32>
    %718 = arith.mulf %709, %717 : vector<8x16xf32>
    %719 = arith.addf %696, %718 : vector<8x16xf32>
    %720 = arith.truncf %719 : vector<8x16xf32> to vector<8x16xbf16>
    %cst_278 = arith.constant dense<0.000000e+00> : vector<8x128xf32>
    %721 = tpu.matmul %720, %410, %cst_278 {dimension_numbers = #tpu.dot_dimension_numbers<[1], [0], [0], [1], [0, 0, 1, 1], [], []>} : vector<8x16xbf16>, vector<16x128xbf16>, vector<8x128xf32> -> vector<8x128xf32>
    %722 = arith.addf %687, %721 : vector<8x128xf32>
    %723 = vector.broadcast %438 : vector<8x1xf32> to vector<8x8xf32>
    %724 = vector.broadcast %443 : vector<1x8xf32> to vector<8x8xf32>
    %725 = arith.addf %723, %724 : vector<8x8xf32>
    %cst_279 = arith.constant 0.000000e+00 : f32
    %726 = vector.broadcast %cst_279 : f32 to vector<8x8xf32>
    %727 = arith.cmpf oge, %725, %726 : vector<8x8xf32>
    %cst_280 = arith.constant 2.000000e-01 : f32
    %728 = vector.broadcast %cst_280 : f32 to vector<8x8xf32>
    %729 = arith.mulf %728, %725 : vector<8x8xf32>
    %730 = arith.select %727, %725, %729 : vector<8x8xi1>, vector<8x8xf32>
    %cst_281 = arith.constant 0.000000e+00 : f32
    %731 = vector.broadcast %cst_281 : f32 to vector<8x8xf32>
    %c0_282 = arith.constant 0 : index
    %c0_283 = arith.constant 0 : index
    %732 = vector.load %arg9[%c0_282, %c0_283] : memref<8x8xi8, #tpu.memory_space<vmem>>, vector<8x8xi8>
    %733 = arith.sitofp %732 : vector<8x8xi8> to vector<8x8xf32>
    %cst_284 = arith.constant 0.000000e+00 : f32
    %734 = vector.broadcast %cst_284 : f32 to vector<8x8xf32>
    %735 = arith.cmpf ogt, %733, %734 : vector<8x8xf32>
    %cst_285 = arith.constant -1.000000e+30 : f32
    %736 = vector.broadcast %cst_285 : f32 to vector<8x8xf32>
    %737 = arith.select %735, %730, %736 : vector<8x8xi1>, vector<8x8xf32>
    %cst_286 = arith.constant dense<0xFF800000> : vector<8xf32>
    %738 = vector.multi_reduction <maximumf>, %737, %cst_286 [1] : vector<8x8xf32> to vector<8xf32>
    %739 = vector.shape_cast %738 : vector<8xf32> to vector<8x1xf32>
    %740 = vector.broadcast %739 : vector<8x1xf32> to vector<8x8xf32>
    %741 = arith.subf %737, %740 : vector<8x8xf32>
    %742 = math.exp %741 : vector<8x8xf32>
    %cst_287 = arith.constant 0.000000e+00 : f32
    %743 = vector.broadcast %cst_287 : f32 to vector<8x8xf32>
    %744 = arith.select %735, %742, %743 : vector<8x8xi1>, vector<8x8xf32>
    %cst_288 = arith.constant dense<0.000000e+00> : vector<8xf32>
    %745 = vector.multi_reduction <add>, %744, %cst_288 [1] : vector<8x8xf32> to vector<8xf32>
    %746 = vector.shape_cast %745 : vector<8xf32> to vector<8x1xf32>
    %cst_289 = arith.constant 0.000000e+00 : f32
    %747 = vector.broadcast %cst_289 : f32 to vector<8x1xf32>
    %748 = arith.cmpf ogt, %746, %747 : vector<8x1xf32>
    %cst_290 = arith.constant 1.000000e+00 : f32
    %749 = vector.broadcast %cst_290 : f32 to vector<8x1xf32>
    %750 = arith.select %748, %746, %749 : vector<8x1xi1>, vector<8x1xf32>
    %751 = tpu.reciprocal %750 {approx = true} : vector<8x1xf32> -> vector<8x1xf32>
    %752 = vector.broadcast %751 : vector<8x1xf32> to vector<8x8xf32>
    %753 = arith.mulf %744, %752 : vector<8x8xf32>
    %754 = arith.addf %731, %753 : vector<8x8xf32>
    %c0_291 = arith.constant 0 : index
    %c0_292 = arith.constant 0 : index
    %755 = vector.load %arg10[%c0_291, %c0_292] : memref<8x8xi8, #tpu.memory_space<vmem>>, vector<8x8xi8>
    %756 = arith.sitofp %755 : vector<8x8xi8> to vector<8x8xf32>
    %cst_293 = arith.constant 0.000000e+00 : f32
    %757 = vector.broadcast %cst_293 : f32 to vector<8x8xf32>
    %758 = arith.cmpf ogt, %756, %757 : vector<8x8xf32>
    %cst_294 = arith.constant -1.000000e+30 : f32
    %759 = vector.broadcast %cst_294 : f32 to vector<8x8xf32>
    %760 = arith.select %758, %730, %759 : vector<8x8xi1>, vector<8x8xf32>
    %cst_295 = arith.constant dense<0xFF800000> : vector<8xf32>
    %761 = vector.multi_reduction <maximumf>, %760, %cst_295 [1] : vector<8x8xf32> to vector<8xf32>
    %762 = vector.shape_cast %761 : vector<8xf32> to vector<8x1xf32>
    %763 = vector.broadcast %762 : vector<8x1xf32> to vector<8x8xf32>
    %764 = arith.subf %760, %763 : vector<8x8xf32>
    %765 = math.exp %764 : vector<8x8xf32>
    %cst_296 = arith.constant 0.000000e+00 : f32
    %766 = vector.broadcast %cst_296 : f32 to vector<8x8xf32>
    %767 = arith.select %758, %765, %766 : vector<8x8xi1>, vector<8x8xf32>
    %cst_297 = arith.constant dense<0.000000e+00> : vector<8xf32>
    %768 = vector.multi_reduction <add>, %767, %cst_297 [1] : vector<8x8xf32> to vector<8xf32>
    %769 = vector.shape_cast %768 : vector<8xf32> to vector<8x1xf32>
    %cst_298 = arith.constant 0.000000e+00 : f32
    %770 = vector.broadcast %cst_298 : f32 to vector<8x1xf32>
    %771 = arith.cmpf ogt, %769, %770 : vector<8x1xf32>
    %cst_299 = arith.constant 1.000000e+00 : f32
    %772 = vector.broadcast %cst_299 : f32 to vector<8x1xf32>
    %773 = arith.select %771, %769, %772 : vector<8x1xi1>, vector<8x1xf32>
    %774 = tpu.reciprocal %773 {approx = true} : vector<8x1xf32> -> vector<8x1xf32>
    %775 = vector.broadcast %774 : vector<8x1xf32> to vector<8x8xf32>
    %776 = arith.mulf %767, %775 : vector<8x8xf32>
    %777 = arith.addf %754, %776 : vector<8x8xf32>
    %778 = arith.truncf %777 : vector<8x8xf32> to vector<8x8xbf16>
    %cst_300 = arith.constant dense<0.000000e+00> : vector<8x128xf32>
    %779 = tpu.matmul %778, %434, %cst_300 {dimension_numbers = #tpu.dot_dimension_numbers<[1], [0], [0], [1], [0, 0, 1, 1], [], []>} : vector<8x8xbf16>, vector<8x128xbf16>, vector<8x128xf32> -> vector<8x128xf32>
    %780 = arith.addf %722, %779 : vector<8x128xf32>
    %cst_301 = arith.constant 0.333333343 : f32
    %781 = vector.broadcast %cst_301 : f32 to vector<8x128xf32>
    %782 = arith.mulf %780, %781 : vector<8x128xf32>
    %783 = vector.broadcast %407 : vector<1x128xf32> to vector<8x128xf32>
    %784 = arith.addf %782, %783 : vector<8x128xf32>
    %cst_302 = arith.constant 0.000000e+00 : f32
    %785 = vector.broadcast %cst_302 : f32 to vector<8x128xf32>
    %786 = arith.cmpf oge, %784, %785 : vector<8x128xf32>
    %cst_303 = arith.constant 0.00999999977 : f32
    %787 = vector.broadcast %cst_303 : f32 to vector<8x128xf32>
    %788 = arith.mulf %787, %784 : vector<8x128xf32>
    %789 = arith.select %786, %784, %788 : vector<8x128xi1>, vector<8x128xf32>
    %790 = tpu.iota {dimensions = array<i32: 0>} : vector<8x1xi32>
    %c6_i32_304 = arith.constant 6 : i32
    %791 = vector.broadcast %c6_i32_304 : i32 to vector<8x1xi32>
    %792 = arith.cmpi slt, %790, %791 : vector<8x1xi32>
    %cst_305 = arith.constant 0.000000e+00 : f32
    %793 = vector.shape_cast %792 : vector<8x1xi1> to vector<8x1xi1>
    %794 = vector.broadcast %793 : vector<8x1xi1> to vector<8x128xi1>
    %795 = vector.broadcast %cst_305 : f32 to vector<8x128xf32>
    %796 = arith.select %794, %789, %795 : vector<8x128xi1>, vector<8x128xf32>
    %cst_306 = arith.constant 0.000000e+00 : f32
    %797 = vector.broadcast %cst_306 : f32 to vector<8x128xf32>
    %c0_307 = arith.constant 0 : index
    %c0_308 = arith.constant 0 : index
    %798 = vector.load %arg17[%c0_307, %c0_308] : memref<8x16xf32, #tpu.memory_space<vmem>>, vector<8x16xf32>
    %cst_309 = arith.constant dense<0.000000e+00> : vector<8x128xf32>
    %799 = tpu.matmul %798, %611, %cst_309 {dimension_numbers = #tpu.dot_dimension_numbers<[1], [0], [0], [1], [0, 0, 1, 1], [], []>} : vector<8x16xf32>, vector<16x128xf32>, vector<8x128xf32> -> vector<8x128xf32>
    %800 = arith.addf %797, %799 : vector<8x128xf32>
    %c0_310 = arith.constant 0 : index
    %c0_311 = arith.constant 0 : index
    %801 = vector.load %arg18[%c0_310, %c0_311] : memref<8x16xf32, #tpu.memory_space<vmem>>, vector<8x16xf32>
    %cst_312 = arith.constant dense<0.000000e+00> : vector<8x128xf32>
    %802 = tpu.matmul %801, %686, %cst_312 {dimension_numbers = #tpu.dot_dimension_numbers<[1], [0], [0], [1], [0, 0, 1, 1], [], []>} : vector<8x16xf32>, vector<16x128xf32>, vector<8x128xf32> -> vector<8x128xf32>
    %803 = arith.addf %800, %802 : vector<8x128xf32>
    %c0_313 = arith.constant 0 : index
    %c0_314 = arith.constant 0 : index
    %804 = vector.load %arg19[%c0_313, %c0_314] : memref<8x8xf32, #tpu.memory_space<vmem>>, vector<8x8xf32>
    %cst_315 = arith.constant dense<0.000000e+00> : vector<8x128xf32>
    %805 = tpu.matmul %804, %796, %cst_315 {dimension_numbers = #tpu.dot_dimension_numbers<[1], [0], [0], [1], [0, 0, 1, 1], [], []>} : vector<8x8xf32>, vector<8x128xf32>, vector<8x128xf32> -> vector<8x128xf32>
    %806 = arith.addf %803, %805 : vector<8x128xf32>
    %c0_316 = arith.constant 0 : index
    %c0_317 = arith.constant 0 : index
    %807 = vector.load %arg20[%c0_316, %c0_317] : memref<128x128xf32, #tpu.memory_space<vmem>>, vector<128x128xf32>
    %cst_318 = arith.constant dense<0.000000e+00> : vector<8x128xf32>
    %808 = tpu.matmul %806, %807, %cst_318 {dimension_numbers = #tpu.dot_dimension_numbers<[1], [0], [0], [1], [0, 0, 1, 1], [], []>} : vector<8x128xf32>, vector<128x128xf32>, vector<8x128xf32> -> vector<8x128xf32>
    %c0_319 = arith.constant 0 : index
    %c0_320 = arith.constant 0 : index
    %809 = vector.load %arg21[%c0_319, %c0_320] : memref<1x128xf32, #tpu.memory_space<vmem>>, vector<1x128xf32>
    %810 = vector.broadcast %809 : vector<1x128xf32> to vector<8x128xf32>
    %811 = arith.addf %808, %810 : vector<8x128xf32>
    %c0_321 = arith.constant 0 : index
    %c0_322 = arith.constant 0 : index
    %812 = vector.load %arg22[%c0_321, %c0_322] : memref<128x128xf32, #tpu.memory_space<vmem>>, vector<128x128xf32>
    %cst_323 = arith.constant dense<0.000000e+00> : vector<8x128xf32>
    %813 = tpu.matmul %811, %812, %cst_323 {dimension_numbers = #tpu.dot_dimension_numbers<[1], [0], [0], [1], [0, 0, 1, 1], [], []>} : vector<8x128xf32>, vector<128x128xf32>, vector<8x128xf32> -> vector<8x128xf32>
    %c0_324 = arith.constant 0 : index
    %c0_325 = arith.constant 0 : index
    %814 = vector.load %arg23[%c0_324, %c0_325] : memref<1x128xf32, #tpu.memory_space<vmem>>, vector<1x128xf32>
    %815 = vector.broadcast %814 : vector<1x128xf32> to vector<8x128xf32>
    %816 = arith.addf %813, %815 : vector<8x128xf32>
    %c0_326 = arith.constant 0 : index
    %c0_327 = arith.constant 0 : index
    %817 = vector.load %arg24[%c0_326, %c0_327] : memref<8x128xf32, #tpu.memory_space<vmem>>, vector<8x128xf32>
    tpu.vector_store %arg24[%c0_326, %c0_327], %816 {strides = array<i32>} : memref<8x128xf32, #tpu.memory_space<vmem>>, vector<8x128xf32>,
    return
  }
}

</mosaic_0001>

<bundles_post_ra>
// kernel: tpu_custom_call.1
= control target key start
LH: loop header
LB: loop body
LE: loop exit
PB: predicated region body
PF: predicated region fallthrough
CT: control target
= control target key end

     0   :  { %s4863_s0 = inlined_call_operand.hbm [shape: f32[16,128], index: 0, kind: input, shape index: {}]   ;;  %s4864_s1 = inlined_call_operand.hbm [shape: f32[16,128], index: 1, kind: input, shape index: {}]   ;;  %s4865_s2 = inlined_call_operand.vmem [shape: f32[8,128], index: 2, kind: input, shape index: {}]   ;;  %s4866_s3 = inlined_call_operand.hbm [shape: s8[16,16], index: 3, kind: input, shape index: {}]   ;;  %s4867_s4 = inlined_call_operand.hbm [shape: s8[16,16], index: 4, kind: input, shape index: {}]   ;;  %s4868_s5 = inlined_call_operand.hbm [shape: s8[16,16], index: 5, kind: input, shape index: {}]   ;;  %s4869_s6 = inlined_call_operand.hbm [shape: s8[16,16], index: 6, kind: input, shape index: {}]   ;;  %s4870_s7 = inlined_call_operand.hbm [shape: s8[8,16], index: 7, kind: input, shape index: {}]   ;;  %s4871_s8 = inlined_call_operand.vmem [shape: s8[16,8], index: 8, kind: input, shape index: {}]   ;;  %s4872_s9 = inlined_call_operand.hbm [shape: s8[8,8], index: 9, kind: input, shape index: {}]   ;;  %s4873_s10 = inlined_call_operand.vmem [shape: s8[8,8], index: 10, kind: input, shape index: {}]   ;;  %s4874_s11 = inlined_call_operand.vmem [shape: s8[16,16], index: 11, kind: input, shape index: {}]   ;;  %s4875_s12 = inlined_call_operand.vmem [shape: s8[16,16], index: 12, kind: input, shape index: {}]   ;;  %s4876_s13 = inlined_call_operand.hbm [shape: bf16[2,128,128], index: 13, kind: input, shape index: {}]   ;;  %s4877_s14 = inlined_call_operand.vmem [shape: f32[2,1,128], index: 14, kind: input, shape index: {}]   ;;  %s4878_s15 = inlined_call_operand.vmem [shape: f32[2,1,128], index: 15, kind: input, shape index: {}]   ;;  %s4879_s16 = inlined_call_operand.vmem [shape: f32[2,1,128], index: 16, kind: input, shape index: {}]   ;;  %s4880_s17 = inlined_call_operand.vmem [shape: f32[8,16], index: 17, kind: input, shape index: {}]   ;;  %s4881_s18 = inlined_call_operand.vmem [shape: f32[8,16], index: 18, kind: input, shape index: {}]   ;;  %s4882_s19 = inlined_call_operand.vmem [shape: f32[8,8], index: 19, kind: input, shape index: {}]   ;;  %s4883_s20 = inlined_call_operand.hbm [shape: f32[128,128], index: 20, kind: input, shape index: {}]   ;;  %s4884_s21 = inlined_call_operand.vmem [shape: f32[1,128], index: 21, kind: input, shape index: {}]   ;;  %s4885_s22 = inlined_call_operand.hbm [shape: f32[128,128], index: 22, kind: input, shape index: {}]   ;;  %s4886_s23 = inlined_call_operand.vmem [shape: f32[1,128], index: 23, kind: input, shape index: {}]   ;;  %s4887_s24 = inlined_call_operand.hbm [shape: f32[8,128], index: 24, kind: output, shape index: {}]  }
   0x1   :  { %4913 = sst [smem:[#allocation28_spill]] %s4863_s0 }
   0x2   :  { %4914 = sst [smem:[#allocation29_spill]] %s4864_s1 }
   0x3   :  { %4915 = sst [smem:[#allocation30_spill]] %s4865_s2 }
   0x4   :  { %4916 = sst [smem:[#allocation31_spill]] %s4866_s3 }
   0x5   :  { %4917 = sst [smem:[#allocation32_spill]] %s4867_s4 }
   0x6   :  { %4918 = sst [smem:[#allocation33_spill]] %s4868_s5 }
   0x7   :  { %4919 = sst [smem:[#allocation34_spill]] %s4869_s6 }
   0x8   :  { %4920 = sst [smem:[#allocation35_spill]] %s4870_s7 }
   0x9   :  { %4921 = sst [smem:[#allocation36_spill]] %s4871_s8 }
   0xa   :  { %4922 = sst [smem:[#allocation37_spill]] %s4884_s21 }
   0xb   :  { %4923 = sst [smem:[#allocation38_spill]] %s4886_s23 }
   0xc   :  { %4924 = sst [smem:[#allocation39_spill]] %s4887_s24 }
   0xd   :  { %29 = vsyncpa [#allocation3], 0 }
   0xe   :  { %30 = vsyncpa [#allocation6], 0 }
   0xf   :  { %31 = vsyncpa [#allocation9], 0 }
  0x10   :  { %32 = vsyncpa [#allocation12], 0 }
  0x11   :  { %33 = vsyncpa [#allocation15], 0 }
  0x12   :  { %34 = vsyncpa [#allocation18], 0 }
  0x13   :  { %35 = vsyncpa [#allocation4], 0  ;;  %s3703_s5 = smov [#allocation5]   ;;  %s4925_s6 = sld [smem:[#allocation29_spill]] }
  0x14   :  { %s53_s26 = sshll.u32 %s3703_s5, 4  ;;  %s54_s26 = int_to_ptr.vmem [resolvable:$true] %s53_s26 }
  0x19   :  { %s3425_s2 = scalar_lea.hbm %s4925_s6, 256 }
  0x1a   :  { %p3426_p0 = scmp.ne.s32.totalorder %s4925_s6, %s3425_s2  ;;  %p3429_p1 = scmp.lt.u32.totalorder %s3425_s2, %s4925_s6 }
  0x1c   :  { %p3431_p2 = pnand %p3429_p1, %p3426_p0 }
  0x1e   :  { %3434 = shalt.err (!%p3431_p2)
}
  0x1f   :  { %s3435_s3 = scalar_lea.vmem %s54_s26, 256  ;;  %p3440_p4 = scmp.lt.s32.totalorder %s54_s26, %s54_s26 }
  0x20   :  { %p3436_p3 = scmp.ne.s32.totalorder %s54_s26, %s3435_s3  ;;  %p3441_p5 = scmp.lt.s32.totalorder %s3435_s3, %s3435_s3 }
  0x22   :  { %p3442_p6 = por %p3441_p5, %p3440_p4 }
  0x24   :  { %p3443_p7 = pnand %p3442_p6, %p3436_p3 }
  0x26   :  { %3446 = shalt.err (!%p3443_p7)
}
  0x27   :  { %s4896_s25 = smov 128   ;;  %s3705_s8 = smov 8  }
  0x28   :  { %59 = dma.hbm_to_vmem [thread:$0]  %s4925_s6, 256, %s54_s26, [#allocation6], %s4896_s25, %s4896_s25, %s3705_s8  }
  0x29   :  { %s3706_s5 = smov [#allocation8]   ;;  %s3707_s28 = smov [#allocation11]  }
  0x2a   :  { %s79_s27 = sshll.u32 %s3706_s5, 4  ;;  %s103_s2 = sshll.u32 %s3707_s28, 4  ;;  %s80_s27 = int_to_ptr.vmem [resolvable:$true] %s79_s27  ;;  %s104_s2 = int_to_ptr.vmem [resolvable:$true] %s103_s2 }
  0x2b   :  { %s4926_s7 = sld [smem:[#allocation32_spill]] }
  0x31   :  { %s3447_s30 = scalar_lea.hbm %s4926_s7, 64 }
  0x32   :  { %p3448_p8 = scmp.ne.s32.totalorder %s4926_s7, %s3447_s30  ;;  %p3451_p9 = scmp.lt.u32.totalorder %s3447_s30, %s4926_s7 }
  0x34   :  { %p3453_p10 = pnand %p3451_p9, %p3448_p8 }
  0x36   :  { %3456 = shalt.err (!%p3453_p10)
}
  0x37   :  { %s3457_s26 = scalar_lea.vmem %s80_s27, 64  ;;  %p3462_p12 = scmp.lt.s32.totalorder %s80_s27, %s80_s27 }
  0x38   :  { %p3458_p11 = scmp.ne.s32.totalorder %s80_s27, %s3457_s26  ;;  %p3463_p13 = scmp.lt.s32.totalorder %s3457_s26, %s3457_s26 }
  0x3a   :  { %p3464_p0 = por %p3463_p13, %p3462_p12 }
  0x3c   :  { %p3465_p1 = pnand %p3464_p0, %p3458_p11 }
  0x3e   :  { %3468 = shalt.err (!%p3465_p1)
}
  0x3f   :  { %s3708_s6 = smov 32   ;;  %s3709_s4 = smov 2  }
  0x40   :  { %85 = dma.hbm_to_vmem [thread:$0]  %s4926_s7, 64, %s80_s27, [#allocation9], %s3708_s6, %s3708_s6, %s3709_s4  }
  0x41   :  { %s4927_s5 = sld [smem:[#allocation34_spill]] }
  0x47   :  { %s3469_s28 = scalar_lea.hbm %s4927_s5, 64 }
  0x48   :  { %p3470_p2 = scmp.ne.s32.totalorder %s4927_s5, %s3469_s28  ;;  %p3473_p3 = scmp.lt.u32.totalorder %s3469_s28, %s4927_s5 }
  0x4a   :  { %p3475_p4 = pnand %p3473_p3, %p3470_p2 }
  0x4c   :  { %3478 = shalt.err (!%p3475_p4)
}
  0x4d   :  { %s3479_s26 = scalar_lea.vmem %s104_s2, 64  ;;  %p3484_p6 = scmp.lt.s32.totalorder %s104_s2, %s104_s2 }
  0x4e   :  { %p3480_p5 = scmp.ne.s32.totalorder %s104_s2, %s3479_s26  ;;  %p3485_p7 = scmp.lt.s32.totalorder %s3479_s26, %s3479_s26 }
  0x50   :  { %p3486_p8 = por %p3485_p7, %p3484_p6 }
  0x52   :  { %p3487_p9 = pnand %p3486_p8, %p3480_p5 }
  0x54   :  { %3490 = shalt.err (!%p3487_p9)
}
  0x55   :  { %109 = dma.hbm_to_vmem [thread:$0]  %s4927_s5, 64, %s104_s2, [#allocation12], %s3708_s6, %s3708_s6, %s3709_s4  }
  0x56   :  { %s3710_s24 = smov [#allocation14]   ;;  %s3711_s21 = smov [#allocation17]  }
  0x57   :  { %s128_s1 = sshll.u32 %s3710_s24, 4  ;;  %s167_s23 = sshll.u32 %s3711_s21, 4  ;;  %s129_s1 = int_to_ptr.vmem [resolvable:$true] %s128_s1  ;;  %s168_s23 = int_to_ptr.vmem [resolvable:$true] %s167_s23 }
  0x58   :  { %s3491_s0 = scalar_lea.hbm %s4872_s9, 32 }
  0x59   :  { %p3492_p10 = scmp.ne.s32.totalorder %s4872_s9, %s3491_s0  ;;  %p3495_p11 = scmp.lt.u32.totalorder %s3491_s0, %s4872_s9 }
  0x5b   :  { %p3497_p12 = pnand %p3495_p11, %p3492_p10 }
  0x5d   :  { %3500 = shalt.err (!%p3497_p12)
}
  0x5e   :  { %s3501_s2 = scalar_lea.vmem %s129_s1, 32  ;;  %p3506_p0 = scmp.lt.s32.totalorder %s129_s1, %s129_s1 }
  0x5f   :  { %p3502_p13 = scmp.ne.s32.totalorder %s129_s1, %s3501_s2  ;;  %p3507_p1 = scmp.lt.s32.totalorder %s3501_s2, %s3501_s2 }
  0x61   :  { %p3508_p2 = por %p3507_p1, %p3506_p0 }
  0x63   :  { %p3509_p3 = pnand %p3508_p2, %p3502_p13 }
  0x65   :  { %3512 = shalt.err (!%p3509_p3)
}
  0x66   :  { %131 = dma.hbm_to_vmem [thread:$0]  %s4872_s9, 32, %s129_s1, [#allocation15]  }
  0x67   :  { %s3513_s21 = scalar_lea.hbm %s4883_s20, 2048 }
  0x68   :  { %p3514_p4 = scmp.ne.s32.totalorder %s4883_s20, %s3513_s21  ;;  %p3517_p5 = scmp.lt.u32.totalorder %s3513_s21, %s4883_s20 }
  0x6a   :  { %p3519_p6 = pnand %p3517_p5, %p3514_p4 }
  0x6c   :  { %3522 = shalt.err (!%p3519_p6)
}
  0x6d   :  { %s3523_s30 = scalar_lea.vmem %s168_s23, 2048  ;;  %p3528_p8 = scmp.lt.s32.totalorder %s168_s23, %s168_s23 }
  0x6e   :  { %p3524_p7 = scmp.ne.s32.totalorder %s168_s23, %s3523_s30  ;;  %p3529_p9 = scmp.lt.s32.totalorder %s3523_s30, %s3523_s30 }
  0x70   :  { %p3530_p10 = por %p3529_p9, %p3528_p8 }
  0x72   :  { %p3531_p11 = pnand %p3530_p10, %p3524_p7 }
  0x74   :  { %3534 = shalt.err (!%p3531_p11)
}
  0x75   :  { %s4928_s9 = smov 128   ;;  %s3712_s26 = smov [#allocation2]  }
  0x76   :  { %173 = dma.hbm_to_vmem [thread:$0]  %s4883_s20, 2048, %s168_s23, [#allocation18], %s4928_s9, %s4928_s9, %s3705_s8  }
  0x77   :  { %s41_s2 = sshll.u32 %s3712_s26, 4  ;;  %s3713_s5 = smov [#allocation7]   ;;  %s42_s2 = int_to_ptr.vmem [resolvable:$true] %s41_s2 }
  0x78   :  { %s67_s27 = sshll.u32 %s3713_s5, 4  ;;  %s4929_s21 = sld [smem:[#allocation28_spill]]  ;;  %s68_s27 = int_to_ptr.vmem [resolvable:$true] %s67_s27 }
  0x7e   :  { %s3535_s25 = scalar_lea.hbm %s4929_s21, 256 }
  0x7f   :  { %p3536_p12 = scmp.ne.s32.totalorder %s4929_s21, %s3535_s25  ;;  %p3539_p13 = scmp.lt.u32.totalorder %s3535_s25, %s4929_s21 }
  0x81   :  { %p3541_p0 = pnand %p3539_p13, %p3536_p12 }
  0x83   :  { %3544 = shalt.err (!%p3541_p0)
}
  0x84   :  { %s3545_s20 = scalar_lea.vmem %s42_s2, 256  ;;  %p3550_p2 = scmp.lt.s32.totalorder %s42_s2, %s42_s2 }
  0x85   :  { %p3546_p1 = scmp.ne.s32.totalorder %s42_s2, %s3545_s20  ;;  %p3551_p3 = scmp.lt.s32.totalorder %s3545_s20, %s3545_s20 }
  0x87   :  { %p3552_p4 = por %p3551_p3, %p3550_p2 }
  0x89   :  { %p3553_p5 = pnand %p3552_p4, %p3546_p1 }
  0x8b   :  { %3556 = shalt.err (!%p3553_p5)
}
  0x8c   :  { %47 = dma.hbm_to_vmem [thread:$0]  %s4929_s21, 256, %s42_s2, [#allocation3], %s4928_s9, %s4928_s9, %s3705_s8  }
  0x8d   :  { %s4930_s5 = sld [smem:[#allocation31_spill]] }
  0x93   :  { %s3557_s7 = scalar_lea.hbm %s4930_s5, 64 }
  0x94   :  { %p3558_p6 = scmp.ne.s32.totalorder %s4930_s5, %s3557_s7  ;;  %p3561_p7 = scmp.lt.u32.totalorder %s3557_s7, %s4930_s5 }
  0x96   :  { %p3563_p8 = pnand %p3561_p7, %p3558_p6 }
  0x98   :  { %3566 = shalt.err (!%p3563_p8)
}
  0x99   :  { %s3567_s0 = scalar_lea.vmem %s68_s27, 64  ;;  %p3572_p10 = scmp.lt.s32.totalorder %s68_s27, %s68_s27 }
  0x9a   :  { %p3568_p9 = scmp.ne.s32.totalorder %s68_s27, %s3567_s0  ;;  %p3573_p11 = scmp.lt.s32.totalorder %s3567_s0, %s3567_s0 }
  0x9c   :  { %p3574_p12 = por %p3573_p11, %p3572_p10 }
  0x9e   :  { %p3575_p13 = pnand %p3574_p12, %p3568_p9 }
  0xa0   :  { %3578 = shalt.err (!%p3575_p13)
}
  0xa1   :  { %73 = dma.hbm_to_vmem [thread:$0]  %s4930_s5, 64, %s68_s27, [#allocation6], %s3708_s6, %s3708_s6, %s3709_s4  }
  0xa2   :  { %s3714_s30 = smov [#allocation10]   ;;  %s3715_s23 = smov [#allocation13]  }
  0xa3   :  { %s91_s20 = sshll.u32 %s3714_s30, 4  ;;  %s116_s1 = sshll.u32 %s3715_s23, 4  ;;  %s92_s20 = int_to_ptr.vmem [resolvable:$true] %s91_s20  ;;  %s117_s1 = int_to_ptr.vmem [resolvable:$true] %s116_s1 }
  0xa4   :  { %s4931_s7 = sld [smem:[#allocation33_spill]] }
  0xaa   :  { %s3579_s24 = scalar_lea.hbm %s4931_s7, 64 }
  0xab   :  { %p3580_p0 = scmp.ne.s32.totalorder %s4931_s7, %s3579_s24  ;;  %p3583_p1 = scmp.lt.u32.totalorder %s3579_s24, %s4931_s7 }
  0xad   :  { %p3585_p2 = pnand %p3583_p1, %p3580_p0 }
  0xaf   :  { %3588 = shalt.err (!%p3585_p2)
}
  0xb0   :  { %s3589_s27 = scalar_lea.vmem %s92_s20, 64  ;;  %p3594_p4 = scmp.lt.s32.totalorder %s92_s20, %s92_s20 }
  0xb1   :  { %p3590_p3 = scmp.ne.s32.totalorder %s92_s20, %s3589_s27  ;;  %p3595_p5 = scmp.lt.s32.totalorder %s3589_s27, %s3589_s27 }
  0xb3   :  { %p3596_p6 = por %p3595_p5, %p3594_p4 }
  0xb5   :  { %p3597_p7 = pnand %p3596_p6, %p3590_p3 }
  0xb7   :  { %3600 = shalt.err (!%p3597_p7)
}
  0xb8   :  { %97 = dma.hbm_to_vmem [thread:$0]  %s4931_s7, 64, %s92_s20, [#allocation9], %s3708_s6, %s3708_s6, %s3709_s4  }
  0xb9   :  { %s4932_s23 = sld [smem:[#allocation35_spill]] }
  0xbf   :  { %s3601_s3 = scalar_lea.hbm %s4932_s23, 32 }
  0xc0   :  { %p3602_p8 = scmp.ne.s32.totalorder %s4932_s23, %s3601_s3  ;;  %p3605_p9 = scmp.lt.u32.totalorder %s3601_s3, %s4932_s23 }
  0xc2   :  { %p3607_p10 = pnand %p3605_p9, %p3602_p8 }
  0xc4   :  { %3610 = shalt.err (!%p3607_p10)
}
  0xc5   :  { %s3611_s29 = scalar_lea.vmem %s117_s1, 32  ;;  %p3616_p12 = scmp.lt.s32.totalorder %s117_s1, %s117_s1 }
  0xc6   :  { %p3612_p11 = scmp.ne.s32.totalorder %s117_s1, %s3611_s29  ;;  %p3617_p13 = scmp.lt.s32.totalorder %s3611_s29, %s3611_s29 }
  0xc8   :  { %p3618_p0 = por %p3617_p13, %p3616_p12 }
  0xca   :  { %p3619_p1 = pnand %p3618_p0, %p3612_p11 }
  0xcc   :  { %3622 = shalt.err (!%p3619_p1)
}
  0xcd   :  { %119 = dma.hbm_to_vmem [thread:$0]  %s4932_s23, 32, %s117_s1, [#allocation12]  }
  0xce   :  { %s3716_s20 = smov [#allocation16]   ;;  %s3623_s5 = scalar_lea.hbm %s4876_s13, 2048 }
  0xcf   :  { %s143_s7 = sshll.u32 %s3716_s20, 4  ;;  %p3624_p2 = scmp.ne.s32.totalorder %s4876_s13, %s3623_s5  ;;  %s144_s7 = int_to_ptr.vmem [resolvable:$true] %s143_s7 }
  0xd0   :  { %p3627_p3 = scmp.lt.u32.totalorder %s3623_s5, %s4876_s13 }
  0xd2   :  { %p3629_p4 = pnand %p3627_p3, %p3624_p2 }
  0xd4   :  { %3632 = shalt.err (!%p3629_p4)
}
  0xd5   :  { %s3633_s26 = scalar_lea.vmem %s144_s7, 2048  ;;  %p3638_p6 = scmp.lt.s32.totalorder %s144_s7, %s144_s7 }
  0xd6   :  { %p3634_p5 = scmp.ne.s32.totalorder %s144_s7, %s3633_s26  ;;  %p3639_p7 = scmp.lt.s32.totalorder %s3633_s26, %s3633_s26 }
  0xd8   :  { %p3640_p8 = por %p3639_p7, %p3638_p6 }
  0xda   :  { %p3641_p9 = pnand %p3640_p8, %p3634_p5 }
  0xdc   :  { %3644 = shalt.err (!%p3641_p9)
}
  0xdd   :  { %s3717_s1 = smov 64   ;;  %s3718_s23 = smov 4  }
  0xde   :  { %149 = dma.hbm_to_vmem [thread:$0]  %s4876_s13, 2048, %s144_s7, [#allocation15], %s3717_s1, %s3717_s1, %s3718_s23  }
  0xdf   :  { %s3719_s28 = smov [#allocation19]   ;;  %s3645_s20 = scalar_lea.hbm %s4885_s22, 2048 }
  0xe0   :  { %s181_s29 = sshll.u32 %s3719_s28, 4  ;;  %p3646_p10 = scmp.ne.s32.totalorder %s4885_s22, %s3645_s20  ;;  %s182_s29 = int_to_ptr.vmem [resolvable:$true] %s181_s29 }
  0xe1   :  { %p3649_p11 = scmp.lt.u32.totalorder %s3645_s20, %s4885_s22 }
  0xe3   :  { %p3651_p12 = pnand %p3649_p11, %p3646_p10 }
  0xe5   :  { %3654 = shalt.err (!%p3651_p12)
}
  0xe6   :  { %s3655_s21 = scalar_lea.vmem %s182_s29, 2048  ;;  %p3660_p0 = scmp.lt.s32.totalorder %s182_s29, %s182_s29 }
  0xe7   :  { %p3656_p13 = scmp.ne.s32.totalorder %s182_s29, %s3655_s21  ;;  %p3661_p1 = scmp.lt.s32.totalorder %s3655_s21, %s3655_s21 }
  0xe9   :  { %p3662_p2 = por %p3661_p1, %p3660_p0 }
  0xeb   :  { %p3663_p3 = pnand %p3662_p2, %p3656_p13 }
  0xed   :  { %3666 = shalt.err (!%p3663_p3)
}
  0xee   :  { %187 = dma.hbm_to_vmem [thread:$0]  %s4885_s22, 2048, %s182_s29, [#allocation18], %s4928_s9, %s4928_s9, %s3705_s8  }
  0xef   :  { %3689 = dma.done.wait [#allocation3], 256  }
  0xf0   :  { %3690 = vsyncadd [#allocation3], 4294967040 }
  0xf1   :  { %3691 = dma.done.wait [#allocation6], 320  }
  0xf2   :  { %3692 = vsyncadd [#allocation6], 4294966976 }
  0xf3   :  { %3693 = dma.done.wait [#allocation9], 128  }
  0xf4   :  { %3694 = vsyncadd [#allocation9], 4294967168 }
  0xf5   :  { %3695 = dma.done.wait [#allocation12], 96  }
  0xf6   :  { %3696 = vsyncadd [#allocation12], 4294967200 }
  0xf7   :  { %3697 = dma.done.wait [#allocation15], 2080  }
  0xf8   :  { %3698 = vsyncadd [#allocation15], 4294965216 }
  0xf9   :  { %3699 = dma.done.wait [#allocation18], 4096  }
  0xfa   :  { %3700 = vsyncadd [#allocation18], 4294963200  ;;  %v3720_v0 = vmov 0.0   ;;  %vm4899_vm0 = vmmov 0   ;;  %v3273_v1 = vld [vmem:[#allocation16] sm:$0xff]   ;;  %v3274_v2 = vld [vmem:[#allocation16 + $0x8] sm:$0xff]   ;;  %v562_v53 = vlaneseq }
  0xfb   :  { %2886 = vmatprep.subr.bf16.mxu0 %v3720_v0  ;;  %2906 = vmatprep.subr.bf16.mxu1 %v3720_v0  ;;  %v3275_v3 = vld [vmem:[#allocation16 + $0x10] sm:$0xff]   ;;  %v3276_v4 = vld [vmem:[#allocation16 + $0x18] sm:$0xff]   ;;  %v3277_v5 = vld [vmem:[#allocation16 + $0x20] sm:$0xff]   ;;  %s4933_s9 = sld [smem:[#allocation30_spill]]  ;;  %vm4898_vm1 = vcmask 1043456   ;;  %vm584_vm2 = vcmask 130048  }
  0xfc   :  { %2902 = vmatprep.mubr.msk.bf16.mxu0 %vm4899_vm0, %v3720_v0  ;;  %2922 = vmatprep.mubr.msk.bf16.mxu1 %vm4899_vm0, %v3720_v0  ;;  %v3278_v6 = vld [vmem:[#allocation16 + $0x28] sm:$0xff]   ;;  %v3279_v7 = vld [vmem:[#allocation16 + $0x30] sm:$0xff]   ;;  %v3280_v8 = vld [vmem:[#allocation16 + $0x38] sm:$0xff]   ;;  %v4065_v54 = vshrl.u32 %v562_v53, 7  ;;  %s4934_s29 = sld [smem:[#allocation36_spill]]  ;;  %s4965_s8 = sld [smem:[#allocation37_spill]] }
  0xfd   :  { %2887 = vmatpush3.bf16.msra.mxu0 %v3273_v1  ;;  %2907 = vmatpush3.bf16.msra.mxu1 %v3273_v1  ;;  %v224_v9 = vld [vmem:[#allocation2] sm:$0xff]  ;;  %v225_v10 = vld [vmem:[#allocation2 + $0x8] sm:$0xff]  ;;  %v226_v11 = vld [vmem:[#allocation5] sm:$0xff]  ;;  %s4966_s3 = sld [smem:[#allocation38_spill]]  ;;  %s3724_s26 = smov [#allocation20]  }
  0xfe   :  { %2888 = vmatprep.subr.bf16.mxu0 %v3720_v0  ;;  %2908 = vmatprep.subr.bf16.mxu1 %v3720_v0  ;;  %v227_v12 = vld [vmem:[#allocation5 + $0x8] sm:$0xff]  ;;  %v248_v13 = vpack.c.bf16 %v225_v10, %v224_v9  ;;  %v2693_v17 = vld [vmem:[%s4877_s14] ss:$0 sm:$0xff]  ;;  %v2747_v55 = vld [vmem:[#allocation8] sm:$0xf]   ;;  %v4070_v59 = vsub.s32 0, %v4065_v54 }
  0xff   :  { %v395_v14 = vpack.c.bf16 %v227_v12, %v226_v11  ;;  %v2692_v26 = vld [vmem:[%s4878_s15] ss:$0 sm:$0xff]  ;;  %v2751_v56 = vld [vmem:[#allocation11] sm:$0xf]   ;;  %v2748_v58 = vunpack.c.0.s8 %v2747_v55  ;;  %v2749_v60 = vunpack.c.1.s8 %v2747_v55  ;;  %s2670_s1 = sshll.u32 %s3724_s26, 4  ;;  %s2671_s1 = int_to_ptr.vmem [resolvable:$true] %s2670_s1 }
 0x100   :  { %v2752_v61 = vunpack.c.0.s8 %v2751_v56  ;;  %v2753_v62 = vunpack.c.1.s8 %v2751_v56  ;;  %v2763_v56 = vld [vmem:[#allocation10] sm:$0xf]   ;;  %s3667_s23 = scalar_lea.vmem %s2671_s1, 128  ;;  %p3672_p5 = scmp.lt.s32.totalorder %s2671_s1, %s2671_s1 }
 0x101   :  { %2889 = vmatpush3.bf16.msra.mxu0 %v3274_v2  ;;  %2909 = vmatpush3.bf16.msra.mxu1 %v3274_v2  ;;  %v228_v15 = vld [vmem:[%s4933_s9] sm:$0xff]  ;;  %p3668_p4 = scmp.ne.s32.totalorder %s2671_s1, %s3667_s23  ;;  %p3673_p6 = scmp.lt.s32.totalorder %s3667_s23, %s3667_s23 }
 0x102   :  { %2890 = vmatprep.subr.bf16.mxu0 %v3720_v0  ;;  %2910 = vmatprep.subr.bf16.mxu1 %v3720_v0  ;;  %v482_v16 = vpack.c.bf16 %v228_v15, %v228_v15  ;;  %v2755_v53 = vld [vmem:[%s4934_s29] sm:$0xf]  }
 0x103   :  { %p3674_p7 = por %p3673_p6, %p3672_p5 }
 0x105   :  { %2891 = vmatpush3.bf16.msra.mxu0 %v3275_v3  ;;  %2911 = vmatpush3.bf16.msra.mxu1 %v3275_v3  ;;  %p3675_p8 = pnand %p3674_p7, %p3668_p4 }
 0x106   :  { %2892 = vmatprep.subr.bf16.mxu0 %v3720_v0  ;;  %2912 = vmatprep.subr.bf16.mxu1 %v3720_v0 }
 0x109   :  { %2893 = vmatpush3.bf16.msra.mxu0 %v3276_v4  ;;  %2913 = vmatpush3.bf16.msra.mxu1 %v3276_v4 }
 0x10a   :  { %2894 = vmatprep.subr.bf16.mxu0 %v3720_v0  ;;  %2914 = vmatprep.subr.bf16.mxu1 %v3720_v0 }
 0x10d   :  { %2895 = vmatpush3.bf16.msra.mxu0 %v3277_v5  ;;  %2915 = vmatpush3.bf16.msra.mxu1 %v3277_v5 }
 0x10e   :  { %2896 = vmatprep.subr.bf16.mxu0 %v3720_v0  ;;  %2916 = vmatprep.subr.bf16.mxu1 %v3720_v0 }
 0x111   :  { %2897 = vmatpush3.bf16.msra.mxu0 %v3278_v6  ;;  %2917 = vmatpush3.bf16.msra.mxu1 %v3278_v6 }
 0x112   :  { %2898 = vmatprep.subr.bf16.mxu0 %v3720_v0  ;;  %2918 = vmatprep.subr.bf16.mxu1 %v3720_v0 }
 0x115   :  { %2899 = vmatpush3.bf16.msra.mxu0 %v3279_v7  ;;  %2919 = vmatpush3.bf16.msra.mxu1 %v3279_v7 }
 0x116   :  { %2900 = vmatprep.subr.bf16.mxu0 %v3720_v0  ;;  %2920 = vmatprep.subr.bf16.mxu1 %v3720_v0 }
 0x119   :  { %2901 = vmatpush3.bf16.msra.mxu0 %v3280_v8  ;;  %2921 = vmatpush3.bf16.msra.mxu1 %v3280_v8 }
 0x11a   :  { %2926 = vmatprep.subr.bf16.mxu0 %v3720_v0  ;;  %2946 = vmatprep.subr.bf16.mxu1 %v3720_v0 }
 0x11c   :  { %2903 = vmatmul.mubr.bf16.vlgmr.msra.gmra.mrb[0].mxu0 %v248_v13  ;;  %2923 = vmatmul.mubr.bf16.vlgmr.msra.gmra.mrb[0].mxu1 %v395_v14 }
 0x11d   :  { %2927 = vmatpush3.bf16.msra.mxu0 %v3273_v1  ;;  %2942 = vmatprep.mubr.msk.bf16.mxu0 %vm4899_vm0, %v3720_v0 }
 0x11e   :  { %2928 = vmatprep.subr.bf16.mxu0 %v3720_v0  ;;  %2948 = vmatprep.mubr.msk.bf16.mxu1 %vm4899_vm0, %v3720_v0 }
 0x121   :  { %2929 = vmatpush3.bf16.msra.mxu0 %v3274_v2  ;;  %v4074_v2 = vcvt.s32.f32 %v2748_v58  ;;  %v2757_v58 = vunpack.c.1.s8 %v2755_v53 }
 0x122   :  { %2930 = vmatprep.subr.bf16.mxu0 %v3720_v0 }
 0x123   :  { %vm674_vm3 = vcmp.gt.f32.partialorder %v4074_v2, 0.0 }
 0x125   :  { %2931 = vmatpush3.bf16.msra.mxu0 %v3275_v3  ;;  %v2739_v3 = vld [vmem:[%s4874_s11] sm:$0xf]  }
 0x126   :  { %2932 = vmatprep.subr.bf16.mxu0 %v3720_v0  ;;  %v2740_v11 = vunpack.c.0.s8 %v2739_v3  ;;  %v2741_v13 = vunpack.c.1.s8 %v2739_v3  ;;  %v2765_v3 = vunpack.c.1.s8 %v2763_v56 }
 0x129   :  { %2933 = vmatpush3.bf16.msra.mxu0 %v3276_v4 }
 0x12a   :  { %2934 = vmatprep.subr.bf16.mxu0 %v3720_v0 }
 0x12d   :  { %2935 = vmatpush3.bf16.msra.mxu0 %v3277_v5  ;;  %v2743_v5 = vld [vmem:[%s4875_s12] sm:$0xf]  }
 0x12e   :  { %2936 = vmatprep.subr.bf16.mxu0 %v3720_v0  ;;  %v2744_v14 = vunpack.c.0.s8 %v2743_v5 }
 0x131   :  { %2937 = vmatpush3.bf16.msra.mxu0 %v3278_v6  ;;  %v4083_v6 = vcvt.s32.f32 %v2749_v60  ;;  %v2756_v60 = vunpack.c.0.s8 %v2755_v53 }
 0x132   :  { %2938 = vmatprep.subr.bf16.mxu0 %v3720_v0 }
 0x133   :  { %vm675_vm6 = vcmp.gt.f32.partialorder %v4083_v6, 0.0 }
 0x135   :  { %2939 = vmatpush3.bf16.msra.mxu0 %v3279_v7  ;;  %v4085_v7 = vcvt.s32.f32 %v2752_v61 }
 0x136   :  { %2940 = vmatprep.subr.bf16.mxu0 %v3720_v0 }
 0x137   :  { %vm714_vm7 = vcmp.gt.f32.partialorder %v4085_v7, 0.0 }
 0x139   :  { %2941 = vmatpush3.bf16.msra.mxu0 %v3280_v8  ;;  %v4087_v8 = vcvt.s32.f32 %v2753_v62 }
 0x13a   :  { %2970 = vmatprep.subr.bf16.mxu0 %v3720_v0 }
 0x13b   :  { %vm4905_vm8 = vcmp.gt.f32.partialorder %v4087_v8, 0.0 }
 0x13c   :  { %2943 = vmatmul.mubr.bf16.vlgmr.msra.gmra.mrb[4].mxu0 %v482_v16 }
 0x13d   :  { %2972 = vmatprep.mubr.msk.bf16.mxu0 %vm4899_vm0, %v3720_v0 }
 0x1ef   :  { %v331_v18 = vpop.f32.mrb[0].mxu0  ;;  %v430_v19 = vpop.f32.mrb[0].mxu1 }
 0x1f0   :  { %v2904_v20 = vpop.f32.mrb[1].mxu0  ;;  %v2924_v21 = vpop.f32.mrb[1].mxu1  ;;  %v444_v22 = vmul.f32 %v2693_v17, %v430_v19  ;;  %v357_v23 = vmul.f32 %v2693_v17, %v331_v18  ;;  %v345_v32 = vmul.f32 %v2692_v26, %v331_v18  ;;  %v438_v35 = vmul.f32 %v2692_v26, %v430_v19 }
 0x1f1   :  { %v334_v24 = vpop.f32.mrb[2].mxu0  ;;  %v433_v25 = vpop.f32.mrb[2].mxu1  ;;  %v4102_v21 = vcvt.s32.f32 %v2740_v11  ;;  %v4173_v11 = vcvt.s32.f32 %v2756_v60 }
 0x1f2   :  { %v4051_v27 = vpack.c.bf16 %v334_v24, %v331_v18  ;;  %446 = vadd.xlane.f32.xlu0 %v444_v22  ;;  %v437_v28 = vpack.c.bf16 %v433_v25, %v430_v19  ;;  %359 = vadd.xlane.f32.xlu1 %v357_v23  ;;  %v2905_v29 = vpop.f32.mrb[3].mxu0  ;;  %v2925_v30 = vpop.f32.mrb[3].mxu1  ;;  %v445_v31 = vmul.f32 %v2693_v17, %v433_v25 }
 0x1f3   :  { %v358_v33 = vmul.f32 %v2693_v17, %v334_v24  ;;  %v346_v34 = vmul.f32 %v2692_v26, %v334_v24  ;;  %v439_v36 = vmul.f32 %v2692_v26, %v433_v25  ;;  %v4108_v24 = vcvt.s32.f32 %v2741_v13 }
 0x1f4   :  { %2947 = vmatpush3.bf16.msra.mxu1 %v437_v28  ;;  %v2745_v25 = vunpack.c.1.s8 %v2743_v5  ;;  %v4116_v29 = vcvt.s32.f32 %v2744_v14  ;;  %vm4912_vm11 = vcmp.gt.f32.partialorder %v4102_v21, 0.0 }
 0x1f5   :  { %2952 = vmatprep.subr.bf16.mxu1 %v3720_v0  ;;  %vm581_vm12 = vcmp.gt.f32.partialorder %v4108_v24, 0.0 }
 0x1f6   :  { %448 = vadd.xlane.f32.xlu0 %v445_v31  ;;  %347 = vadd.xlane.f32.xlu1 %v345_v32  ;;  %vm4902_vm13 = vcmp.gt.f32.partialorder %v4116_v29, 0.0 }
 0x1fa   :  { %361 = vadd.xlane.f32.xlu1 %v358_v33  ;;  %349 = vadd.xlane.f32.xlu0 %v346_v34 }
 0x1fe   :  { %440 = vadd.xlane.f32.xlu1 %v438_v35  ;;  %442 = vadd.xlane.f32.xlu0 %v439_v36  ;;  %v4130_v36 = vcvt.s32.f32 %v2745_v25 }
 0x200   :  { %vm4901_vm14 = vcmp.gt.f32.partialorder %v4130_v36, 0.0 }
 0x20f   :  { %v517_v37 = vpop.f32.mrb[4].mxu0 }
 0x210   :  { %v523_v38 = vpack.c.bf16 %v517_v37, %v517_v37  ;;  %v2944_v39 = vpop.f32.mrb[5].mxu0  ;;  %v527_v40 = vmul.f32 %v2693_v17, %v517_v37  ;;  %v524_v44 = vmul.f32 %v2692_v26, %v517_v37 }
 0x211   :  { %v520_v41 = vpop.f32.mrb[6].mxu0 }
 0x212   :  { %528 = vadd.xlane.f32.xlu0 %v527_v40  ;;  %v2945_v42 = vpop.f32.mrb[7].mxu0  ;;  %v4055_v43 = vsel %vm4898_vm1, %v523_v38, 0 }
 0x213   :  { %2971 = vmatpush3.bf16.msra.mxu0 %v4055_v43 }
 0x214   :  { %2976 = vmatprep.subr.bf16.mxu0 %v3720_v0 }
 0x216   :  { %525 = vadd.xlane.f32.xlu0 %v524_v44 }
 0x27f   :  { %v447_v45 = vpop.xlane.xlu0 %446  ;;  %v360_v46 = vpop.xlane.xlu1 %359 }
 0x280   :  { %450 = vxpose.xlu1.b32.start [1/2] (short) (narrow) %v447_v45, 8  ;;  %363 = vxpose.xlu0.b32.start [1/2] (short) (narrow) %v360_v46, 8 }
 0x283   :  { %v449_v47 = vpop.xlane.xlu0 %448  ;;  %v4059_v48 = vpop.xlane.xlu1 %347 }
 0x284   :  { %451 = vxpose.xlu1.b32.end [2/2] (short) (narrow) %v449_v47, 8 }
 0x287   :  { %v362_v49 = vpop.xlane.xlu1 %361  ;;  %v4061_v50 = vpop.xlane.xlu0 %349 }
 0x288   :  { %364 = vxpose.xlu0.b32.end [2/2] (short) (narrow) %v362_v49, 8 }
 0x28b   :  { %v4063_v51 = vpop.xlane.xlu0 %442  ;;  %v4067_v57 = vpop.xlane.xlu1 %440 }
 0x29f   :  { %v529_v52 = vpop.xlane.xlu0 %528 }
 0x2a0   :  { %530 = vxpose.xlu1.b32.start.end [1/1] (short) (narrow) %v529_v52, 8  ;;  %v2759_v52 = vld [vmem:[#allocation7] sm:$0xf]  }
 0x2a1   :  { %v2761_v55 = vunpack.c.1.s8 %v2759_v52  ;;  %v2760_v61 = vunpack.c.0.s8 %v2759_v52 }
 0x2a3   :  { %v4072_v63 = vpop.xlane.xlu0 %525 }
 0x300   :  { %v466_v1 = vpop.trf.xlu1 }
 0x301   :  { %v659_v4 = vrot.slane %v466_v1, %v4070_v59  ;;  %v4167_v1 = vcvt.s32.f32 %v2761_v55 }
 0x303   :  { %v660_v9 = vadd.f32 %v659_v4, %v4059_v48  ;;  %v661_v10 = vadd.f32 %v659_v4, %v4061_v50  ;;  %v2764_v4 = vunpack.c.0.s8 %v2763_v56  ;;  %vm4903_vm15 = vcmp.gt.f32.partialorder %v4167_v1, 0.0 }
 0x304   :  { %v379_v12 = vpop.trf.xlu0 }
 0x305   :  { %v4093_v15 = vrot.slane %v379_v12, %v4070_v59  ;;  %vm662_vm4 = vcmp.ge.f32.partialorder %v660_v9, 0.0  ;;  %v664_v16 = vmul.f32 0.2, %v660_v9  ;;  %vm663_vm5 = vcmp.ge.f32.partialorder %v661_v10, 0.0 }
 0x306   :  { %v665_v17 = vmul.f32 0.2, %v661_v10  ;;  %v4175_v12 = vcvt.s32.f32 %v2760_v61 }
 0x307   :  { %v666_v18 = vsel %vm662_vm4, %v660_v9, %v664_v16  ;;  %v567_v19 = vadd.f32 %v4093_v15, %v4061_v50  ;;  %v566_v20 = vadd.f32 %v4093_v15, %v4059_v48  ;;  %v969_v62 = vadd.f32 %v4093_v15, %v4063_v51 }
 0x308   :  { %v4106_v22 = vsel %vm674_vm3, %v666_v18, -1e+30  ;;  %v667_v23 = vsel %vm663_vm5, %v661_v10, %v665_v17  ;;  %v4122_v31 = vsel %vm714_vm7, %v666_v18, -1e+30  ;;  %v968_v5 = vadd.f32 %v4093_v15, %v4067_v57  ;;  %v1168_v57 = vld [vmem:[%s4873_s10] sm:$0x3] }
 0x309   :  { %v678_v26 = vsel %vm584_vm2, %v4106_v22, -inf  ;;  %v4114_v28 = vsel %vm675_vm6, %v667_v23, -1e+30  ;;  %vm569_vm9 = vcmp.ge.f32.partialorder %v567_v19, 0.0  ;;  %v571_v32 = vmul.f32 0.2, %v567_v19 }
 0x30a   :  { %679 = vmax.xlane.f32.xlu1 %v678_v26  ;;  %v681_v30 = vsel %vm584_vm2, %v4114_v28, -inf  ;;  %v4126_v33 = vsel %vm4905_vm8, %v667_v23, -1e+30  ;;  %vm568_vm10 = vcmp.ge.f32.partialorder %v566_v20, 0.0  ;;  %v570_v34 = vmul.f32 0.2, %v566_v20 }
 0x30b   :  { %682 = vmax.xlane.f32.xlu0 %v681_v30  ;;  %v573_v35 = vsel %vm569_vm9, %v567_v19, %v571_v32  ;;  %v718_v37 = vsel %vm584_vm2, %v4122_v31, -inf  ;;  %v721_v39 = vsel %vm584_vm2, %v4126_v33, -inf  ;;  %v4171_v10 = vcvt.s32.f32 %v2757_v58 }
 0x30c   :  { %v572_v38 = vsel %vm568_vm10, %v566_v20, %v570_v34  ;;  %v4142_v41 = vsel %vm581_vm12, %v573_v35, -1e+30  ;;  %v4156_v46 = vsel %vm4901_vm14, %v573_v35, -1e+30  ;;  %v973_v14 = vmul.f32 0.2, %v969_v62 }
 0x30d   :  { %v4138_v40 = vsel %vm4912_vm11, %v572_v38, -1e+30  ;;  %v588_v44 = vsel %vm584_vm2, %v4142_v41, -inf  ;;  %v4152_v45 = vsel %vm4902_vm13, %v572_v38, -1e+30  ;;  %v628_v49 = vsel %vm584_vm2, %v4156_v46, -inf }
 0x30e   :  { %719 = vmax.xlane.f32.xlu1 %v718_v37  ;;  %v585_v42 = vsel %vm584_vm2, %v4138_v40, -inf  ;;  %v625_v47 = vsel %vm584_vm2, %v4152_v45, -inf  ;;  %v4179_v51 = vcvt.s32.f32 %v2765_v3  ;;  %v4181_v16 = vcvt.s32.f32 %v2764_v4  ;;  %v1148_v20 = vld [vmem:[#allocation14] sm:$0x3]  ;;  %v1123_v37 = vld [vmem:[#allocation13] sm:$0x3] }
 0x30f   :  { %722 = vmax.xlane.f32.xlu0 %v721_v39  ;;  %vm971_vm4 = vcmp.ge.f32.partialorder %v969_v62, 0.0  ;;  %v972_v19 = vmul.f32 0.2, %v968_v5  ;;  %vm4907_vm5 = vcmp.gt.f32.partialorder %v4171_v10, 0.0  ;;  %vm855_vm9 = vcmp.gt.f32.partialorder %v4173_v11, 0.0 }
 0x310   :  { %vm970_vm10 = vcmp.ge.f32.partialorder %v968_v5, 0.0  ;;  %vm4904_vm1 = vcmp.gt.f32.partialorder %v4175_v12, 0.0  ;;  %vm859_vm13 = vcmask 64512   ;;  %v975_v26 = vsel %vm971_vm4, %v969_v62, %v973_v14 }
 0x311   :  { %v1169_v30 = vunpack.c.0.s8 %v1168_v57  ;;  %v974_v35 = vsel %vm970_vm10, %v968_v5, %v972_v19  ;;  %vm4910_vm4 = vcmp.gt.f32.partialorder %v4179_v51, 0.0  ;;  %v1124_v52 = vunpack.c.0.s8 %v1123_v37 }
 0x312   :  { %586 = vmax.xlane.f32.xlu1 %v585_v42  ;;  %v1119_v58 = vadd.f32 %v4093_v15, %v4072_v63  ;;  %v4226_v62 = vsel %vm4910_vm4, %v975_v26, -1e+30 }
 0x313   :  { %589 = vmax.xlane.f32.xlu0 %v588_v44  ;;  %v4214_v55 = vcvt.s32.f32 %v1169_v30  ;;  %v4232_v4 = vcvt.s32.f32 %v1124_v52  ;;  %v1029_v5 = vsel %vm584_vm2, %v4226_v62, -inf }
 0x314   :  { %v1121_v15 = vmul.f32 0.2, %v1119_v58 }
 0x315   :  { %vm4906_vm10 = vcmp.gt.f32.partialorder %v4214_v55, 0.0 }
 0x316   :  { %626 = vmax.xlane.f32.xlu1 %v625_v47  ;;  %v4207_v47 = vsel %vm4903_vm15, %v975_v26, -1e+30 }
 0x317   :  { %629 = vmax.xlane.f32.xlu0 %v628_v49  ;;  %v4211_v49 = vsel %vm4904_vm1, %v974_v35, -1e+30  ;;  %v989_v60 = vsel %vm584_vm2, %v4207_v47, -inf  ;;  %vm1120_vm1 = vcmp.ge.f32.partialorder %v1119_v58, 0.0 }
 0x318   :  { %v986_v61 = vsel %vm584_vm2, %v4211_v49, -inf  ;;  %v1122_v57 = vsel %vm1120_vm1, %v1119_v58, %v1121_v15  ;;  %vm4935_vm1 = vcmp.gt.f32.partialorder %v4116_v29, 0.0 }
 0x320   :  { %v546_v9 = vpop.trf.xlu1 }
 0x321   :  { %v840_v13 = vrot.slane %v546_v9, %v4070_v59 }
 0x323   :  { %v841_v17 = vadd.f32 %v840_v13, %v4059_v48  ;;  %v842_v18 = vadd.f32 %v840_v13, %v4061_v50  ;;  %v1149_v48 = vunpack.c.0.s8 %v1148_v20  ;;  %v1144_v50 = vadd.f32 %v840_v13, %v4072_v63 }
 0x325   :  { %vm844_vm0 = vcmp.ge.f32.partialorder %v842_v18, 0.0  ;;  %v846_v23 = vmul.f32 0.2, %v842_v18  ;;  %vm843_vm14 = vcmp.ge.f32.partialorder %v841_v17, 0.0  ;;  %v845_v25 = vmul.f32 0.2, %v841_v17 }
 0x326   :  { %v1146_v53 = vmul.f32 0.2, %v1144_v50  ;;  %v4216_v56 = vcvt.s32.f32 %v1149_v48 }
 0x327   :  { %v848_v32 = vsel %vm844_vm0, %v842_v18, %v846_v23  ;;  %v847_v34 = vsel %vm843_vm14, %v841_v17, %v845_v25  ;;  %vm1022_vm0 = vcmp.gt.f32.partialorder %v4181_v16, 0.0  ;;  %vm1145_vm14 = vcmp.ge.f32.partialorder %v1144_v50, 0.0 }
 0x328   :  { %v4194_v38 = vsel %vm4907_vm5, %v848_v32, -1e+30  ;;  %v4198_v39 = vsel %vm855_vm9, %v847_v34, -1e+30  ;;  %v4230_v3 = vsel %vm1022_vm0, %v974_v35, -1e+30  ;;  %v1147_v63 = vsel %vm1145_vm14, %v1144_v50, %v1146_v53 }
 0x329   :  { %v863_v42 = vsel %vm859_vm13, %v4194_v38, -inf  ;;  %v860_v44 = vsel %vm859_vm13, %v4198_v39, -inf  ;;  %vm4909_vm15 = vcmp.gt.f32.partialorder %v4216_v56, 0.0  ;;  %v1026_v9 = vsel %vm584_vm2, %v4230_v3, -inf }
 0x32a   :  { %864 = vmax.xlane.f32.xlu0 %v863_v42  ;;  %861 = vmax.xlane.f32.xlu1 %v860_v44  ;;  %v4242_v13 = vsel %vm4906_vm10, %v1147_v63, -1e+30  ;;  %v4246_v14 = vsel %vm4909_vm15, %v1147_v63, -1e+30  ;;  %vm4908_vm14 = vcmp.gt.f32.partialorder %v4232_v4, 0.0 }
 0x32b   :  { %v1173_v17 = vsel %vm859_vm13, %v4242_v13, -inf  ;;  %v1153_v18 = vsel %vm859_vm13, %v4246_v14, -inf  ;;  %v4255_v19 = vsel %vm4908_vm14, %v1122_v57, -1e+30 }
 0x32c   :  { %v1128_v20 = vsel %vm584_vm2, %v4255_v19, -inf }
 0x32e   :  { %990 = vmax.xlane.f32.xlu0 %v989_v60  ;;  %987 = vmax.xlane.f32.xlu1 %v986_v61 }
 0x332   :  { %1030 = vmax.xlane.f32.xlu0 %v1029_v5  ;;  %1027 = vmax.xlane.f32.xlu1 %v1026_v9 }
 0x336   :  { %1174 = vmax.xlane.f32.xlu0 %v1173_v17  ;;  %1154 = vmax.xlane.f32.xlu1 %v1153_v18 }
 0x33a   :  { %1129 = vmax.xlane.f32.xlu1 %v1128_v20 }
 0x397   :  { %v680_v23 = vpop.xlane.xlu1 %679 }
 0x398   :  { %v684_v25 = vsub.f32 %v4106_v22, %v680_v23  ;;  %v683_v26 = vpop.xlane.xlu0 %682 }
 0x399   :  { %v685_v30 = vsub.f32 %v4114_v28, %v683_v26 }
 0x39a   :  { %v686_v48 = vmul.f32 1.442695, %v684_v25 }
 0x39b   :  { %v688_v50 = vmul.f32 1.442695, %v685_v30  ;;  %v720_v32 = vpop.xlane.xlu1 %719 }
 0x39c   :  { %3289 = vpow2.f32 %v686_v48  ;;  %v724_v34 = vsub.f32 %v4122_v31, %v720_v32  ;;  %v723_v35 = vpop.xlane.xlu0 %722 }
 0x39d   :  { %3291 = vpow2.f32 %v688_v50  ;;  %v725_v37 = vsub.f32 %v4126_v33, %v723_v35 }
 0x39e   :  { %v726_v42 = vmul.f32 1.442695, %v724_v34 }
 0x39f   :  { %v728_v44 = vmul.f32 1.442695, %v725_v37  ;;  %v587_v52 = vpop.xlane.xlu1 %586 }
 0x3a0   :  { %3293 = vpow2.f32 %v726_v42  ;;  %v591_v53 = vsub.f32 %v4138_v40, %v587_v52  ;;  %v590_v22 = vpop.xlane.xlu0 %589 }
 0x3a1   :  { %3295 = vpow2.f32 %v728_v44  ;;  %v592_v28 = vsub.f32 %v4142_v41, %v590_v22 }
 0x3a2   :  { %v593_v58 = vmul.f32 1.442695, %v591_v53 }
 0x3a3   :  { %v595_v60 = vmul.f32 1.442695, %v592_v28  ;;  %v627_v61 = vpop.xlane.xlu1 %626 }
 0x3a4   :  { %3297 = vpow2.f32 %v593_v58  ;;  %v631_v31 = vsub.f32 %v4152_v45, %v627_v61  ;;  %v630_v63 = vpop.xlane.xlu0 %629 }
 0x3a5   :  { %3299 = vpow2.f32 %v595_v60  ;;  %v632_v33 = vsub.f32 %v4156_v46, %v630_v63 }
 0x3a6   :  { %v3290_v15 = vpop.eup %3289  ;;  %v633_v5 = vmul.f32 1.442695, %v631_v31 }
 0x3a7   :  { %v3292_v9 = vpop.eup %3291  ;;  %v635_v57 = vmul.f32 1.442695, %v632_v33  ;;  %v4269_v40 = vsel %vm674_vm3, %v3290_v15, 0.0 }
 0x3a8   :  { %3301 = vpow2.f32 %v633_v5  ;;  %v692_v41 = vsel %vm584_vm2, %v4269_v40, 0.0  ;;  %v4275_v17 = vsel %vm675_vm6, %v3292_v9, 0.0 }
 0x3a9   :  { %3303 = vpow2.f32 %v635_v57  ;;  %693 = vadd.xlane.f32.xlu0 %v692_v41  ;;  %v695_v45 = vsel %vm584_vm2, %v4275_v17, 0.0 }
 0x3aa   :  { %v3294_v46 = vpop.eup %3293  ;;  %696 = vadd.xlane.f32.xlu1 %v695_v45 }
 0x3ab   :  { %v3296_v18 = vpop.eup %3295  ;;  %v4281_v20 = vsel %vm714_vm7, %v3294_v46, 0.0 }
 0x3ac   :  { %v732_v23 = vsel %vm584_vm2, %v4281_v20, 0.0  ;;  %v4287_v25 = vsel %vm4905_vm8, %v3296_v18, 0.0  ;;  %vm4936_vm8 = vcmp.gt.f32.partialorder %v4130_v36, 0.0 }
 0x3ad   :  { %733 = vadd.xlane.f32.xlu0 %v732_v23  ;;  %v735_v26 = vsel %vm584_vm2, %v4287_v25, 0.0 }
 0x3ae   :  { %v3298_v30 = vpop.eup %3297  ;;  %736 = vadd.xlane.f32.xlu1 %v735_v26 }
 0x3af   :  { %v3300_v48 = vpop.eup %3299  ;;  %v4293_v50 = vsel %vm4912_vm11, %v3298_v30, 0.0 }
 0x3b0   :  { %v599_v32 = vsel %vm584_vm2, %v4293_v50, 0.0  ;;  %v4299_v34 = vsel %vm581_vm12, %v3300_v48, 0.0 }
 0x3b1   :  { %600 = vadd.xlane.f32.xlu0 %v599_v32  ;;  %v602_v35 = vsel %vm584_vm2, %v4299_v34, 0.0 }
 0x3b2   :  { %v3302_v37 = vpop.eup %3301  ;;  %603 = vadd.xlane.f32.xlu1 %v602_v35 }
 0x3b3   :  { %v3304_v42 = vpop.eup %3303  ;;  %v4305_v44 = vsel %vm4935_vm1, %v3302_v37, 0.0  ;;  %vm4938_vm1 = vcmp.gt.f32.partialorder %v4167_v1, 0.0 }
 0x3b4   :  { %v639_v52 = vsel %vm584_vm2, %v4305_v44, 0.0  ;;  %v4311_v53 = vsel %vm4936_vm8, %v3304_v42, 0.0  ;;  %vm4937_vm8 = vcmp.gt.f32.partialorder %v4175_v12, 0.0 }
 0x3b5   :  { %640 = vadd.xlane.f32.xlu0 %v639_v52  ;;  %v642_v22 = vsel %vm584_vm2, %v4311_v53, 0.0 }
 0x3b6   :  { %643 = vadd.xlane.f32.xlu1 %v642_v22 }
 0x3b7   :  { %v862_v28 = vpop.xlane.xlu1 %861  ;;  %v865_v58 = vpop.xlane.xlu0 %864 }
 0x3b8   :  { %v866_v60 = vsub.f32 %v4198_v39, %v862_v28  ;;  %v867_v61 = vsub.f32 %v4194_v38, %v865_v58 }
 0x3ba   :  { %v868_v31 = vmul.f32 1.442695, %v866_v60  ;;  %v870_v63 = vmul.f32 1.442695, %v867_v61 }
 0x3bb   :  { %v988_v33 = vpop.xlane.xlu1 %987  ;;  %v991_v15 = vpop.xlane.xlu0 %990 }
 0x3bc   :  { %3305 = vpow2.f32 %v868_v31  ;;  %v992_v5 = vsub.f32 %v4211_v49, %v988_v33  ;;  %v993_v9 = vsub.f32 %v4207_v47, %v991_v15 }
 0x3bd   :  { %3307 = vpow2.f32 %v870_v63 }
 0x3be   :  { %v994_v57 = vmul.f32 1.442695, %v992_v5  ;;  %v996_v41 = vmul.f32 1.442695, %v993_v9 }
 0x3bf   :  { %v1028_v45 = vpop.xlane.xlu1 %1027  ;;  %v1031_v46 = vpop.xlane.xlu0 %1030 }
 0x3c0   :  { %3309 = vpow2.f32 %v994_v57  ;;  %v1032_v18 = vsub.f32 %v4230_v3, %v1028_v45  ;;  %v1033_v39 = vsub.f32 %v4226_v62, %v1031_v46 }
 0x3c1   :  { %3311 = vpow2.f32 %v996_v41 }
 0x3c2   :  { %v1034_v38 = vmul.f32 1.442695, %v1032_v18  ;;  %v1036_v23 = vmul.f32 1.442695, %v1033_v39 }
 0x3c3   :  { %v1155_v26 = vpop.xlane.xlu1 %1154  ;;  %v1175_v30 = vpop.xlane.xlu0 %1174 }
 0x3c4   :  { %3313 = vpow2.f32 %v1034_v38  ;;  %v1156_v49 = vsub.f32 %v4246_v14, %v1155_v26  ;;  %v1176_v47 = vsub.f32 %v4242_v13, %v1175_v30 }
 0x3c5   :  { %3315 = vpow2.f32 %v1036_v23 }
 0x3c6   :  { %v3306_v48 = vpop.eup %3305  ;;  %v1157_v32 = vmul.f32 1.442695, %v1156_v49  ;;  %v1177_v35 = vmul.f32 1.442695, %v1176_v47 }
 0x3c7   :  { %v3308_v37 = vpop.eup %3307  ;;  %v1130_v42 = vpop.xlane.xlu1 %1129  ;;  %v4325_v3 = vsel %vm855_vm9, %v3306_v48, 0.0 }
 0x3c8   :  { %3317 = vpow2.f32 %v1157_v32  ;;  %v1131_v62 = vsub.f32 %v4255_v19, %v1130_v42  ;;  %v874_v52 = vsel %vm859_vm13, %v4325_v3, 0.0  ;;  %v4332_v14 = vsel %vm4907_vm5, %v3308_v37, 0.0 }
 0x3c9   :  { %3319 = vpow2.f32 %v1177_v35  ;;  %875 = vadd.xlane.f32.xlu0 %v874_v52  ;;  %v877_v13 = vsel %vm859_vm13, %v4332_v14, 0.0 }
 0x3ca   :  { %v3310_v22 = vpop.eup %3309  ;;  %v1132_v28 = vmul.f32 1.442695, %v1131_v62  ;;  %878 = vadd.xlane.f32.xlu1 %v877_v13 }
 0x3cb   :  { %v3312_v58 = vpop.eup %3311  ;;  %v4338_v60 = vsel %vm4937_vm8, %v3310_v22, 0.0 }
 0x3cc   :  { %3321 = vpow2.f32 %v1132_v28  ;;  %v1000_v19 = vsel %vm584_vm2, %v4338_v60, 0.0  ;;  %v4344_v61 = vsel %vm4938_vm1, %v3312_v58, 0.0 }
 0x3cd   :  { %1001 = vadd.xlane.f32.xlu0 %v1000_v19  ;;  %v1003_v31 = vsel %vm584_vm2, %v4344_v61, 0.0 }
 0x3ce   :  { %v3314_v63 = vpop.eup %3313  ;;  %1004 = vadd.xlane.f32.xlu1 %v1003_v31 }
 0x3cf   :  { %v3316_v33 = vpop.eup %3315  ;;  %v4350_v15 = vsel %vm1022_vm0, %v3314_v63, 0.0 }
 0x3d0   :  { %v1040_v5 = vsel %vm584_vm2, %v4350_v15, 0.0  ;;  %v4356_v9 = vsel %vm4910_vm4, %v3316_v33, 0.0 }
 0x3d1   :  { %1041 = vadd.xlane.f32.xlu0 %v1040_v5  ;;  %v1043_v57 = vsel %vm584_vm2, %v4356_v9, 0.0 }
 0x3d2   :  { %v3318_v41 = vpop.eup %3317  ;;  %1044 = vadd.xlane.f32.xlu1 %v1043_v57 }
 0x3d3   :  { %v3320_v45 = vpop.eup %3319  ;;  %v4362_v46 = vsel %vm4909_vm15, %v3318_v41, 0.0 }
 0x3d4   :  { %v1160_v18 = vsel %vm859_vm13, %v4362_v46, 0.0  ;;  %v4368_v39 = vsel %vm4906_vm10, %v3320_v45, 0.0 }
 0x3d5   :  { %1161 = vadd.xlane.f32.xlu0 %v1160_v18  ;;  %v1180_v38 = vsel %vm859_vm13, %v4368_v39, 0.0 }
 0x3d6   :  { %v3322_v23 = vpop.eup %3321  ;;  %1181 = vadd.xlane.f32.xlu1 %v1180_v38 }
 0x3d7   :  { %v4374_v26 = vsel %vm4908_vm14, %v3322_v23, 0.0 }
 0x3d8   :  { %v1135_v30 = vsel %vm584_vm2, %v4374_v26, 0.0 }
 0x3d9   :  { %1136 = vadd.xlane.f32.xlu0 %v1135_v30 }
 0x436   :  { %v694_v49 = vpop.xlane.xlu0 %693 }
 0x437   :  { %v697_v47 = vpop.xlane.xlu1 %696  ;;  %vm698_vm8 = vcmp.gt.f32.partialorder %v694_v49, 0.0 }
 0x438   :  { %vm699_vm1 = vcmp.gt.f32.partialorder %v697_v47, 0.0  ;;  %v700_v48 = vsel %vm698_vm8, %v694_v49, 1.0 }
 0x439   :  { %v701_v32 = vsel %vm699_vm1, %v697_v47, 1.0  ;;  %3323 = vrcp.f32 %v700_v48 }
 0x43a   :  { %v734_v35 = vpop.xlane.xlu0 %733  ;;  %3325 = vrcp.f32 %v701_v32 }
 0x43b   :  { %v737_v37 = vpop.xlane.xlu1 %736  ;;  %vm738_vm10 = vcmp.gt.f32.partialorder %v734_v35, 0.0 }
 0x43c   :  { %vm739_vm5 = vcmp.gt.f32.partialorder %v737_v37, 0.0  ;;  %v740_v42 = vsel %vm738_vm10, %v734_v35, 1.0 }
 0x43d   :  { %v741_v62 = vsel %vm739_vm5, %v737_v37, 1.0  ;;  %3327 = vrcp.f32 %v740_v42 }
 0x43e   :  { %3329 = vrcp.f32 %v741_v62  ;;  %v601_v52 = vpop.xlane.xlu0 %600 }
 0x43f   :  { %v604_v13 = vpop.xlane.xlu1 %603  ;;  %vm605_vm14 = vcmp.gt.f32.partialorder %v601_v52, 0.0 }
 0x440   :  { %vm606_vm15 = vcmp.gt.f32.partialorder %v604_v13, 0.0  ;;  %v607_v22 = vsel %vm605_vm14, %v601_v52, 1.0 }
 0x441   :  { %v608_v28 = vsel %vm606_vm15, %v604_v13, 1.0  ;;  %3331 = vrcp.f32 %v607_v22  ;;  %vm4939_vm15 = vmmov 0  }
 0x442   :  { %v641_v58 = vpop.xlane.xlu0 %640  ;;  %3333 = vrcp.f32 %v608_v28 }
 0x443   :  { %v644_v19 = vpop.xlane.xlu1 %643  ;;  %vm645_vm8 = vcmp.gt.f32.partialorder %v641_v58, 0.0  ;;  %v3324_v63 = vpop.eup %3323 }
 0x444   :  { %vm646_vm1 = vcmp.gt.f32.partialorder %v644_v19, 0.0  ;;  %v647_v31 = vsel %vm645_vm8, %v641_v58, 1.0  ;;  %v3326_v5 = vpop.eup %3325  ;;  %v704_v45 = vmul.f32 %v3324_v63, %v4269_v40 }
 0x445   :  { %v648_v33 = vsel %vm646_vm1, %v644_v19, 1.0  ;;  %3335 = vrcp.f32 %v647_v31  ;;  %v705_v38 = vmul.f32 %v3326_v5, %v4275_v17 }
 0x446   :  { %3337 = vrcp.f32 %v648_v33 }
 0x447   :  { %v3328_v57 = vpop.eup %3327 }
 0x448   :  { %v3330_v41 = vpop.eup %3329  ;;  %v744_v18 = vmul.f32 %v3328_v57, %v4281_v20 }
 0x449   :  { %v745_v23 = vmul.f32 %v3330_v41, %v4287_v25 }
 0x44a   :  { %v746_v30 = vadd.f32 %v744_v18, %v704_v45 }
 0x44b   :  { %v747_v49 = vadd.f32 %v745_v23, %v705_v38  ;;  %v3332_v47 = vpop.eup %3331 }
 0x44c   :  { %v3334_v32 = vpop.eup %3333  ;;  %v611_v25 = vmul.f32 %v3332_v47, %v4293_v50 }
 0x44d   :  { %v748_v48 = vpack.c.bf16 %v747_v49, %v746_v30  ;;  %v612_v20 = vmul.f32 %v3334_v32, %v4299_v34 }
 0x44f   :  { %v3336_v35 = vpop.eup %3335  ;;  %2949 = vmatmul.mubr.msk.bf16.vlgmr.msra.gmra.mrb[4].mxu1 %vm584_vm2, %v748_v48 }
 0x450   :  { %v3338_v37 = vpop.eup %3337  ;;  %2953 = vmatpush3.bf16.msra.mxu1 %v4051_v27  ;;  %2954 = vmatprep.mubr.msk.bf16.mxu1 %vm4939_vm15, %v3720_v0  ;;  %v651_v17 = vmul.f32 %v3336_v35, %v4305_v44 }
 0x451   :  { %v652_v40 = vmul.f32 %v3338_v37, %v4311_v53  ;;  %2958 = vmatprep.subr.bf16.mxu1 %v3720_v0 }
 0x452   :  { %v653_v42 = vadd.f32 %v651_v17, %v611_v25 }
 0x453   :  { %v654_v62 = vadd.f32 %v652_v40, %v612_v20 }
 0x455   :  { %v655_v58 = vpack.c.bf16 %v654_v62, %v653_v42 }
 0x456   :  { %v876_v52 = vpop.xlane.xlu0 %875 }
 0x457   :  { %v879_v13 = vpop.xlane.xlu1 %878  ;;  %vm880_vm5 = vcmp.gt.f32.partialorder %v876_v52, 0.0 }
 0x458   :  { %vm881_vm10 = vcmp.gt.f32.partialorder %v879_v13, 0.0  ;;  %v882_v22 = vsel %vm880_vm5, %v876_v52, 1.0 }
 0x459   :  { %v883_v28 = vsel %vm881_vm10, %v879_v13, 1.0  ;;  %3339 = vrcp.f32 %v882_v22  ;;  %v4408_v13 = vld [vmem:[#allocation16 + $0x40] sm:$0xff]  }
 0x45a   :  { %3341 = vrcp.f32 %v883_v28  ;;  %v1002_v53 = vpop.xlane.xlu0 %1001 }
 0x45b   :  { %v1005_v19 = vpop.xlane.xlu1 %1004  ;;  %2955 = vmatmul.mubr.msk.bf16.vlgmr.msra.gmra.mrb[4].mxu1 %vm584_vm2, %v655_v58  ;;  %vm1006_vm14 = vcmp.gt.f32.partialorder %v1002_v53, 0.0  ;;  %v4429_v58 = vld [vmem:[#allocation16 + $0x58] sm:$0xff]  }
 0x45c   :  { %vm1007_vm8 = vcmp.gt.f32.partialorder %v1005_v19, 0.0  ;;  %v1008_v34 = vsel %vm1006_vm14, %v1002_v53, 1.0  ;;  %2959 = vmatpush3.bf16.msra.mxu1 %v4055_v43  ;;  %2960 = vmatprep.mubr.msk.bf16.mxu1 %vm4939_vm15, %v3720_v0  ;;  %v4433_v53 = vld [vmem:[#allocation16 + $0x60] sm:$0xff]  }
 0x45d   :  { %v1009_v50 = vsel %vm1007_vm8, %v1005_v19, 1.0  ;;  %2964 = vmatprep.subr.bf16.mxu1 %v3720_v0  ;;  %3343 = vrcp.f32 %v1008_v34  ;;  %v4457_v19 = vld [vmem:[#allocation16 + $0x70] sm:$0xff]   ;;  %v4460_v34 = vld [vmem:[#allocation16 + $0x78] sm:$0xff]  }
 0x45e   :  { %v1042_v44 = vpop.xlane.xlu0 %1041  ;;  %3345 = vrcp.f32 %v1009_v50  ;;  %v2697_v50 = vld [vmem:[%s4879_s16] ss:$0 sm:$0xff] }
 0x45f   :  { %v1045_v31 = vpop.xlane.xlu1 %1044  ;;  %vm1046_vm1 = vcmp.gt.f32.partialorder %v1042_v44, 0.0 }
 0x460   :  { %vm1047_vm5 = vcmp.gt.f32.partialorder %v1045_v31, 0.0  ;;  %v1048_v63 = vsel %vm1046_vm1, %v1042_v44, 1.0 }
 0x461   :  { %v1049_v33 = vsel %vm1047_vm5, %v1045_v31, 1.0  ;;  %3347 = vrcp.f32 %v1048_v63 }
 0x462   :  { %3349 = vrcp.f32 %v1049_v33  ;;  %v1162_v5 = vpop.xlane.xlu0 %1161 }
 0x463   :  { %v3340_v57 = vpop.eup %3339  ;;  %v1182_v41 = vpop.xlane.xlu1 %1181  ;;  %vm1163_vm10 = vcmp.gt.f32.partialorder %v1162_v5, 0.0 }
 0x464   :  { %v3342_v43 = vpop.eup %3341  ;;  %v886_v45 = vmul.f32 %v3340_v57, %v4325_v3  ;;  %vm1183_vm14 = vcmp.gt.f32.partialorder %v1182_v41, 0.0  ;;  %v1164_v18 = vsel %vm1163_vm10, %v1162_v5, 1.0  ;;  %v959_v5 = vadd.s32 8, %v4065_v54 }
 0x465   :  { %v887_v38 = vmul.f32 %v3342_v43, %v4332_v14  ;;  %v1184_v23 = vsel %vm1183_vm14, %v1182_v41, 1.0  ;;  %3351 = vrcp.f32 %v1164_v18  ;;  %vm3722_vm14 = vmmov 1  }
 0x466   :  { %3353 = vrcp.f32 %v1184_v23  ;;  %v1137_v30 = vpop.xlane.xlu0 %1136  ;;  %vm961_vm5 = vcmp.lt.s32.totalorder %v959_v5, 12 }
 0x467   :  { %v890_v49 = vpack.c.bf16 %v887_v38, %v886_v45  ;;  %v3344_v47 = vpop.eup %3343  ;;  %vm1138_vm8 = vcmp.gt.f32.partialorder %v1137_v30, 0.0 }
 0x468   :  { %v3346_v48 = vpop.eup %3345  ;;  %v1012_v14 = vmul.f32 %v3344_v47, %v4338_v60  ;;  %v1139_v17 = vsel %vm1138_vm8, %v1137_v30, 1.0  ;;  %vm4474_vm8 = vmpackc.low %vm961_vm5, %vm3722_vm14  ;;  %vm1112_vm5 = vcmp.lt.s32.totalorder %v959_v5, 10 }
 0x469   :  { %2961 = vmatmul.mubr.msk.bf16.vlgmr.msra.gmra.mrb[4].mxu1 %vm859_vm13, %v890_v49  ;;  %v1013_v37 = vmul.f32 %v3346_v48, %v4344_v61  ;;  %3355 = vrcp.f32 %v1139_v17  ;;  %vm4487_vm4 = vmpackc.low %vm1112_vm5, %vm3722_vm14 }
 0x46a   :  { %2965 = vmatpush3.bf16.msra.mxu1 %v4051_v27  ;;  %2966 = vmatprep.mubr.msk.bf16.mxu1 %vm4939_vm15, %v3720_v0 }
 0x46b   :  { %v3348_v3 = vpop.eup %3347  ;;  %2982 = vmatprep.subr.bf16.mxu1 %v3720_v0 }
 0x46c   :  { %v3350_v32 = vpop.eup %3349  ;;  %v1052_v35 = vmul.f32 %v3348_v3, %v4350_v15  ;;  %v4416_v15 = vld [vmem:[#allocation16 + $0x48] sm:$0xff]  }
 0x46d   :  { %v1053_v40 = vmul.f32 %v3350_v32, %v4356_v9  ;;  %v4423_v9 = vld [vmem:[#allocation16 + $0x50] sm:$0xff]  }
 0x46e   :  { %v1054_v20 = vadd.f32 %v1052_v35, %v1012_v14 }
 0x46f   :  { %v3352_v25 = vpop.eup %3351  ;;  %v1055_v42 = vadd.f32 %v1053_v40, %v1013_v37 }
 0x470   :  { %v3354_v62 = vpop.eup %3353  ;;  %v1166_v52 = vmul.f32 %v3352_v25, %v4362_v46 }
 0x471   :  { %v1186_v22 = vmul.f32 %v3354_v62, %v4368_v39  ;;  %v1056_v28 = vpack.c.bf16 %v1055_v42, %v1054_v20 }
 0x473   :  { %2967 = vmatmul.mubr.msk.bf16.vlgmr.msra.gmra.mrb[8].mxu1 %vm584_vm2, %v1056_v28  ;;  %v1187_v60 = vadd.f32 %v1186_v22, %v1166_v52  ;;  %v3356_v46 = vpop.eup %3355 }
 0x474   :  { %2983 = vmatpush3.bf16.msra.mxu1 %v4408_v13  ;;  %2998 = vmatprep.mubr.msk.bf16.mxu1 %vm4939_vm15, %v3720_v0  ;;  %v1141_v39 = vmul.f32 %v3356_v46, %v4374_v26  ;;  %v4451_v26 = vld [vmem:[#allocation16 + $0x68] sm:$0xff]  }
 0x475   :  { %v1188_v61 = vpack.c.bf16 %v1187_v60, %v1187_v60  ;;  %2984 = vmatprep.subr.bf16.mxu1 %v3720_v0 }
 0x477   :  { %2973 = vmatmul.mubr.msk.bf16.vlgmr.msra.gmra.mrb[8].mxu0 %vm859_vm13, %v1188_v61 }
 0x478   :  { %2977 = vmatpush3.bf16.msra.mxu0 %v4051_v27  ;;  %2978 = vmatprep.mubr.msk.bf16.mxu0 %vm4939_vm15, %v3720_v0  ;;  %v1143_v27 = vpack.c.bf16 %v1141_v39, %v1141_v39 }
 0x479   :  { %2985 = vmatpush3.bf16.msra.mxu1 %v4416_v15  ;;  %3002 = vmatprep.subr.bf16.mxu0 %v3720_v0 }
 0x47a   :  { %2986 = vmatprep.subr.bf16.mxu1 %v3720_v0 }
 0x47d   :  { %2987 = vmatpush3.bf16.msra.mxu1 %v4423_v9 }
 0x47e   :  { %2988 = vmatprep.subr.bf16.mxu1 %v3720_v0 }
 0x481   :  { %2989 = vmatpush3.bf16.msra.mxu1 %v4429_v58 }
 0x482   :  { %2990 = vmatprep.subr.bf16.mxu1 %v3720_v0 }
 0x483   :  { %2979 = vmatmul.mubr.msk.bf16.vlgmr.msra.gmra.mrb[8].mxu0 %vm584_vm2, %v1143_v27 }
 0x484   :  { %3003 = vmatpush3.bf16.msra.mxu0 %v4408_v13  ;;  %3018 = vmatprep.mubr.msk.bf16.mxu0 %vm4939_vm15, %v3720_v0 }
 0x485   :  { %3004 = vmatprep.subr.bf16.mxu0 %v3720_v0  ;;  %2991 = vmatpush3.bf16.msra.mxu1 %v4433_v53 }
 0x486   :  { %2992 = vmatprep.subr.bf16.mxu1 %v3720_v0 }
 0x488   :  { %3005 = vmatpush3.bf16.msra.mxu0 %v4416_v15 }
 0x489   :  { %3006 = vmatprep.subr.bf16.mxu0 %v3720_v0  ;;  %2993 = vmatpush3.bf16.msra.mxu1 %v4451_v26 }
 0x48a   :  { %2994 = vmatprep.subr.bf16.mxu1 %v3720_v0 }
 0x48c   :  { %3007 = vmatpush3.bf16.msra.mxu0 %v4423_v9 }
 0x48d   :  { %3008 = vmatprep.subr.bf16.mxu0 %v3720_v0  ;;  %2995 = vmatpush3.bf16.msra.mxu1 %v4457_v19 }
 0x48e   :  { %2996 = vmatprep.subr.bf16.mxu1 %v3720_v0 }
 0x490   :  { %3009 = vmatpush3.bf16.msra.mxu0 %v4429_v58 }
 0x491   :  { %3010 = vmatprep.subr.bf16.mxu0 %v3720_v0  ;;  %2997 = vmatpush3.bf16.msra.mxu1 %v4460_v34 }
 0x492   :  { %3022 = vmatprep.subr.bf16.mxu1 %v3720_v0 }
 0x494   :  { %3011 = vmatpush3.bf16.msra.mxu0 %v4433_v53 }
 0x495   :  { %3012 = vmatprep.subr.bf16.mxu0 %v3720_v0 }
 0x498   :  { %3013 = vmatpush3.bf16.msra.mxu0 %v4451_v26 }
 0x499   :  { %3014 = vmatprep.subr.bf16.mxu0 %v3720_v0 }
 0x49c   :  { %3015 = vmatpush3.bf16.msra.mxu0 %v4457_v19 }
 0x49d   :  { %3016 = vmatprep.subr.bf16.mxu0 %v3720_v0 }
 0x4a0   :  { %3017 = vmatpush3.bf16.msra.mxu0 %v4460_v34 }
 0x4a1   :  { %3042 = vmatprep.subr.bf16.mxu0 %v3720_v0 }
 0x53c   :  { %v932_v44 = vpop.f32.mrb[4].mxu1 }
 0x53d   :  { %v941_v31 = vmul.f32 0.2, %v932_v44  ;;  %v2962_v63 = vpop.f32.mrb[5].mxu1  ;;  %v2716_v44 = vld [vmem:[%s4877_s14 + $0x1] ss:$0 sm:$0xff] }
 0x53e   :  { %v935_v33 = vpop.f32.mrb[6].mxu1 }
 0x53f   :  { %v949_v57 = vadd.f32 %v2697_v50, %v941_v31  ;;  %v942_v41 = vmul.f32 0.2, %v935_v33  ;;  %v2963_v43 = vpop.f32.mrb[7].mxu1 }
 0x541   :  { %v953_v45 = vmul.f32 0.01, %v949_v57  ;;  %v950_v18 = vadd.f32 %v2697_v50, %v942_v41  ;;  %vm951_vm1 = vcmp.ge.f32.partialorder %v949_v57, 0.0 }
 0x543   :  { %vm952_vm10 = vcmp.ge.f32.partialorder %v950_v18, 0.0  ;;  %v954_v38 = vmul.f32 0.01, %v950_v18  ;;  %v955_v23 = vsel %vm951_vm1, %v949_v57, %v953_v45 }
 0x545   :  { %v956_v30 = vsel %vm952_vm10, %v950_v18, %v954_v38  ;;  %v2715_v18 = vld [vmem:[%s4878_s15 + $0x1] ss:$0 sm:$0xff] }
 0x546   :  { %v2713_v47 = vpack.c.bf16 %v956_v30, %v955_v23  ;;  %v1094_v48 = vpop.f32.mrb[8].mxu1 }
 0x547   :  { %v1101_v3 = vmul.f32 0.5, %v1094_v48  ;;  %v2968_v32 = vpop.f32.mrb[9].mxu1 }
 0x548   :  { %v1097_v14 = vpop.f32.mrb[10].mxu1  ;;  %2999 = vmatmul.mubr.msk.bf16.vlgmr.msra.gmra.mrb[12].mxu1 %vm4474_vm8, %v2713_v47 }
 0x549   :  { %v1103_v35 = vadd.f32 %v2697_v50, %v1101_v3  ;;  %v1102_v37 = vmul.f32 0.5, %v1097_v14  ;;  %3023 = vmatpush3.bf16.msra.mxu1 %v4408_v13  ;;  %v2969_v40 = vpop.f32.mrb[11].mxu1  ;;  %3038 = vmatprep.mubr.msk.bf16.mxu1 %vm4939_vm15, %v3720_v0 }
 0x54a   :  { %3024 = vmatprep.subr.bf16.mxu1 %v3720_v0 }
 0x54b   :  { %v1107_v17 = vmul.f32 0.01, %v1103_v35  ;;  %v1104_v20 = vadd.f32 %v2697_v50, %v1102_v37  ;;  %vm1105_vm1 = vcmp.ge.f32.partialorder %v1103_v35, 0.0 }
 0x54d   :  { %vm1106_vm10 = vcmp.ge.f32.partialorder %v1104_v20, 0.0  ;;  %v1108_v25 = vmul.f32 0.01, %v1104_v20  ;;  %3025 = vmatpush3.bf16.msra.mxu1 %v4416_v15  ;;  %v1109_v42 = vsel %vm1105_vm1, %v1103_v35, %v1107_v17  ;;  %vm4911_vm1 = vcmp.lt.s32.totalorder %v4065_v54, 6 }
 0x54e   :  { %3026 = vmatprep.subr.bf16.mxu1 %v3720_v0  ;;  %vm2720_vm5 = vmpackc.low %vm4911_vm1, %vm4911_vm1  ;;  %vm4945_vm1 = vcmp.gt.f32.partialorder %v4087_v8, 0.0 }
 0x54f   :  { %v1110_v62 = vsel %vm1106_vm10, %v1104_v20, %v1108_v25 }
 0x550   :  { %v2718_v13 = vpack.c.bf16 %v1110_v62, %v1109_v42 }
 0x551   :  { %3027 = vmatpush3.bf16.msra.mxu1 %v4423_v9 }
 0x552   :  { %3019 = vmatmul.mubr.msk.bf16.vlgmr.msra.gmra.mrb[12].mxu0 %vm4487_vm4, %v2718_v13  ;;  %3028 = vmatprep.subr.bf16.mxu1 %v3720_v0 }
 0x553   :  { %3044 = vmatprep.mubr.msk.bf16.mxu0 %vm4939_vm15, %v3720_v0 }
 0x555   :  { %3029 = vmatpush3.bf16.msra.mxu1 %v4429_v58 }
 0x556   :  { %v1269_v22 = vpop.f32.mrb[8].mxu0  ;;  %3030 = vmatprep.subr.bf16.mxu1 %v3720_v0 }
 0x557   :  { %v1275_v28 = vmul.f32 0.33333334, %v1269_v22  ;;  %v2980_v60 = vpop.f32.mrb[9].mxu0 }
 0x558   :  { %v1272_v61 = vpop.f32.mrb[10].mxu0 }
 0x559   :  { %3031 = vmatpush3.bf16.msra.mxu1 %v4433_v53  ;;  %v2981_v15 = vpop.f32.mrb[11].mxu0  ;;  %v1276_v9 = vadd.f32 %v2697_v50, %v1275_v28 }
 0x55a   :  { %3032 = vmatprep.subr.bf16.mxu1 %v3720_v0 }
 0x55b   :  { %v1278_v46 = vmul.f32 0.01, %v1276_v9  ;;  %vm1277_vm14 = vcmp.ge.f32.partialorder %v1276_v9, 0.0 }
 0x55d   :  { %3033 = vmatpush3.bf16.msra.mxu1 %v4451_v26  ;;  %v1279_v39 = vsel %vm1277_vm14, %v1276_v9, %v1278_v46 }
 0x55e   :  { %3034 = vmatprep.subr.bf16.mxu1 %v3720_v0  ;;  %v2721_v58 = vpack.c.bf16 %v1279_v39, %v1279_v39 }
 0x561   :  { %3035 = vmatpush3.bf16.msra.mxu1 %v4457_v19 }
 0x562   :  { %3036 = vmatprep.subr.bf16.mxu1 %v3720_v0 }
 0x565   :  { %3037 = vmatpush3.bf16.msra.mxu1 %v4460_v34 }
 0x566   :  { %3060 = vmatprep.subr.bf16.mxu1 %v3720_v0 }
 0x568   :  { %3039 = vmatmul.mubr.msk.bf16.vlgmr.msra.gmra.mrb[16].mxu1 %vm2720_vm5, %v2721_v58 }
 0x569   :  { %3062 = vmatprep.mubr.msk.bf16.mxu1 %vm4939_vm15, %v3720_v0 }
 0x61b   :  { %v1390_v27 = vpop.f32.mrb[12].mxu1 }
 0x61c   :  { %v3000_v53 = vpop.f32.mrb[13].mxu1  ;;  %v1416_v43 = vmul.f32 %v2716_v44, %v1390_v27  ;;  %v1404_v23 = vmul.f32 %v2715_v18, %v1390_v27 }
 0x61d   :  { %v1393_v26 = vpop.f32.mrb[14].mxu1 }
 0x61e   :  { %v4513_v19 = vpack.c.bf16 %v1393_v26, %v1390_v27  ;;  %v3001_v50 = vpop.f32.mrb[15].mxu1  ;;  %v1417_v45 = vmul.f32 %v2716_v44, %v1393_v26  ;;  %v1405_v38 = vmul.f32 %v2715_v18, %v1393_v26 }
 0x620   :  { %3061 = vmatpush3.bf16.msra.mxu1 %v4513_v19 }
 0x625   :  { %v1489_v34 = vpop.f32.mrb[12].mxu0 }
 0x626   :  { %v3020_v31 = vpop.f32.mrb[13].mxu0  ;;  %v1503_v63 = vmul.f32 %v2716_v44, %v1489_v34  ;;  %v1497_v47 = vmul.f32 %v2715_v18, %v1489_v34 }
 0x627   :  { %v1492_v33 = vpop.f32.mrb[14].mxu0 }
 0x628   :  { %v1496_v5 = vpack.c.bf16 %v1492_v33, %v1489_v34  ;;  %1505 = vadd.xlane.f32.xlu1 %v1503_v63  ;;  %v3021_v57 = vpop.f32.mrb[15].mxu0  ;;  %v1504_v41 = vmul.f32 %v2716_v44, %v1492_v33  ;;  %v1498_v30 = vmul.f32 %v2715_v18, %v1492_v33 }
 0x62a   :  { %1507 = vadd.xlane.f32.xlu0 %v1504_v41  ;;  %3043 = vmatpush3.bf16.msra.mxu0 %v1496_v5 }
 0x62b   :  { %3048 = vmatprep.subr.bf16.mxu0 %v3720_v0 }
 0x62c   :  { %1418 = vadd.xlane.f32.xlu1 %v1416_v43 }
 0x62e   :  { %1420 = vadd.xlane.f32.xlu0 %v1417_v45 }
 0x630   :  { %1408 = vadd.xlane.f32.xlu1 %v1405_v38 }
 0x632   :  { %1406 = vadd.xlane.f32.xlu0 %v1404_v23 }
 0x634   :  { %1501 = vadd.xlane.f32.xlu1 %v1498_v30 }
 0x636   :  { %1499 = vadd.xlane.f32.xlu0 %v1497_v47 }
 0x63b   :  { %v4523_v48 = vpop.f32.mrb[16].mxu1 }
 0x63c   :  { %v3040_v3 = vpop.f32.mrb[17].mxu1  ;;  %v1583_v32 = vmul.f32 %v2715_v18, %v4523_v48  ;;  %v1586_v14 = vmul.f32 %v2716_v44, %v4523_v48 }
 0x63d   :  { %v1579_v35 = vpop.f32.mrb[18].mxu1 }
 0x63e   :  { %v3041_v37 = vpop.f32.mrb[19].mxu1  ;;  %1584 = vadd.xlane.f32.xlu0 %v1583_v32  ;;  %1587 = vadd.xlane.f32.xlu1 %v1586_v14 }
 0x6b5   :  { %v1506_v40 = vpop.xlane.xlu1 %1505 }
 0x6b6   :  { %1509 = vxpose.xlu1.b32.start [1/2] (short) (narrow) %v1506_v40, 8 }
 0x6b7   :  { %v1508_v17 = vpop.xlane.xlu0 %1507 }
 0x6b9   :  { %v1419_v20 = vpop.xlane.xlu1 %1418 }
 0x6ba   :  { %1422 = vxpose.xlu0.b32.start [1/2] (short) (narrow) %v1419_v20, 8  ;;  %1510 = vxpose.xlu1.b32.end [2/2] (short) (narrow) %v1508_v17, 8 }
 0x6bb   :  { %v1421_v25 = vpop.xlane.xlu0 %1420 }
 0x6bd   :  { %v4527_v42 = vpop.xlane.xlu1 %1408 }
 0x6be   :  { %1423 = vxpose.xlu0.b32.end [2/2] (short) (narrow) %v1421_v25, 8 }
 0x6bf   :  { %v1407_v22 = vpop.xlane.xlu0 %1406 }
 0x6c1   :  { %v1502_v62 = vpop.xlane.xlu1 %1501 }
 0x6c3   :  { %v1500_v28 = vpop.xlane.xlu0 %1499 }
 0x6cb   :  { %v1588_v13 = vpop.xlane.xlu1 %1587  ;;  %v1585_v60 = vpop.xlane.xlu0 %1584 }
 0x6cc   :  { %1589 = vxpose.xlu0.b32.start.end [1/1] (short) (narrow) %v1588_v13, 8 }
 0x736   :  { %v1525_v61 = vpop.trf.xlu1 }
 0x737   :  { %v1701_v15 = vrot.slane %v1525_v61, %v4070_v59 }
 0x739   :  { %v1702_v9 = vadd.f32 %v1701_v15, %v1407_v22  ;;  %v1703_v46 = vadd.f32 %v1701_v15, %v4527_v42 }
 0x73a   :  { %v1438_v39 = vpop.trf.xlu0 }
 0x73b   :  { %v1624_v58 = vrot.slane %v1438_v39, %v4070_v59  ;;  %vm1705_vm10 = vcmp.ge.f32.partialorder %v1703_v46, 0.0  ;;  %v1707_v27 = vmul.f32 0.2, %v1703_v46  ;;  %vm1704_vm14 = vcmp.ge.f32.partialorder %v1702_v9, 0.0 }
 0x73c   :  { %v1706_v53 = vmul.f32 0.2, %v1702_v9 }
 0x73d   :  { %v1709_v26 = vsel %vm1705_vm10, %v1703_v46, %v1707_v27  ;;  %v1625_v50 = vadd.f32 %v1624_v58, %v1407_v22  ;;  %v1975_v34 = vadd.f32 %v1624_v58, %v1500_v28  ;;  %v1626_v63 = vadd.f32 %v1624_v58, %v4527_v42 }
 0x73e   :  { %v4534_v44 = vsel %vm675_vm6, %v1709_v26, -1e+30  ;;  %v1708_v31 = vsel %vm1704_vm14, %v1702_v9, %v1706_v53  ;;  %v4563_v32 = vsel %vm4945_vm1, %v1709_v26, -1e+30  ;;  %v1976_v35 = vadd.f32 %v1624_v58, %v1502_v62 }
 0x73f   :  { %v1715_v33 = vsel %vm584_vm2, %v4534_v44, -inf  ;;  %v4541_v5 = vsel %vm674_vm3, %v1708_v31, -1e+30  ;;  %vm1627_vm5 = vcmp.ge.f32.partialorder %v1625_v50, 0.0  ;;  %v1629_v57 = vmul.f32 0.2, %v1625_v50 }
 0x740   :  { %1716 = vmax.xlane.f32.xlu0 %v1715_v33  ;;  %v1712_v41 = vsel %vm584_vm2, %v4541_v5, -inf  ;;  %v4547_v45 = vsel %vm714_vm7, %v1708_v31, -1e+30  ;;  %v1979_v18 = vmul.f32 0.2, %v1975_v34  ;;  %vm1977_vm10 = vcmp.ge.f32.partialorder %v1975_v34, 0.0 }
 0x741   :  { %1713 = vmax.xlane.f32.xlu1 %v1712_v41  ;;  %v1631_v43 = vsel %vm1627_vm5, %v1625_v50, %v1629_v57  ;;  %v1630_v23 = vmul.f32 0.2, %v1626_v63  ;;  %vm1628_vm14 = vcmp.ge.f32.partialorder %v1626_v63, 0.0  ;;  %v1744_v47 = vsel %vm584_vm2, %v4547_v45, -inf }
 0x742   :  { %v4551_v38 = vsel %vm4912_vm11, %v1631_v43, -1e+30  ;;  %vm4944_vm5 = vcmp.gt.f32.partialorder %v4116_v29, 0.0  ;;  %v1981_v14 = vsel %vm1977_vm10, %v1975_v34, %v1979_v18  ;;  %v1747_v17 = vsel %vm584_vm2, %v4563_v32, -inf }
 0x743   :  { %v1635_v30 = vsel %vm584_vm2, %v4551_v38, -inf  ;;  %v4559_v3 = vsel %vm4944_vm5, %v1631_v43, -1e+30  ;;  %v1632_v37 = vsel %vm1628_vm14, %v1626_v63, %v1630_v23  ;;  %vm4946_vm11 = vcmp.gt.f32.partialorder %v4175_v12, 0.0 }
 0x744   :  { %1636 = vmax.xlane.f32.xlu0 %v1635_v30  ;;  %v1667_v40 = vsel %vm584_vm2, %v4559_v3, -inf  ;;  %v4571_v20 = vsel %vm4946_vm11, %v1981_v14, -1e+30  ;;  %v4575_v25 = vsel %vm581_vm12, %v1632_v37, -1e+30  ;;  %vm1978_vm1 = vcmp.ge.f32.partialorder %v1976_v35, 0.0 }
 0x745   :  { %1745 = vmax.xlane.f32.xlu1 %v1744_v47  ;;  %v1980_v13 = vmul.f32 0.2, %v1976_v35  ;;  %v1985_v62 = vsel %vm584_vm2, %v4571_v20, -inf  ;;  %v1638_v61 = vsel %vm584_vm2, %v4575_v25, -inf  ;;  %v4583_v15 = vsel %vm1022_vm0, %v1981_v14, -1e+30 }
 0x746   :  { %vm4947_vm11 = vcmp.gt.f32.partialorder %v4130_v36, 0.0  ;;  %v2104_v27 = vadd.f32 %v1624_v58, %v1585_v60  ;;  %v2017_v34 = vsel %vm584_vm2, %v4583_v15, -inf  ;;  %vm4948_vm10 = vcmp.gt.f32.partialorder %v4167_v1, 0.0 }
 0x747   :  { %v4588_v46 = vsel %vm4947_vm11, %v1632_v37, -1e+30  ;;  %v1982_v39 = vsel %vm1978_vm1, %v1976_v35, %v1980_v13 }
 0x748   :  { %1668 = vmax.xlane.f32.xlu0 %v1667_v40  ;;  %v1670_v31 = vsel %vm584_vm2, %v4588_v46, -inf  ;;  %vm2105_vm11 = vcmp.ge.f32.partialorder %v2104_v27, 0.0 }
 0x749   :  { %1748 = vmax.xlane.f32.xlu1 %v1747_v17 }
 0x74c   :  { %v1605_v28 = vpop.trf.xlu0  ;;  %1986 = vmax.xlane.f32.xlu0 %v1985_v62 }
 0x74d   :  { %v1866_v9 = vrot.slane %v1605_v28, %v4070_v59  ;;  %1639 = vmax.xlane.f32.xlu1 %v1638_v61  ;;  %v4597_v59 = vsel %vm4948_vm10, %v1982_v39, -1e+30  ;;  %vm4949_vm10 = vcmp.gt.f32.partialorder %v4179_v51, 0.0 }
 0x74e   :  { %v1988_v57 = vsel %vm584_vm2, %v4597_v59, -inf  ;;  %v4609_v18 = vsel %vm4949_vm10, %v1982_v39, -1e+30  ;;  %vm4952_vm10 = vcmp.gt.f32.partialorder %v4232_v4, 0.0 }
 0x74f   :  { %v1867_v53 = vadd.f32 %v1866_v9, %v1407_v22  ;;  %v1868_v26 = vadd.f32 %v1866_v9, %v4527_v42  ;;  %v2125_v50 = vadd.f32 %v1866_v9, %v1585_v60  ;;  %v2106_v60 = vmul.f32 0.2, %v2104_v27 }
 0x750   :  { %2018 = vmax.xlane.f32.xlu0 %v2017_v34  ;;  %v2020_v14 = vsel %vm584_vm2, %v4609_v18, -inf }
 0x751   :  { %1671 = vmax.xlane.f32.xlu1 %v1670_v31  ;;  %vm1869_vm14 = vcmp.ge.f32.partialorder %v1867_v53, 0.0  ;;  %v1871_v63 = vmul.f32 0.2, %v1867_v53  ;;  %vm2126_vm5 = vcmp.ge.f32.partialorder %v2125_v50, 0.0  ;;  %v2127_v58 = vmul.f32 0.2, %v2125_v50 }
 0x752   :  { %v1872_v22 = vmul.f32 0.2, %v1868_v26  ;;  %vm1870_vm1 = vcmp.ge.f32.partialorder %v1868_v26, 0.0  ;;  %v2107_v47 = vsel %vm2105_vm11, %v2104_v27, %v2106_v60  ;;  %vm4957_vm11 = vcmp.gt.f32.partialorder %v4175_v12, 0.0 }
 0x753   :  { %v1873_v33 = vsel %vm1869_vm14, %v1867_v53, %v1871_v63  ;;  %v2128_v42 = vsel %vm2126_vm5, %v2125_v50, %v2127_v58  ;;  %vm4950_vm14 = vcmp.gt.f32.partialorder %v4216_v56, 0.0  ;;  %vm4951_vm5 = vcmp.gt.f32.partialorder %v4171_v10, 0.0 }
 0x754   :  { %v4603_v41 = vsel %vm855_vm9, %v1873_v33, -1e+30  ;;  %v4613_v23 = vsel %vm4950_vm14, %v2128_v42, -1e+30  ;;  %v1874_v30 = vsel %vm1870_vm1, %v1868_v26, %v1872_v22  ;;  %v4625_v40 = vsel %vm4952_vm10, %v2107_v47, -1e+30 }
 0x755   :  { %1989 = vmax.xlane.f32.xlu1 %v1988_v57  ;;  %v1877_v43 = vsel %vm859_vm13, %v4603_v41, -inf  ;;  %v2130_v35 = vsel %vm859_vm13, %v4613_v23, -inf  ;;  %v4621_v37 = vsel %vm4951_vm5, %v1874_v30, -1e+30  ;;  %v2109_v13 = vsel %vm584_vm2, %v4625_v40, -inf }
 0x756   :  { %1878 = vmax.xlane.f32.xlu0 %v1877_v43  ;;  %v1880_v17 = vsel %vm859_vm13, %v4621_v37, -inf  ;;  %vm4953_vm1 = vcmp.gt.f32.partialorder %v4214_v55, 0.0  ;;  %vm4959_vm14 = vcmp.gt.f32.partialorder %v4167_v1, 0.0  ;;  %vm4961_vm5 = vcmp.gt.f32.partialorder %v4216_v56, 0.0 }
 0x757   :  { %v4633_v62 = vsel %vm4953_vm1, %v2128_v42, -1e+30 }
 0x758   :  { %v2146_v28 = vsel %vm859_vm13, %v4633_v62, -inf }
 0x759   :  { %2021 = vmax.xlane.f32.xlu1 %v2020_v14 }
 0x75a   :  { %2131 = vmax.xlane.f32.xlu0 %v2130_v35 }
 0x75d   :  { %1881 = vmax.xlane.f32.xlu1 %v1880_v17 }
 0x75e   :  { %2110 = vmax.xlane.f32.xlu0 %v2109_v13 }
 0x761   :  { %2147 = vmax.xlane.f32.xlu1 %v2146_v28 }
 0x7cd   :  { %v1717_v61 = vpop.xlane.xlu0 %1716 }
 0x7ce   :  { %v1719_v9 = vsub.f32 %v4534_v44, %v1717_v61  ;;  %v1714_v39 = vpop.xlane.xlu1 %1713 }
 0x7cf   :  { %v1718_v27 = vsub.f32 %v4541_v5, %v1714_v39 }
 0x7d0   :  { %v1722_v53 = vmul.f32 1.442695, %v1719_v9 }
 0x7d1   :  { %v1720_v26 = vmul.f32 1.442695, %v1718_v27  ;;  %v1637_v50 = vpop.xlane.xlu0 %1636 }
 0x7d2   :  { %3357 = vpow2.f32 %v1722_v53  ;;  %v1641_v34 = vsub.f32 %v4551_v38, %v1637_v50  ;;  %v1746_v31 = vpop.xlane.xlu1 %1745 }
 0x7d3   :  { %3359 = vpow2.f32 %v1720_v26  ;;  %v1750_v63 = vsub.f32 %v4547_v45, %v1746_v31 }
 0x7d4   :  { %v1643_v58 = vmul.f32 1.442695, %v1641_v34 }
 0x7d5   :  { %v1752_v22 = vmul.f32 1.442695, %v1750_v63  ;;  %v1669_v33 = vpop.xlane.xlu0 %1668 }
 0x7d6   :  { %3361 = vpow2.f32 %v1643_v58  ;;  %v1673_v42 = vsub.f32 %v4559_v3, %v1669_v33  ;;  %v1749_v44 = vpop.xlane.xlu1 %1748 }
 0x7d7   :  { %3363 = vpow2.f32 %v1752_v22  ;;  %v1751_v5 = vsub.f32 %v4563_v32, %v1749_v44 }
 0x7d8   :  { %v1675_v60 = vmul.f32 1.442695, %v1673_v42 }
 0x7d9   :  { %v1754_v57 = vmul.f32 1.442695, %v1751_v5  ;;  %v1987_v43 = vpop.xlane.xlu0 %1986 }
 0x7da   :  { %3365 = vpow2.f32 %v1675_v60  ;;  %v1991_v38 = vsub.f32 %v4571_v20, %v1987_v43  ;;  %v1640_v30 = vpop.xlane.xlu1 %1639 }
 0x7db   :  { %3367 = vpow2.f32 %v1754_v57  ;;  %v1642_v45 = vsub.f32 %v4575_v25, %v1640_v30 }
 0x7dc   :  { %v3358_v47 = vpop.eup %3357  ;;  %v1993_v14 = vmul.f32 1.442695, %v1991_v38 }
 0x7dd   :  { %v3360_v35 = vpop.eup %3359  ;;  %v1645_v17 = vmul.f32 1.442695, %v1642_v45  ;;  %v2019_v13 = vpop.xlane.xlu0 %2018  ;;  %v4647_v3 = vsel %vm675_vm6, %v3358_v47, 0.0  ;;  %vm4955_vm6 = vcmp.gt.f32.partialorder %v4087_v8, 0.0 }
 0x7de   :  { %3369 = vpow2.f32 %v1993_v14  ;;  %v2023_v32 = vsub.f32 %v4583_v15, %v2019_v13  ;;  %v1672_v28 = vpop.xlane.xlu1 %1671  ;;  %v1729_v20 = vsel %vm584_vm2, %v4647_v3, 0.0  ;;  %v4654_v61 = vsel %vm674_vm3, %v3360_v35, 0.0 }
 0x7df   :  { %3371 = vpow2.f32 %v1645_v17  ;;  %v1674_v25 = vsub.f32 %v4588_v46, %v1672_v28  ;;  %1730 = vadd.xlane.f32.xlu0 %v1729_v20  ;;  %v1726_v6 = vsel %vm584_vm2, %v4654_v61, 0.0  ;;  %vm4954_vm3 = vcmp.gt.f32.partialorder %v4102_v21, 0.0 }
 0x7e0   :  { %v3362_v9 = vpop.eup %3361  ;;  %v2025_v39 = vmul.f32 1.442695, %v2023_v32  ;;  %1727 = vadd.xlane.f32.xlu1 %v1726_v6 }
 0x7e1   :  { %v3364_v27 = vpop.eup %3363  ;;  %v1677_v15 = vmul.f32 1.442695, %v1674_v25  ;;  %v4669_v63 = vsel %vm4954_vm3, %v3362_v9, 0.0 }
 0x7e2   :  { %3373 = vpow2.f32 %v2025_v39  ;;  %v1990_v53 = vpop.xlane.xlu1 %1989  ;;  %v4661_v26 = vsel %vm714_vm7, %v3364_v27, 0.0  ;;  %vm4956_vm7 = vcmp.gt.f32.partialorder %v4116_v29, 0.0 }
 0x7e3   :  { %3375 = vpow2.f32 %v1677_v15  ;;  %v1992_v2 = vsub.f32 %v4597_v59, %v1990_v53  ;;  %v1879_v50 = vpop.xlane.xlu0 %1878  ;;  %v1758_v46 = vsel %vm584_vm2, %v4661_v26, 0.0 }
 0x7e4   :  { %v3366_v34 = vpop.eup %3365  ;;  %v1883_v31 = vsub.f32 %v4603_v41, %v1879_v50  ;;  %1759 = vadd.xlane.f32.xlu1 %v1758_v46  ;;  %v1649_v41 = vsel %vm584_vm2, %v4669_v63, 0.0 }
 0x7e5   :  { %v3368_v58 = vpop.eup %3367  ;;  %v1995_v22 = vmul.f32 1.442695, %v1992_v2  ;;  %v4683_v8 = vsel %vm4956_vm7, %v3366_v34, 0.0 }
 0x7e6   :  { %v1885_v7 = vmul.f32 1.442695, %v1883_v31  ;;  %v2022_v33 = vpop.xlane.xlu1 %2021  ;;  %v4673_v42 = vsel %vm4955_vm6, %v3368_v58, 0.0 }
 0x7e7   :  { %3377 = vpow2.f32 %v1995_v22  ;;  %v2024_v59 = vsub.f32 %v4609_v18, %v2022_v33  ;;  %v2132_v44 = vpop.xlane.xlu0 %2131  ;;  %v1761_v21 = vsel %vm584_vm2, %v4673_v42, 0.0 }
 0x7e8   :  { %v3370_v5 = vpop.eup %3369  ;;  %3379 = vpow2.f32 %v1885_v7  ;;  %v2133_v60 = vsub.f32 %v4613_v23, %v2132_v44  ;;  %1650 = vadd.xlane.f32.xlu1 %v1649_v41  ;;  %1762 = vadd.xlane.f32.xlu0 %v1761_v21  ;;  %v1681_v23 = vsel %vm584_vm2, %v4683_v8, 0.0 }
 0x7e9   :  { %v3372_v57 = vpop.eup %3371  ;;  %v2027_v43 = vmul.f32 1.442695, %v2024_v59  ;;  %v4697_v24 = vsel %vm4957_vm11, %v3370_v5, 0.0 }
 0x7ea   :  { %v2134_v18 = vmul.f32 1.442695, %v2133_v60  ;;  %v1882_v38 = vpop.xlane.xlu1 %1881  ;;  %v4687_v30 = vsel %vm581_vm12, %v3372_v57, 0.0  ;;  %vm4958_vm12 = vcmp.gt.f32.partialorder %v4130_v36, 0.0 }
 0x7eb   :  { %3381 = vpow2.f32 %v2027_v43  ;;  %v1884_v45 = vsub.f32 %v4621_v37, %v1882_v38  ;;  %v2111_v47 = vpop.xlane.xlu0 %2110  ;;  %v1652_v29 = vsel %vm584_vm2, %v4687_v30, 0.0 }
 0x7ec   :  { %v3374_v14 = vpop.eup %3373  ;;  %3383 = vpow2.f32 %v2134_v18  ;;  %v2112_v35 = vsub.f32 %v4625_v40, %v2111_v47  ;;  %1682 = vadd.xlane.f32.xlu1 %v1681_v23  ;;  %1653 = vadd.xlane.f32.xlu0 %v1652_v29  ;;  %v1999_v40 = vsel %vm584_vm2, %v4697_v24, 0.0 }
 0x7ed   :  { %v3376_v17 = vpop.eup %3375  ;;  %v1887_v13 = vmul.f32 1.442695, %v1884_v45  ;;  %v4710_v12 = vsel %vm1022_vm0, %v3374_v14, 0.0  ;;  %vm4960_vm0 = vcmp.gt.f32.partialorder %v4179_v51, 0.0 }
 0x7ee   :  { %v2113_v37 = vmul.f32 1.442695, %v2112_v35  ;;  %v2148_v32 = vpop.xlane.xlu1 %2147  ;;  %v4701_v28 = vsel %vm4958_vm12, %v3376_v17, 0.0 }
 0x7ef   :  { %3385 = vpow2.f32 %v1887_v13  ;;  %v2149_v20 = vsub.f32 %v4633_v62, %v2148_v32  ;;  %v1684_v25 = vsel %vm584_vm2, %v4701_v28, 0.0  ;;  %v2031_v62 = vsel %vm584_vm2, %v4710_v12, 0.0 }
 0x7f0   :  { %3387 = vpow2.f32 %v2113_v37  ;;  %2000 = vadd.xlane.f32.xlu1 %v1999_v40  ;;  %1685 = vadd.xlane.f32.xlu0 %v1684_v25 }
 0x7f1   :  { %v3378_v6 = vpop.eup %3377  ;;  %v2150_v36 = vmul.f32 1.442695, %v2149_v20 }
 0x7f2   :  { %v3380_v9 = vpop.eup %3379  ;;  %v4714_v39 = vsel %vm4959_vm14, %v3378_v6, 0.0 }
 0x7f3   :  { %3389 = vpow2.f32 %v2150_v36  ;;  %v2002_v27 = vsel %vm584_vm2, %v4714_v39, 0.0  ;;  %v4722_v16 = vsel %vm855_vm9, %v3380_v9, 0.0  ;;  %vm4962_vm9 = vcmp.gt.f32.partialorder %v4171_v10, 0.0 }
 0x7f4   :  { %2032 = vadd.xlane.f32.xlu1 %v2031_v62  ;;  %2003 = vadd.xlane.f32.xlu0 %v2002_v27  ;;  %v1891_v2 = vsel %vm859_vm13, %v4722_v16, 0.0 }
 0x7f5   :  { %v3382_v15 = vpop.eup %3381 }
 0x7f6   :  { %v3384_v53 = vpop.eup %3383  ;;  %v4726_v1 = vsel %vm4960_vm0, %v3382_v15, 0.0 }
 0x7f7   :  { %v2034_v50 = vsel %vm584_vm2, %v4726_v1, 0.0  ;;  %v4734_v46 = vsel %vm4961_vm5, %v3384_v53, 0.0 }
 0x7f8   :  { %1892 = vadd.xlane.f32.xlu1 %v1891_v2  ;;  %2035 = vadd.xlane.f32.xlu0 %v2034_v50  ;;  %v2137_v51 = vsel %vm859_vm13, %v4734_v46, 0.0 }
 0x7f9   :  { %v3386_v11 = vpop.eup %3385 }
 0x7fa   :  { %v3388_v34 = vpop.eup %3387  ;;  %v4738_v31 = vsel %vm4962_vm9, %v3386_v11, 0.0 }
 0x7fb   :  { %v1894_v58 = vsel %vm859_vm13, %v4738_v31, 0.0  ;;  %v4746_v22 = vsel %vm4952_vm10, %v3388_v34, 0.0 }
 0x7fc   :  { %2138 = vadd.xlane.f32.xlu1 %v2137_v51  ;;  %1895 = vadd.xlane.f32.xlu0 %v1894_v58  ;;  %v2116_v10 = vsel %vm584_vm2, %v4746_v22, 0.0 }
 0x7fd   :  { %v3390_v56 = vpop.eup %3389 }
 0x7fe   :  { %v4750_v7 = vsel %vm4953_vm1, %v3390_v56, 0.0 }
 0x7ff   :  { %v2153_v33 = vsel %vm859_vm13, %v4750_v7, 0.0 }
 0x800   :  { %2117 = vadd.xlane.f32.xlu1 %v2116_v10  ;;  %2154 = vadd.xlane.f32.xlu0 %v2153_v33 }
 0x86c   :  { %v1731_v59 = vpop.xlane.xlu0 %1730 }
 0x86d   :  { %v1728_v44 = vpop.xlane.xlu1 %1727  ;;  %vm1733_vm3 = vcmp.gt.f32.partialorder %v1731_v59, 0.0 }
 0x86e   :  { %vm1732_vm6 = vcmp.gt.f32.partialorder %v1728_v44, 0.0  ;;  %v1735_v41 = vsel %vm1733_vm3, %v1731_v59, 1.0 }
 0x86f   :  { %v1734_v21 = vsel %vm1732_vm6, %v1728_v44, 1.0 }
 0x871   :  { %v1760_v4 = vpop.xlane.xlu1 %1759 }
 0x872   :  { %vm1764_vm7 = vcmp.gt.f32.partialorder %v1760_v4, 0.0 }
 0x873   :  { %v1766_v5 = vsel %vm1764_vm7, %v1760_v4, 1.0 }
 0x874   :  { %3391 = vrcp.f32 %v1766_v5 }
 0x875   :  { %3393 = vrcp.f32 %v1735_v41  ;;  %v1763_v55 = vpop.xlane.xlu0 %1762  ;;  %v1651_v60 = vpop.xlane.xlu1 %1650 }
 0x876   :  { %3395 = vrcp.f32 %v1734_v21  ;;  %vm1765_vm11 = vcmp.gt.f32.partialorder %v1763_v55, 0.0  ;;  %vm1655_vm0 = vcmp.gt.f32.partialorder %v1651_v60, 0.0 }
 0x877   :  { %v1767_v57 = vsel %vm1765_vm11, %v1763_v55, 1.0  ;;  %v1657_v35 = vsel %vm1655_vm0, %v1651_v60, 1.0 }
 0x878   :  { %3397 = vrcp.f32 %v1767_v57  ;;  %v1582_v57 = vpack.c.bf16 %v4523_v48, %v4523_v48 }
 0x879   :  { %v1654_v43 = vpop.xlane.xlu0 %1653  ;;  %v1683_v18 = vpop.xlane.xlu1 %1682 }
 0x87a   :  { %vm1656_vm12 = vcmp.gt.f32.partialorder %v1654_v43, 0.0  ;;  %vm1687_vm14 = vcmp.gt.f32.partialorder %v1683_v18, 0.0 }
 0x87b   :  { %v1658_v38 = vsel %vm1656_vm12, %v1654_v43, 1.0  ;;  %v1689_v45 = vsel %vm1687_vm14, %v1683_v18, 1.0  ;;  %vm4963_vm14 = vcmask 1043456  }
 0x87c   :  { %3399 = vrcp.f32 %v1658_v38 }
 0x87d   :  { %v1686_v47 = vpop.xlane.xlu0 %1685  ;;  %v2001_v23 = vpop.xlane.xlu1 %2000  ;;  %3401 = vrcp.f32 %v1689_v45 }
 0x87e   :  { %v3392_v29 = vpop.eup %3391  ;;  %vm1688_vm5 = vcmp.gt.f32.partialorder %v1686_v47, 0.0  ;;  %vm2005_vm9 = vcmp.gt.f32.partialorder %v2001_v23, 0.0 }
 0x87f   :  { %v3394_v14 = vpop.eup %3393  ;;  %v1690_v17 = vsel %vm1688_vm5, %v1686_v47, 1.0  ;;  %v1770_v37 = vmul.f32 %v3392_v29, %v4661_v26  ;;  %v2007_v32 = vsel %vm2005_vm9, %v2001_v23, 1.0  ;;  %v1912_v23 = vsel %vm4963_vm14, %v1582_v57, 0 }
 0x880   :  { %v3396_v13 = vpop.eup %3395  ;;  %3403 = vrcp.f32 %v1690_v17  ;;  %v1739_v6 = vmul.f32 %v3394_v14, %v4647_v3 }
 0x881   :  { %v2004_v20 = vpop.xlane.xlu0 %2003  ;;  %v2033_v40 = vpop.xlane.xlu1 %2032  ;;  %3405 = vrcp.f32 %v1657_v35  ;;  %v1738_v36 = vmul.f32 %v3396_v13, %v4654_v61 }
 0x882   :  { %v3398_v25 = vpop.eup %3397  ;;  %vm2006_vm10 = vcmp.gt.f32.partialorder %v2004_v20, 0.0  ;;  %vm2037_vm1 = vcmp.gt.f32.partialorder %v2033_v40, 0.0  ;;  %3407 = vrcp.f32 %v2007_v32 }
 0x883   :  { %v1771_v9 = vmul.f32 %v3398_v25, %v4673_v42  ;;  %v2008_v62 = vsel %vm2006_vm10, %v2004_v20, 1.0  ;;  %v2039_v27 = vsel %vm2037_vm1, %v2033_v40, 1.0  ;;  %v1772_v26 = vadd.f32 %v1770_v37, %v1738_v36  ;;  %v2477_v36 = vld [vmem:[#allocation17] sm:$0xff] }
 0x884   :  { %3409 = vrcp.f32 %v2039_v27  ;;  %v2480_v27 = vld [vmem:[#allocation17 + $0x18] sm:$0xff] }
 0x885   :  { %v2036_v15 = vpop.xlane.xlu0 %2035  ;;  %v1893_v53 = vpop.xlane.xlu1 %1892  ;;  %v1773_v2 = vadd.f32 %v1771_v9, %v1739_v6  ;;  %3411 = vrcp.f32 %v2008_v62  ;;  %v3723_v6 = vmov 0.0|0.0   ;;  %v2478_v9 = vld [vmem:[#allocation17 + $0x8] sm:$0xff] }
 0x886   :  { %vm2038_vm3 = vcmp.gt.f32.partialorder %v2036_v15, 0.0  ;;  %v3400_v3 = vpop.eup %3399  ;;  %vm1897_vm6 = vcmp.gt.f32.partialorder %v1893_v53, 0.0  ;;  %3167 = vmatprep.subr.bf16.mxu1 %v3723_v6  ;;  %v3176_v62 = vpack.c.bf16 %v2478_v9, %v2477_v36  ;;  %v2570_v9 = vld [vmem:[#allocation19] sm:$0xff] }
 0x887   :  { %v2040_v50 = vsel %vm2038_vm3, %v2036_v15, 1.0  ;;  %v1774_v11 = vpack.c.bf16 %v1773_v2, %v1772_v26  ;;  %v3402_v34 = vpop.eup %3401  ;;  %v1662_v33 = vmul.f32 %v3400_v3, %v4687_v30  ;;  %v1899_v44 = vsel %vm1897_vm6, %v1893_v53, 1.0  ;;  %v2482_v53 = vld [vmem:[#allocation17 + $0x28] sm:$0xff]  ;;  %v2483_v2 = vld [vmem:[#allocation17 + $0x30] sm:$0xff]  ;;  %v2485_v3 = vld [vmem:[#allocation17 + $0x40] sm:$0xff] }
 0x888   :  { %3413 = vrcp.f32 %v2040_v50  ;;  %v1693_v59 = vmul.f32 %v3402_v34, %v4683_v8  ;;  %v2484_v50 = vld [vmem:[#allocation17 + $0x38] sm:$0xff]  ;;  %v2486_v34 = vld [vmem:[#allocation17 + $0x48] sm:$0xff] }
 0x889   :  { %v1896_v51 = vpop.xlane.xlu0 %1895  ;;  %3045 = vmatmul.mubr.msk.bf16.vlgmr.msra.gmra.mrb[16].mxu0 %vm584_vm2, %v1774_v11  ;;  %v2139_v56 = vpop.xlane.xlu1 %2138  ;;  %v3185_v11 = vpack.c.bf16 %v2484_v50, %v2483_v2  ;;  %v2576_v2 = vld [vmem:[#allocation19 + $0x30] sm:$0xff]  ;;  %v2577_v50 = vld [vmem:[#allocation19 + $0x38] sm:$0xff] }
 0x88a   :  { %v3404_v61 = vpop.eup %3403  ;;  %vm1898_vm7 = vcmp.gt.f32.partialorder %v1896_v51, 0.0  ;;  %3049 = vmatpush3.bf16.msra.mxu0 %v4513_v19  ;;  %3050 = vmatprep.mubr.msk.bf16.mxu0 %vm4939_vm15, %v3720_v0  ;;  %vm2140_vm11 = vcmp.gt.f32.partialorder %v2139_v56, 0.0 }
 0x88b   :  { %v1694_v42 = vmul.f32 %v3404_v61, %v4701_v28  ;;  %v1900_v58 = vsel %vm1898_vm7, %v1896_v51, 1.0  ;;  %3054 = vmatprep.subr.bf16.mxu0 %v3720_v0  ;;  %v3406_v10 = vpop.eup %3405  ;;  %v2141_v43 = vsel %vm2140_vm11, %v2139_v56, 1.0  ;;  %v3188_v51 = vpack.c.bf16 %v2486_v34, %v2485_v3  ;;  %v2487_v61 = vld [vmem:[#allocation17 + $0x50] sm:$0xff]  ;;  %v2489_v56 = vld [vmem:[#allocation17 + $0x60] sm:$0xff]  ;;  %v2579_v3 = vld [vmem:[#allocation19 + $0x48] sm:$0xff] }
 0x88c   :  { %v3408_v41 = vpop.eup %3407  ;;  %3415 = vrcp.f32 %v1900_v58  ;;  %v1661_v5 = vmul.f32 %v3406_v10, %v4669_v63  ;;  %v2490_v10 = vld [vmem:[#allocation17 + $0x68] sm:$0xff] }
 0x88d   :  { %v2155_v4 = vpop.xlane.xlu0 %2154  ;;  %v1696_v28 = vadd.f32 %v1694_v42, %v1662_v33  ;;  %3417 = vrcp.f32 %v1899_v44  ;;  %v2011_v38 = vmul.f32 %v3408_v41, %v4697_v24  ;;  %v2118_v14 = vpop.xlane.xlu1 %2117  ;;  %v2488_v42 = vld [vmem:[#allocation17 + $0x58] sm:$0xff]  ;;  %v3194_v33 = vpack.c.bf16 %v2490_v10, %v2489_v56  ;;  %v2726_v41 = vld [vmem:[%s4879_s16 + $0x1] ss:$0 sm:$0xff] }
 0x88e   :  { %vm2156_vm12 = vcmp.gt.f32.partialorder %v2155_v4, 0.0  ;;  %v3410_v21 = vpop.eup %3409  ;;  %v1695_v8 = vadd.f32 %v1693_v59, %v1661_v5  ;;  %vm2119_vm0 = vcmp.gt.f32.partialorder %v2118_v14, 0.0  ;;  %v3191_v58 = vpack.c.bf16 %v2488_v42, %v2487_v61  ;;  %v2491_v59 = vld [vmem:[#allocation17 + $0x70] sm:$0xff]  ;;  %v2492_v44 = vld [vmem:[#allocation17 + $0x78] sm:$0xff]  ;;  %v2583_v56 = vld [vmem:[#allocation19 + $0x68] sm:$0xff] }
 0x88f   :  { %v2157_v55 = vsel %vm2156_vm12, %v2155_v4, 1.0  ;;  %v3412_v60 = vpop.eup %3411  ;;  %v2043_v30 = vmul.f32 %v3410_v21, %v4710_v12  ;;  %v2120_v32 = vsel %vm2119_vm0, %v2118_v14, 1.0  ;;  %v3197_v4 = vpack.c.bf16 %v2492_v44, %v2491_v59  ;;  %v2581_v61 = vld [vmem:[#allocation19 + $0x58] sm:$0xff]  ;;  %v2584_v44 = vld [vmem:[#allocation19 + $0x70] sm:$0xff] }
 0x890   :  { %3419 = vrcp.f32 %v2157_v55  ;;  %v2012_v45 = vmul.f32 %v3412_v60, %v4714_v39  ;;  %v1697_v63 = vpack.c.bf16 %v1696_v28, %v1695_v8 }
 0x891   :  { %3421 = vrcp.f32 %v2141_v43  ;;  %v2045_v29 = vadd.f32 %v2043_v30, %v2011_v38 }
 0x892   :  { %v3414_v18 = vpop.eup %3413  ;;  %3423 = vrcp.f32 %v2120_v32  ;;  %v2254_v32 = vld [vmem:[%s4880_s17] sm:$0xff] }
 0x893   :  { %v2044_v47 = vmul.f32 %v3414_v18, %v4726_v1 }
 0x895   :  { %3051 = vmatmul.mubr.msk.bf16.vlgmr.msra.gmra.mrb[16].mxu0 %vm584_vm2, %v1697_v63  ;;  %v2046_v48 = vadd.f32 %v2044_v47, %v2012_v45 }
 0x896   :  { %3055 = vmatpush3.bf16.msra.mxu0 %v1912_v23  ;;  %3056 = vmatprep.mubr.msk.bf16.mxu0 %vm4939_vm15, %v3720_v0  ;;  %v3416_v24 = vpop.eup %3415 }
 0x897   :  { %v2047_v12 = vpack.c.bf16 %v2046_v48, %v2045_v29  ;;  %3066 = vmatprep.subr.bf16.mxu0 %v3720_v0  ;;  %v3418_v39 = vpop.eup %3417  ;;  %v1904_v1 = vmul.f32 %v3416_v24, %v4738_v31 }
 0x898   :  { %v1903_v17 = vmul.f32 %v3418_v39, %v4722_v16  ;;  %v2255_v39 = vld [vmem:[%s4881_s18] sm:$0xff] }
 0x899   :  { %3063 = vmatmul.mubr.msk.bf16.vlgmr.msra.gmra.mrb[20].mxu1 %vm584_vm2, %v2047_v12 }
 0x89a   :  { %3082 = vmatprep.mubr.msk.f32.mxu1 %vm4939_vm15, %v3720_v0  ;;  %v3420_v35 = vpop.eup %3419  ;;  %v1907_v20 = vpack.c.bf16 %v1904_v1, %v1903_v17 }
 0x89b   :  { %v3422_v13 = vpop.eup %3421  ;;  %v2159_v37 = vmul.f32 %v3420_v35, %v4750_v7 }
 0x89c   :  { %v2143_v40 = vmul.f32 %v3422_v13, %v4734_v46  ;;  %v3424_v16 = vpop.eup %3423 }
 0x89d   :  { %v2122_v46 = vmul.f32 %v3424_v16, %v4746_v22  ;;  %v2481_v22 = vld [vmem:[#allocation17 + $0x20] sm:$0xff] }
 0x89e   :  { %v2160_v31 = vadd.f32 %v2159_v37, %v2143_v40  ;;  %v3182_v26 = vpack.c.bf16 %v2482_v53, %v2481_v22  ;;  %v2574_v53 = vld [vmem:[#allocation19 + $0x20] sm:$0xff] }
 0x89f   :  { %v2124_v7 = vpack.c.bf16 %v2122_v46, %v2122_v46 }
 0x8a0   :  { %v2161_v25 = vpack.c.bf16 %v2160_v31, %v2160_v31 }
 0x8a1   :  { %3057 = vmatmul.mubr.msk.bf16.vlgmr.msra.gmra.mrb[16].mxu0 %vm859_vm13, %v1907_v20 }
 0x8a2   :  { %3067 = vmatpush3.bf16.msra.mxu0 %v1912_v23  ;;  %3068 = vmatprep.mubr.msk.bf16.mxu0 %vm4939_vm15, %v3720_v0 }
 0x8a3   :  { %3072 = vmatprep.subr.bf16.mxu0 %v3720_v0 }
 0x8a9   :  { %3069 = vmatmul.mubr.msk.bf16.vlgmr.msra.gmra.mrb[20].mxu0 %vm859_vm13, %v2161_v25 }
 0x8aa   :  { %3073 = vmatpush3.bf16.msra.mxu0 %v4513_v19  ;;  %3074 = vmatprep.mubr.msk.bf16.mxu0 %vm4939_vm15, %v3720_v0  ;;  %v2479_v19 = vld [vmem:[#allocation17 + $0x10] sm:$0xff] }
 0x8ab   :  { %3175 = vmatprep.subr.bf16.mxu0 %v3723_v6  ;;  %v3179_v15 = vpack.c.bf16 %v2480_v27, %v2479_v19  ;;  %v2571_v19 = vld [vmem:[#allocation19 + $0x8] sm:$0xff] }
 0x8ac   :  { %v3200_v27 = vpack.c.bf16 %v2571_v19, %v2570_v9 }
 0x8b5   :  { %3075 = vmatmul.mubr.msk.bf16.vlgmr.msra.gmra.mrb[20].mxu0 %vm584_vm2, %v2124_v7  ;;  %v2402_v7 = vld [vmem:[%s4882_s19] sm:$0xff] }
 0x8b6   :  { %3129 = vmatprep.mubr.msk.f32.mxu0 %vm4939_vm15, %v3720_v0  ;;  %3177 = vmatpush3.bf16.msra.mxu0 %v3176_v62  ;;  %v2572_v62 = vld [vmem:[#allocation19 + $0x10] sm:$0xff] }
 0x8b7   :  { %3178 = vmatprep.subr.bf16.mxu0 %v3723_v6 }
 0x8ba   :  { %3180 = vmatpush3.bf16.msra.mxu0 %v3179_v15  ;;  %v2573_v15 = vld [vmem:[#allocation19 + $0x18] sm:$0xff] }
 0x8bb   :  { %3181 = vmatprep.subr.bf16.mxu0 %v3723_v6  ;;  %v3203_v22 = vpack.c.bf16 %v2573_v15, %v2572_v62 }
 0x8be   :  { %3183 = vmatpush3.bf16.msra.mxu0 %v3182_v26  ;;  %v2575_v26 = vld [vmem:[#allocation19 + $0x28] sm:$0xff] }
 0x8bf   :  { %3184 = vmatprep.subr.bf16.mxu0 %v3723_v6 }
 0x8c2   :  { %3186 = vmatpush3.bf16.msra.mxu0 %v3185_v11  ;;  %v3209_v11 = vpack.c.bf16 %v2577_v50, %v2576_v2 }
 0x8c3   :  { %3187 = vmatprep.subr.bf16.mxu0 %v3723_v6 }
 0x8c6   :  { %3189 = vmatpush3.bf16.msra.mxu0 %v3188_v51  ;;  %v2580_v51 = vld [vmem:[#allocation19 + $0x50] sm:$0xff] }
 0x8c7   :  { %3190 = vmatprep.subr.bf16.mxu0 %v3723_v6  ;;  %v3215_v42 = vpack.c.bf16 %v2581_v61, %v2580_v51 }
 0x8ca   :  { %3192 = vmatpush3.bf16.msra.mxu0 %v3191_v58  ;;  %v2582_v58 = vld [vmem:[#allocation19 + $0x60] sm:$0xff] }
 0x8cb   :  { %3193 = vmatprep.subr.bf16.mxu0 %v3723_v6  ;;  %v3218_v10 = vpack.c.bf16 %v2583_v56, %v2582_v58 }
 0x8ce   :  { %3195 = vmatpush3.bf16.msra.mxu0 %v3194_v33 }
 0x8cf   :  { %3196 = vmatprep.subr.bf16.mxu0 %v3723_v6 }
 0x8d2   :  { %3198 = vmatpush3.bf16.msra.mxu0 %v3197_v4  ;;  %v2585_v4 = vld [vmem:[#allocation19 + $0x78] sm:$0xff] }
 0x96c   :  { %v2085_v21 = vpop.f32.mrb[20].mxu1 }
 0x96d   :  { %v2092_v5 = vmul.f32 0.5, %v2085_v21  ;;  %v3064_v55 = vpop.f32.mrb[21].mxu1  ;;  %v2736_v21 = vld [vmem:[%s4965_s8] ss:$0 sm:$0xff] }
 0x96e   :  { %v2088_v28 = vpop.f32.mrb[22].mxu1 }
 0x96f   :  { %v2094_v60 = vadd.f32 %v2726_v41, %v2092_v5  ;;  %v2093_v57 = vmul.f32 0.5, %v2088_v28  ;;  %v3065_v30 = vpop.f32.mrb[23].mxu1 }
 0x971   :  { %v2098_v43 = vmul.f32 0.01, %v2094_v60  ;;  %v2095_v8 = vadd.f32 %v2726_v41, %v2093_v57  ;;  %vm2096_vm5 = vcmp.ge.f32.partialorder %v2094_v60, 0.0 }
 0x973   :  { %vm2097_vm9 = vcmp.ge.f32.partialorder %v2095_v8, 0.0  ;;  %v2099_v18 = vmul.f32 0.01, %v2095_v8  ;;  %v2100_v45 = vsel %vm2096_vm5, %v2094_v60, %v2098_v43  ;;  %v2737_v60 = vld [vmem:[%s4966_s3] ss:$0 sm:$0xff] }
 0x974   :  { %v1948_v38 = vpop.f32.mrb[16].mxu0 }
 0x975   :  { %v2101_v47 = vsel %vm2097_vm9, %v2095_v8, %v2099_v18  ;;  %v1957_v63 = vmul.f32 0.2, %v1948_v38  ;;  %v3058_v23 = vpop.f32.mrb[17].mxu0 }
 0x976   :  { %v3168_v29 = vpack.c.bf16 %v2101_v47, %v2100_v45  ;;  %v1951_v48 = vpop.f32.mrb[18].mxu0 }
 0x977   :  { %v1965_v12 = vadd.f32 %v2726_v41, %v1957_v63  ;;  %v1958_v24 = vmul.f32 0.2, %v1951_v48  ;;  %v3059_v14 = vpop.f32.mrb[19].mxu0 }
 0x978   :  { %3170 = vmatpush3.bf16.msk.msra.mxu1 %vm4487_vm4, %v3168_v29 }
 0x979   :  { %v1969_v1 = vmul.f32 0.01, %v1965_v12  ;;  %v1966_v35 = vadd.f32 %v2726_v41, %v1958_v24  ;;  %3171 = vmatprep.subr.bf16.mxu1 %v3723_v6  ;;  %vm1967_vm10 = vcmp.ge.f32.partialorder %v1965_v12, 0.0 }
 0x97b   :  { %vm1968_vm1 = vcmp.ge.f32.partialorder %v1966_v35, 0.0  ;;  %v1970_v17 = vmul.f32 0.01, %v1966_v35  ;;  %3083 = vmatmul.mubr.msk.f32.vlgmr.msra.gmra.mrb[24].mxu1 %vm584_vm2, %v2255_v39  ;;  %v1971_v13 = vsel %vm1967_vm10, %v1965_v12, %v1969_v1 }
 0x97c   :  { %3089 = vmatprep.mubr.msk.f32.mxu1 %vm4939_vm15, %v3720_v0 }
 0x97d   :  { %v1972_v37 = vsel %vm1968_vm1, %v1966_v35, %v1970_v17 }
 0x97e   :  { %v3172_v52 = vpack.c.bf16 %v1972_v37, %v1971_v13 }
 0x980   :  { %3174 = vmatpush3.bf16.msk.msra.mxu1 %vm4474_vm8, %v3172_v52  ;;  %vm4964_vm8 = vcmp.lt.s32.totalorder %v4065_v54, 6  ;;  %v3206_v54 = vpack.c.bf16 %v2575_v26, %v2574_v53 }
 0x981   :  { %3092 = vmatprep.subr.mxu1 %v3720_v0 }
 0x983   :  { %3090 = vmatmul.mubr.msk.f32.vlgmr.msra.gmra.mrb[24].mxu1 %vm584_vm2, %v2254_v32 }
 0x984   :  { %3094 = vmatprep.mubr.msk.f32.mxu1 %vm4939_vm15, %v3720_v0 }
 0x988   :  { %v2242_v20 = vpop.f32.mrb[20].mxu0 }
 0x989   :  { %v2248_v40 = vmul.f32 0.33333334, %v2242_v20  ;;  %v3076_v31 = vpop.f32.mrb[21].mxu0 }
 0x98a   :  { %v2245_v25 = vpop.f32.mrb[22].mxu0 }
 0x98b   :  { %v2249_v16 = vadd.f32 %v2726_v41, %v2248_v40  ;;  %v3077_v46 = vpop.f32.mrb[23].mxu0  ;;  %v3221_v41 = vpack.c.bf16 %v2585_v4, %v2584_v44 }
 0x98d   :  { %vm2250_vm4 = vcmp.ge.f32.partialorder %v2249_v16, 0.0  ;;  %v2251_v49 = vmul.f32 0.01, %v2249_v16 }
 0x98f   :  { %v2252_v36 = vsel %vm2250_vm4, %v2249_v16, %v2251_v49 }
 0x990   :  { %3093 = vmatpush3.msk.msra.mxu1 %vm4964_vm8, %v2252_v36 }
 0x991   :  { %3095 = vmatmul.mubr.msk.f32.vlgmr.msra.gmra.mrb[24].mxu1 %vm859_vm13, %v2402_v7  ;;  %3199 = vmatprep.subr.bf16.mxu1 %v3723_v6 }
 0x992   :  { %3164 = vmatprep.mubr.msk.f32.mxu1 %vm4939_vm15, %v3720_v0  ;;  %3201 = vmatpush3.bf16.msra.mxu1 %v3200_v27  ;;  %v2578_v0 = vld [vmem:[#allocation19 + $0x40] sm:$0xff] }
 0x993   :  { %3202 = vmatprep.subr.bf16.mxu1 %v3723_v6  ;;  %v3212_v34 = vpack.c.bf16 %v2579_v3, %v2578_v0 }
 0x996   :  { %3204 = vmatpush3.bf16.msra.mxu1 %v3203_v22 }
 0x997   :  { %3205 = vmatprep.subr.bf16.mxu1 %v3723_v6 }
 0x99a   :  { %3207 = vmatpush3.bf16.msra.mxu1 %v3206_v54 }
 0x99b   :  { %3208 = vmatprep.subr.bf16.mxu1 %v3723_v6 }
 0x99e   :  { %3210 = vmatpush3.bf16.msra.mxu1 %v3209_v11 }
 0x99f   :  { %3211 = vmatprep.subr.bf16.mxu1 %v3723_v6 }
 0x9a2   :  { %3213 = vmatpush3.bf16.msra.mxu1 %v3212_v34 }
 0x9a3   :  { %3214 = vmatprep.subr.bf16.mxu1 %v3723_v6 }
 0x9a6   :  { %3216 = vmatpush3.bf16.msra.mxu1 %v3215_v42 }
 0x9a7   :  { %3217 = vmatprep.subr.bf16.mxu1 %v3723_v6 }
 0x9aa   :  { %3219 = vmatpush3.bf16.msra.mxu1 %v3218_v10 }
 0x9ab   :  { %3220 = vmatprep.subr.bf16.mxu1 %v3723_v6 }
 0x9ae   :  { %3222 = vmatpush3.bf16.msra.mxu1 %v3221_v41 }
 0xa64   :  { %v2472_v33 = vpop.f32.mrb[24].mxu1 }
 0xa65   :  { %v3096_v59 = vpop.f32.mrb[25].mxu1  ;;  %3130 = vmatmul.mubr.f32.vlgmr.msra.gmra.mrb[24].mxu0 %v2472_v33 }
 0xb38   :  { %v2566_v5 = vpop.f32.mrb[24].mxu0 }
 0xb39   :  { %v2567_v55 = vadd.f32 %v2736_v21, %v2566_v5  ;;  %v3131_v28 = vpop.f32.mrb[25].mxu0 }
 0xb3b   :  { %3165 = vmatmul.mubr.f32.vlgmr.msra.gmra.mrb[26].mxu1 %v2567_v55 }
 0xc0e   :  { %v2659_v6 = vpop.f32.mrb[26].mxu1 }
 0xc0f   :  { %v2660_v57 = vadd.f32 %v2737_v60, %v2659_v6  ;;  %v3166_v30 = vpop.f32.mrb[27].mxu1 }
 0xc11   :  { %2663 = vst [vmem:[#allocation20] sm:$0xff] %v2660_v57 }
 0xc12   :  { %3678 = shalt.err (!%p3675_p8)
}
 0xc13   :  { %s4967_s28 = sld [smem:[#allocation39_spill]] }
 0xc19   :  { %s3679_s11 = scalar_lea.hbm %s4967_s28, 128 }
 0xc1a   :  { %p3680_p9 = scmp.ne.s32.totalorder %s4967_s28, %s3679_s11  ;;  %p3683_p10 = scmp.lt.u32.totalorder %s3679_s11, %s4967_s28 }
 0xc1c   :  { %p3685_p11 = pnand %p3683_p10, %p3680_p9 }
 0xc1e   :  { %3688 = shalt.err (!%p3685_p11)
}
 0xc1f   :  { %2673 = dma.vmem_to_hbm [thread:$0]  %s2671_s1, 128, %s4967_s28, [#allocation4]  }
 0xc20   :  { %3701 = dma.done.wait [#allocation4], 128  }
 0xc21   :  { %3702 = vsyncadd [#allocation4], 4294967168 }
 0xc22   :  { %2677 = vsyncpa [#allocation3], 1 }
 0xc23   :  { %2678 = vsyncpa [#allocation6], 1 }
 0xc24   :  { %2679 = vsyncpa [#allocation9], 1 }
 0xc25   :  { %2680 = vsyncpa [#allocation12], 1 }
 0xc26   :  { %2681 = vsyncpa [#allocation15], 1 }
 0xc27   :  { %2682 = vsyncpa [#allocation18], 1 }
 0xc28   :  { %2683 = vsyncpa [#allocation4], 1 }

</bundles_post_ra>
